<compile_context>
chip_gen: v7x
topology: tpu7x:2x2x1
jax: 0.10.0
libtpu: 0.0.40
codegen_flags: <defaults>
</compile_context>

<pallas_src>
import functools

import jax
import jax.numpy as jnp
from jax import lax
from jax.experimental import pallas as pl
from jax.experimental.pallas import tpu as pltpu


def _round_up(x, m):
    return ((x + m - 1) // m) * m


def _full_spec(shape):
    # Whole array as one block; index_map gets (grid_i, captions_smem_ref).
    zeros = (0,) * len(shape)
    return pl.BlockSpec(shape, lambda i, cap, _z=zeros: _z)


# ---------------------------------------------------------------------------
# Fused kernel: resize+BN -> embed gather -> multi-layer tanh RNN -> Linear(H->V)
# ---------------------------------------------------------------------------
def make_decoder_kernel(B, B_p, T, num_layers):
    S = T + 1

    def kernel(*refs):
        cap_ref = refs[0]                      # SMEM (B_p*T,) int32, scalar-prefetched
        feat_ref = refs[1]                     # (B_p, 2048)
        rs_w_ref, rs_b_ref = refs[2], refs[3]  # (2048, E_p), (1, E_p)
        g_ref, beta_ref = refs[4], refs[5]     # (1, E_p), (1, E_p)
        emb_ref = refs[6]                      # (V_p, E_p)
        rnn_refs = [(refs[7 + 2 * l], refs[8 + 2 * l]) for l in range(num_layers)]
        lin_w_ref = refs[7 + 2 * num_layers]   # (H_p, V_p)
        lin_b_ref = refs[8 + 2 * num_layers]   # (1, V_p)
        out_ref = refs[9 + 2 * num_layers]     # (S*B_p, V_p)

        H_p = rnn_refs[0][0].shape[1]

        # ---- resize Linear(2048->E) + BatchNorm1d (train-mode stats over B real rows)
        y = (jnp.dot(feat_ref[...], rs_w_ref[...],
                     preferred_element_type=jnp.float32) + rs_b_ref[...])
        row = lax.broadcasted_iota(jnp.int32, y.shape, 0)
        valid = (row < B).astype(jnp.float32)                 # mask out padded rows
        inv_b = 1.0 / float(B)
        mean = jnp.sum(y * valid, axis=0, keepdims=True) * inv_b
        var = jnp.sum(jnp.square(y - mean) * valid, axis=0, keepdims=True) * inv_b
        x0 = ((y - mean) * lax.rsqrt(var + 1e-5)) * g_ref[...] + beta_ref[...]

        # ---- RNN: time-outer / layer-inner, fully unrolled (S static, small)
        h = [jnp.zeros((B_p, H_p), jnp.float32) for _ in range(num_layers)]
        top = []
        for t in range(S):
            if t == 0:
                x = x0                                         # image feature step
            else:
                # embedding gather: one dynamic-row slice per batch element
                rows = [emb_ref[pl.ds(cap_ref[b * T + (t - 1)], 1), :]
                        for b in range(B_p)]
                x = jnp.concatenate(rows, axis=0)              # (B_p, E_p)
            for l in range(num_layers):
                w_ref, b_ref = rnn_refs[l]
                xin = jnp.concatenate([x, h[l]], axis=1)       # (B_p, in_p + H_p)
                h[l] = jnp.tanh(
                    jnp.dot(xin, w_ref[...],
                            preferred_element_type=jnp.float32) + b_ref[...])
                x = h[l]
            top.append(x)                                      # last layer's hidden

        # ---- Linear(H->V) on all S*B_p rows in one MXU matmul (lane-dense output)
        hs = jnp.concatenate(top, axis=0)                      # (S*B_p, H_p)
        out_ref[...] = (jnp.dot(hs, lin_w_ref[...],
                                preferred_element_type=jnp.float32)
                        + lin_b_ref[...])

    return kernel


# ---------------------------------------------------------------------------
# Packed-sequence index helper (pack_padded_sequence order, batch_first=True)
# ---------------------------------------------------------------------------
def packed_indices(lengths):
    # lengths must be sorted descending (torch enforce_sorted=True default).
    t_idx, b_idx = [], []
    max_len = max(lengths)
    for t in range(max_len):
        for b, ln in enumerate(lengths):
            if ln > t:
                t_idx.append(t)
                b_idx.append(b)
    return jnp.asarray(t_idx, jnp.int32), jnp.asarray(b_idx, jnp.int32)


# ---------------------------------------------------------------------------
# Full DecoderRNN.forward (one fused pallas_call + tiny post-gather)
# ---------------------------------------------------------------------------
def decoder_forward(features, captions, lengths, params):
    B, _ = features.shape
    T = captions.shape[1]
    S = T + 1
    B_p = _round_up(max(B, 1), 8)
    E_p = params["resize_w_t"].shape[1]
    H_p = params["rnn_layers"][0][0].shape[1]
    V_p = params["lin_w_t"].shape[1]
    V = params["vocab_size"]
    num_layers = len(params["rnn_layers"])

    feat_p = jnp.pad(features.astype(jnp.float32), ((0, B_p - B), (0, 0)))
    cap_p = jnp.pad(captions.astype(jnp.int32), ((0, B_p - B), (0, 0))).reshape(-1)

    args = [cap_p, feat_p,
            params["resize_w_t"], params["resize_b"],
            params["bn_gamma"], params["bn_beta"],
            params["embed_w"]]
    for (w_stk, b) in params["rnn_layers"]:
        args += [w_stk, b]
    args += [params["lin_w_t"], params["lin_b"]]

    kernel = make_decoder_kernel(B=B, B_p=B_p, T=T, num_layers=num_layers)

    out_full = pl.pallas_call(
        kernel,
        out_shape=jax.ShapeDtypeStruct((S * B_p, V_p), jnp.float32),
        grid_spec=pltpu.PrefetchScalarGridSpec(
            num_scalar_prefetch=1,
            grid=(1,),
            in_specs=[_full_spec(a.shape) for a in args[1:]],
            out_specs=_full_spec((S * B_p, V_p)),
        ),
    )(*args)                                                   # (S*B_p, V_p)

    # pack_padded_sequence ordering: gather valid (t, b) rows, drop vocab padding.
    t_idx, b_idx = packed_indices(lengths)
    rows = t_idx * B_p + b_idx
    return out_full[rows, :V]                                  # (N, V)


# ---------------------------------------------------------------------------
# Pure-JAX reference (mirrors the PyTorch module) for a correctness check
# ---------------------------------------------------------------------------
def reference_forward(features, captions, lengths, raw):
    im = features @ raw["resize_w"].T + raw["resize_b"]
    mean = jnp.mean(im, axis=0, keepdims=True)
    var = jnp.mean(jnp.square(im - mean), axis=0, keepdims=True)
    im = (im - mean) * lax.rsqrt(var + 1e-5) * raw["bn_gamma"] + raw["bn_beta"]
    emb = raw["embed_w"][captions]                              # (B, T, E)
    seq = jnp.concatenate([im[:, None, :], emb], axis=1)        # (B, S, E)
    x = jnp.transpose(seq, (1, 0, 2))                           # (S, B, E)
    for (w_ih, w_hh, b_ih, b_hh) in raw["rnn"]:
        S_, B_, _ = x.shape
        h = jnp.zeros((B_, w_hh.shape[0]), jnp.float32)
        outs = []
        for t in range(S_):
            h = jnp.tanh(x[t] @ w_ih.T + h @ w_hh.T + b_ih + b_hh)
            outs.append(h)
        x = jnp.stack(outs, axis=0)
    t_idx, b_idx = packed_indices(lengths)
    packed = x[t_idx, b_idx]
    return packed @ raw["lin_w"].T + raw["lin_b"]


# ---------------------------------------------------------------------------
if __name__ == "__main__":
    FEAT = 2048
    B, T = 2, 8
    S = T + 1
    E = 32           # embed_size
    H = 32           # hidden_size
    V = 40           # vocab_size
    NUM_LAYERS = 2
    lengths = (9, 6)    # descending, <= S; N = 15

    E_p = _round_up(E, 128)
    H_p = _round_up(H, 128)
    V_p = _round_up(V, 128)

    key = jax.random.PRNGKey(0)
    ks = jax.random.split(key, 16 + 4 * NUM_LAYERS)

    features = jax.random.normal(ks[0], (B, FEAT), jnp.float32)
    captions = jax.random.randint(ks[1], (B, T), 0, V, jnp.int32)

    def u(k, shape, scale):
        return jax.random.uniform(k, shape, jnp.float32, -scale, scale)

    # PyTorch-shaped parameters
    resize_w = u(ks[2], (E, FEAT), 1.0 / jnp.sqrt(FEAT))        # nn.Linear(2048, E)
    resize_b = u(ks[3], (E,), 1.0 / jnp.sqrt(FEAT))
    bn_gamma = 1.0 + 0.1 * jax.random.normal(ks[4], (E,), jnp.float32)
    bn_beta = 0.1 * jax.random.normal(ks[5], (E,), jnp.float32)
    embed_w = jax.random.normal(ks[6], (V, E), jnp.float32)     # nn.Embedding(V, E)

    rnn_raw = []
    for l in range(NUM_LAYERS):
        in_dim = E if l == 0 else H
        kw = ks[7 + 4 * l: 11 + 4 * l]
        sc = 1.0 / jnp.sqrt(H)
        rnn_raw.append((u(kw[0], (H, in_dim), sc),              # weight_ih_l{l}
                        u(kw[1], (H, H), sc),                   # weight_hh_l{l}
                        u(kw[2], (H,), sc),                     # bias_ih_l{l}
                        u(kw[3], (H,), sc)))                    # bias_hh_l{l}

    lin_w = u(ks[7 + 4 * NUM_LAYERS], (V, H), 1.0 / jnp.sqrt(H))  # nn.Linear(H, V)
    lin_b = u(ks[8 + 4 * NUM_LAYERS], (V,), 1.0 / jnp.sqrt(H))

    # Zero-pad to lane-dense (128) / sublane-dense layouts; pre-transpose & stack
    # [W_ih; W_hh] per layer so each timestep needs a single MXU matmul.
    def pad2(x, r, c):
        return jnp.pad(x, ((0, r - x.shape[0]), (0, c - x.shape[1])))

    def pad_row(x, c):
        return jnp.pad(x, (0, c - x.shape[0]))[None, :]

    rnn_layers = []
    for l, (w_ih, w_hh, b_ih, b_hh) in enumerate(rnn_raw):
        in_p = E_p if l == 0 else H_p
        w_stk = jnp.concatenate([pad2(w_ih.T, in_p, H_p),
                                 pad2(w_hh.T, H_p, H_p)], axis=0)   # (in_p+H_p, H_p)
        rnn_layers.append((w_stk, pad_row(b_ih + b_hh, H_p)))

    params = dict(
        resize_w_t=pad2(resize_w.T, FEAT, E_p),
        resize_b=pad_row(resize_b, E_p),
        bn_gamma=pad_row(bn_gamma, E_p),
        bn_beta=pad_row(bn_beta, E_p),
        embed_w=pad2(embed_w, V_p, E_p),
        rnn_layers=rnn_layers,
        lin_w_t=pad2(lin_w.T, H_p, V_p),
        lin_b=pad_row(lin_b, V_p),
        vocab_size=V,
    )

    fwd = jax.jit(functools.partial(decoder_forward, lengths=lengths, params=params))
    out = fwd(features, captions)
    jax.block_until_ready(out)

    assert out.shape == (sum(lengths), V), out.shape
    assert jnp.all(jnp.isfinite(out))

    raw = dict(resize_w=resize_w, resize_b=resize_b, bn_gamma=bn_gamma,
               bn_beta=bn_beta, embed_w=embed_w, rnn=rnn_raw,
               lin_w=lin_w, lin_b=lin_b)
    ref = reference_forward(features, captions, lengths, raw)
    err = float(jnp.max(jnp.abs(out - ref)))
    assert err < 2e-3, f"max abs diff vs reference: {err}"

    # TODO(synk): eval-mode BatchNorm (running stats) not implemented; train-mode
    # batch statistics are used, matching the PyTorch module's default training path.
    print("KERNEL_OK")
</pallas_src>

<mosaic_0001>
module attributes {stable_mosaic.version = 11 : i64} {
  func.func @kernel(%arg0: i32, %arg1: memref<64xi32, #tpu.memory_space<smem>>, %arg2: memref<8x2048xf32, #tpu.memory_space<vmem>>, %arg3: memref<2048x128xf32, #tpu.memory_space<vmem>>, %arg4: memref<1x128xf32, #tpu.memory_space<vmem>>, %arg5: memref<1x128xf32, #tpu.memory_space<vmem>>, %arg6: memref<1x128xf32, #tpu.memory_space<vmem>>, %arg7: memref<128x128xf32, #tpu.memory_space<vmem>>, %arg8: memref<256x128xf32, #tpu.memory_space<vmem>>, %arg9: memref<1x128xf32, #tpu.memory_space<vmem>>, %arg10: memref<256x128xf32, #tpu.memory_space<vmem>>, %arg11: memref<1x128xf32, #tpu.memory_space<vmem>>, %arg12: memref<128x128xf32, #tpu.memory_space<vmem>>, %arg13: memref<1x128xf32, #tpu.memory_space<vmem>>, %arg14: memref<72x128xf32, #tpu.memory_space<vmem>>) attributes {dimension_semantics = [#tpu.dimension_semantics<arbitrary>], iteration_bounds = array<i64: 1>, scalar_prefetch = 1 : i64, scratch_operands = 0 : i64, tpu.core_type = #tpu.core_type<tc>, window_params = [{pipeline_mode = #tpu.pipeline_mode<synchronous>, transform_indices = @transform_0, window_bounds = array<i64: 8, 2048>}, {pipeline_mode = #tpu.pipeline_mode<synchronous>, transform_indices = @transform_1, window_bounds = array<i64: 2048, 128>}, {pipeline_mode = #tpu.pipeline_mode<synchronous>, transform_indices = @transform_2, window_bounds = array<i64: 1, 128>}, {pipeline_mode = #tpu.pipeline_mode<synchronous>, transform_indices = @transform_3, window_bounds = array<i64: 1, 128>}, {pipeline_mode = #tpu.pipeline_mode<synchronous>, transform_indices = @transform_4, window_bounds = array<i64: 1, 128>}, {pipeline_mode = #tpu.pipeline_mode<synchronous>, transform_indices = @transform_5, window_bounds = array<i64: 128, 128>}, {pipeline_mode = #tpu.pipeline_mode<synchronous>, transform_indices = @transform_6, window_bounds = array<i64: 256, 128>}, {pipeline_mode = #tpu.pipeline_mode<synchronous>, transform_indices = @transform_7, window_bounds = array<i64: 1, 128>}, {pipeline_mode = #tpu.pipeline_mode<synchronous>, transform_indices = @transform_8, window_bounds = array<i64: 256, 128>}, {pipeline_mode = #tpu.pipeline_mode<synchronous>, transform_indices = @transform_9, window_bounds = array<i64: 1, 128>}, {pipeline_mode = #tpu.pipeline_mode<synchronous>, transform_indices = @transform_10, window_bounds = array<i64: 128, 128>}, {pipeline_mode = #tpu.pipeline_mode<synchronous>, transform_indices = @transform_11, window_bounds = array<i64: 1, 128>}, {pipeline_mode = #tpu.pipeline_mode<synchronous>, transform_indices = @transform_12, window_bounds = array<i64: 72, 128>}]} {
    %c0 = arith.constant 0 : index
    %c0_0 = arith.constant 0 : index
    %0 = vector.load %arg2[%c0, %c0_0] : memref<8x2048xf32, #tpu.memory_space<vmem>>, vector<8x2048xf32>
    %c0_1 = arith.constant 0 : index
    %c0_2 = arith.constant 0 : index
    %1 = vector.load %arg3[%c0_1, %c0_2] : memref<2048x128xf32, #tpu.memory_space<vmem>>, vector<2048x128xf32>
    %cst = arith.constant dense<0.000000e+00> : vector<8x128xf32>
    %2 = tpu.matmul %0, %1, %cst {dimension_numbers = #tpu.dot_dimension_numbers<[1], [0], [0], [1], [0, 0, 1, 1], [], []>} : vector<8x2048xf32>, vector<2048x128xf32>, vector<8x128xf32> -> vector<8x128xf32>
    %c0_3 = arith.constant 0 : index
    %c0_4 = arith.constant 0 : index
    %3 = vector.load %arg4[%c0_3, %c0_4] : memref<1x128xf32, #tpu.memory_space<vmem>>, vector<1x128xf32>
    %4 = vector.broadcast %3 : vector<1x128xf32> to vector<8x128xf32>
    %5 = arith.addf %2, %4 : vector<8x128xf32>
    %6 = tpu.iota {dimensions = array<i32: 0>} : vector<8x128xi32>
    %c2_i32 = arith.constant 2 : i32
    %7 = vector.broadcast %c2_i32 : i32 to vector<8x128xi32>
    %8 = arith.cmpi slt, %6, %7 : vector<8x128xi32>
    %9 = arith.extui %8 : vector<8x128xi1> to vector<8x128xi32>
    %10 = arith.sitofp %9 : vector<8x128xi32> to vector<8x128xf32>
    %11 = arith.mulf %5, %10 : vector<8x128xf32>
    %cst_5 = arith.constant dense<0.000000e+00> : vector<128xf32>
    %12 = vector.multi_reduction <add>, %11, %cst_5 [0] : vector<8x128xf32> to vector<128xf32>
    %13 = vector.shape_cast %12 : vector<128xf32> to vector<1x128xf32>
    %cst_6 = arith.constant 5.000000e-01 : f32
    %14 = vector.broadcast %cst_6 : f32 to vector<1x128xf32>
    %15 = arith.mulf %13, %14 : vector<1x128xf32>
    %16 = vector.broadcast %15 : vector<1x128xf32> to vector<8x128xf32>
    %17 = arith.subf %5, %16 : vector<8x128xf32>
    %18 = arith.mulf %17, %17 : vector<8x128xf32>
    %19 = arith.mulf %18, %10 : vector<8x128xf32>
    %cst_7 = arith.constant dense<0.000000e+00> : vector<128xf32>
    %20 = vector.multi_reduction <add>, %19, %cst_7 [0] : vector<8x128xf32> to vector<128xf32>
    %21 = vector.shape_cast %20 : vector<128xf32> to vector<1x128xf32>
    %cst_8 = arith.constant 5.000000e-01 : f32
    %22 = vector.broadcast %cst_8 : f32 to vector<1x128xf32>
    %23 = arith.mulf %21, %22 : vector<1x128xf32>
    %24 = vector.broadcast %15 : vector<1x128xf32> to vector<8x128xf32>
    %25 = arith.subf %5, %24 : vector<8x128xf32>
    %cst_9 = arith.constant 9.99999974E-6 : f32
    %26 = vector.broadcast %cst_9 : f32 to vector<1x128xf32>
    %27 = arith.addf %23, %26 : vector<1x128xf32>
    %28 = math.rsqrt %27 : vector<1x128xf32>
    %29 = vector.broadcast %28 : vector<1x128xf32> to vector<8x128xf32>
    %30 = arith.mulf %25, %29 : vector<8x128xf32>
    %c0_10 = arith.constant 0 : index
    %c0_11 = arith.constant 0 : index
    %31 = vector.load %arg5[%c0_10, %c0_11] : memref<1x128xf32, #tpu.memory_space<vmem>>, vector<1x128xf32>
    %32 = vector.broadcast %31 : vector<1x128xf32> to vector<8x128xf32>
    %33 = arith.mulf %30, %32 : vector<8x128xf32>
    %c0_12 = arith.constant 0 : index
    %c0_13 = arith.constant 0 : index
    %34 = vector.load %arg6[%c0_12, %c0_13] : memref<1x128xf32, #tpu.memory_space<vmem>>, vector<1x128xf32>
    %35 = vector.broadcast %34 : vector<1x128xf32> to vector<8x128xf32>
    %36 = arith.addf %33, %35 : vector<8x128xf32>
    %cst_14 = arith.constant 0.000000e+00 : f32
    %37 = vector.broadcast %cst_14 : f32 to vector<8x128xf32>
    %cst_15 = arith.constant 0.000000e+00 : f32
    %38 = vector.broadcast %cst_15 : f32 to vector<8x128xf32>
    %39 = tpu.concatenate %36, %37 in 1 : vector<8x128xf32>, vector<8x128xf32> -> vector<8x256xf32>
    %c0_16 = arith.constant 0 : index
    %c0_17 = arith.constant 0 : index
    %40 = vector.load %arg8[%c0_16, %c0_17] : memref<256x128xf32, #tpu.memory_space<vmem>>, vector<256x128xf32>
    %cst_18 = arith.constant dense<0.000000e+00> : vector<8x128xf32>
    %41 = tpu.matmul %39, %40, %cst_18 {dimension_numbers = #tpu.dot_dimension_numbers<[1], [0], [0], [1], [0, 0, 1, 1], [], []>} : vector<8x256xf32>, vector<256x128xf32>, vector<8x128xf32> -> vector<8x128xf32>
    %c0_19 = arith.constant 0 : index
    %c0_20 = arith.constant 0 : index
    %42 = vector.load %arg9[%c0_19, %c0_20] : memref<1x128xf32, #tpu.memory_space<vmem>>, vector<1x128xf32>
    %43 = vector.broadcast %42 : vector<1x128xf32> to vector<8x128xf32>
    %44 = arith.addf %41, %43 : vector<8x128xf32>
    %45 = math.tanh %44 : vector<8x128xf32>
    %46 = tpu.concatenate %45, %38 in 1 : vector<8x128xf32>, vector<8x128xf32> -> vector<8x256xf32>
    %c0_21 = arith.constant 0 : index
    %c0_22 = arith.constant 0 : index
    %47 = vector.load %arg10[%c0_21, %c0_22] : memref<256x128xf32, #tpu.memory_space<vmem>>, vector<256x128xf32>
    %cst_23 = arith.constant dense<0.000000e+00> : vector<8x128xf32>
    %48 = tpu.matmul %46, %47, %cst_23 {dimension_numbers = #tpu.dot_dimension_numbers<[1], [0], [0], [1], [0, 0, 1, 1], [], []>} : vector<8x256xf32>, vector<256x128xf32>, vector<8x128xf32> -> vector<8x128xf32>
    %c0_24 = arith.constant 0 : index
    %c0_25 = arith.constant 0 : index
    %49 = vector.load %arg11[%c0_24, %c0_25] : memref<1x128xf32, #tpu.memory_space<vmem>>, vector<1x128xf32>
    %50 = vector.broadcast %49 : vector<1x128xf32> to vector<8x128xf32>
    %51 = arith.addf %48, %50 : vector<8x128xf32>
    %52 = math.tanh %51 : vector<8x128xf32>
    %c0_26 = arith.constant 0 : index
    %53 = memref.load %arg1[%c0_26] : memref<64xi32, #tpu.memory_space<smem>>
    %54 = arith.index_cast %53 : i32 to index
    %c0_27 = arith.constant 0 : index
    %55 = vector.load %arg7[%54, %c0_27] : memref<128x128xf32, #tpu.memory_space<vmem>>, vector<1x128xf32>
    %c8 = arith.constant 8 : index
    %56 = memref.load %arg1[%c8] : memref<64xi32, #tpu.memory_space<smem>>
    %57 = arith.index_cast %56 : i32 to index
    %c0_28 = arith.constant 0 : index
    %58 = vector.load %arg7[%57, %c0_28] : memref<128x128xf32, #tpu.memory_space<vmem>>, vector<1x128xf32>
    %c16 = arith.constant 16 : index
    %59 = memref.load %arg1[%c16] : memref<64xi32, #tpu.memory_space<smem>>
    %60 = arith.index_cast %59 : i32 to index
    %c0_29 = arith.constant 0 : index
    %61 = vector.load %arg7[%60, %c0_29] : memref<128x128xf32, #tpu.memory_space<vmem>>, vector<1x128xf32>
    %c24 = arith.constant 24 : index
    %62 = memref.load %arg1[%c24] : memref<64xi32, #tpu.memory_space<smem>>
    %63 = arith.index_cast %62 : i32 to index
    %c0_30 = arith.constant 0 : index
    %64 = vector.load %arg7[%63, %c0_30] : memref<128x128xf32, #tpu.memory_space<vmem>>, vector<1x128xf32>
    %c32 = arith.constant 32 : index
    %65 = memref.load %arg1[%c32] : memref<64xi32, #tpu.memory_space<smem>>
    %66 = arith.index_cast %65 : i32 to index
    %c0_31 = arith.constant 0 : index
    %67 = vector.load %arg7[%66, %c0_31] : memref<128x128xf32, #tpu.memory_space<vmem>>, vector<1x128xf32>
    %c40 = arith.constant 40 : index
    %68 = memref.load %arg1[%c40] : memref<64xi32, #tpu.memory_space<smem>>
    %69 = arith.index_cast %68 : i32 to index
    %c0_32 = arith.constant 0 : index
    %70 = vector.load %arg7[%69, %c0_32] : memref<128x128xf32, #tpu.memory_space<vmem>>, vector<1x128xf32>
    %c48 = arith.constant 48 : index
    %71 = memref.load %arg1[%c48] : memref<64xi32, #tpu.memory_space<smem>>
    %72 = arith.index_cast %71 : i32 to index
    %c0_33 = arith.constant 0 : index
    %73 = vector.load %arg7[%72, %c0_33] : memref<128x128xf32, #tpu.memory_space<vmem>>, vector<1x128xf32>
    %c56 = arith.constant 56 : index
    %74 = memref.load %arg1[%c56] : memref<64xi32, #tpu.memory_space<smem>>
    %75 = arith.index_cast %74 : i32 to index
    %c0_34 = arith.constant 0 : index
    %76 = vector.load %arg7[%75, %c0_34] : memref<128x128xf32, #tpu.memory_space<vmem>>, vector<1x128xf32>
    %77 = tpu.concatenate %55, %58, %61, %64, %67, %70, %73, %76 in 0 : vector<1x128xf32>, vector<1x128xf32>, vector<1x128xf32>, vector<1x128xf32>, vector<1x128xf32>, vector<1x128xf32>, vector<1x128xf32>, vector<1x128xf32> -> vector<8x128xf32>
    %78 = tpu.concatenate %77, %45 in 1 : vector<8x128xf32>, vector<8x128xf32> -> vector<8x256xf32>
    %c0_35 = arith.constant 0 : index
    %c0_36 = arith.constant 0 : index
    %79 = vector.load %arg8[%c0_35, %c0_36] : memref<256x128xf32, #tpu.memory_space<vmem>>, vector<256x128xf32>
    %cst_37 = arith.constant dense<0.000000e+00> : vector<8x128xf32>
    %80 = tpu.matmul %78, %79, %cst_37 {dimension_numbers = #tpu.dot_dimension_numbers<[1], [0], [0], [1], [0, 0, 1, 1], [], []>} : vector<8x256xf32>, vector<256x128xf32>, vector<8x128xf32> -> vector<8x128xf32>
    %c0_38 = arith.constant 0 : index
    %c0_39 = arith.constant 0 : index
    %81 = vector.load %arg9[%c0_38, %c0_39] : memref<1x128xf32, #tpu.memory_space<vmem>>, vector<1x128xf32>
    %82 = vector.broadcast %81 : vector<1x128xf32> to vector<8x128xf32>
    %83 = arith.addf %80, %82 : vector<8x128xf32>
    %84 = math.tanh %83 : vector<8x128xf32>
    %85 = tpu.concatenate %84, %52 in 1 : vector<8x128xf32>, vector<8x128xf32> -> vector<8x256xf32>
    %c0_40 = arith.constant 0 : index
    %c0_41 = arith.constant 0 : index
    %86 = vector.load %arg10[%c0_40, %c0_41] : memref<256x128xf32, #tpu.memory_space<vmem>>, vector<256x128xf32>
    %cst_42 = arith.constant dense<0.000000e+00> : vector<8x128xf32>
    %87 = tpu.matmul %85, %86, %cst_42 {dimension_numbers = #tpu.dot_dimension_numbers<[1], [0], [0], [1], [0, 0, 1, 1], [], []>} : vector<8x256xf32>, vector<256x128xf32>, vector<8x128xf32> -> vector<8x128xf32>
    %c0_43 = arith.constant 0 : index
    %c0_44 = arith.constant 0 : index
    %88 = vector.load %arg11[%c0_43, %c0_44] : memref<1x128xf32, #tpu.memory_space<vmem>>, vector<1x128xf32>
    %89 = vector.broadcast %88 : vector<1x128xf32> to vector<8x128xf32>
    %90 = arith.addf %87, %89 : vector<8x128xf32>
    %91 = math.tanh %90 : vector<8x128xf32>
    %c1 = arith.constant 1 : index
    %92 = memref.load %arg1[%c1] : memref<64xi32, #tpu.memory_space<smem>>
    %93 = arith.index_cast %92 : i32 to index
    %c0_45 = arith.constant 0 : index
    %94 = vector.load %arg7[%93, %c0_45] : memref<128x128xf32, #tpu.memory_space<vmem>>, vector<1x128xf32>
    %c9 = arith.constant 9 : index
    %95 = memref.load %arg1[%c9] : memref<64xi32, #tpu.memory_space<smem>>
    %96 = arith.index_cast %95 : i32 to index
    %c0_46 = arith.constant 0 : index
    %97 = vector.load %arg7[%96, %c0_46] : memref<128x128xf32, #tpu.memory_space<vmem>>, vector<1x128xf32>
    %c17 = arith.constant 17 : index
    %98 = memref.load %arg1[%c17] : memref<64xi32, #tpu.memory_space<smem>>
    %99 = arith.index_cast %98 : i32 to index
    %c0_47 = arith.constant 0 : index
    %100 = vector.load %arg7[%99, %c0_47] : memref<128x128xf32, #tpu.memory_space<vmem>>, vector<1x128xf32>
    %c25 = arith.constant 25 : index
    %101 = memref.load %arg1[%c25] : memref<64xi32, #tpu.memory_space<smem>>
    %102 = arith.index_cast %101 : i32 to index
    %c0_48 = arith.constant 0 : index
    %103 = vector.load %arg7[%102, %c0_48] : memref<128x128xf32, #tpu.memory_space<vmem>>, vector<1x128xf32>
    %c33 = arith.constant 33 : index
    %104 = memref.load %arg1[%c33] : memref<64xi32, #tpu.memory_space<smem>>
    %105 = arith.index_cast %104 : i32 to index
    %c0_49 = arith.constant 0 : index
    %106 = vector.load %arg7[%105, %c0_49] : memref<128x128xf32, #tpu.memory_space<vmem>>, vector<1x128xf32>
    %c41 = arith.constant 41 : index
    %107 = memref.load %arg1[%c41] : memref<64xi32, #tpu.memory_space<smem>>
    %108 = arith.index_cast %107 : i32 to index
    %c0_50 = arith.constant 0 : index
    %109 = vector.load %arg7[%108, %c0_50] : memref<128x128xf32, #tpu.memory_space<vmem>>, vector<1x128xf32>
    %c49 = arith.constant 49 : index
    %110 = memref.load %arg1[%c49] : memref<64xi32, #tpu.memory_space<smem>>
    %111 = arith.index_cast %110 : i32 to index
    %c0_51 = arith.constant 0 : index
    %112 = vector.load %arg7[%111, %c0_51] : memref<128x128xf32, #tpu.memory_space<vmem>>, vector<1x128xf32>
    %c57 = arith.constant 57 : index
    %113 = memref.load %arg1[%c57] : memref<64xi32, #tpu.memory_space<smem>>
    %114 = arith.index_cast %113 : i32 to index
    %c0_52 = arith.constant 0 : index
    %115 = vector.load %arg7[%114, %c0_52] : memref<128x128xf32, #tpu.memory_space<vmem>>, vector<1x128xf32>
    %116 = tpu.concatenate %94, %97, %100, %103, %106, %109, %112, %115 in 0 : vector<1x128xf32>, vector<1x128xf32>, vector<1x128xf32>, vector<1x128xf32>, vector<1x128xf32>, vector<1x128xf32>, vector<1x128xf32>, vector<1x128xf32> -> vector<8x128xf32>
    %117 = tpu.concatenate %116, %84 in 1 : vector<8x128xf32>, vector<8x128xf32> -> vector<8x256xf32>
    %c0_53 = arith.constant 0 : index
    %c0_54 = arith.constant 0 : index
    %118 = vector.load %arg8[%c0_53, %c0_54] : memref<256x128xf32, #tpu.memory_space<vmem>>, vector<256x128xf32>
    %cst_55 = arith.constant dense<0.000000e+00> : vector<8x128xf32>
    %119 = tpu.matmul %117, %118, %cst_55 {dimension_numbers = #tpu.dot_dimension_numbers<[1], [0], [0], [1], [0, 0, 1, 1], [], []>} : vector<8x256xf32>, vector<256x128xf32>, vector<8x128xf32> -> vector<8x128xf32>
    %c0_56 = arith.constant 0 : index
    %c0_57 = arith.constant 0 : index
    %120 = vector.load %arg9[%c0_56, %c0_57] : memref<1x128xf32, #tpu.memory_space<vmem>>, vector<1x128xf32>
    %121 = vector.broadcast %120 : vector<1x128xf32> to vector<8x128xf32>
    %122 = arith.addf %119, %121 : vector<8x128xf32>
    %123 = math.tanh %122 : vector<8x128xf32>
    %124 = tpu.concatenate %123, %91 in 1 : vector<8x128xf32>, vector<8x128xf32> -> vector<8x256xf32>
    %c0_58 = arith.constant 0 : index
    %c0_59 = arith.constant 0 : index
    %125 = vector.load %arg10[%c0_58, %c0_59] : memref<256x128xf32, #tpu.memory_space<vmem>>, vector<256x128xf32>
    %cst_60 = arith.constant dense<0.000000e+00> : vector<8x128xf32>
    %126 = tpu.matmul %124, %125, %cst_60 {dimension_numbers = #tpu.dot_dimension_numbers<[1], [0], [0], [1], [0, 0, 1, 1], [], []>} : vector<8x256xf32>, vector<256x128xf32>, vector<8x128xf32> -> vector<8x128xf32>
    %c0_61 = arith.constant 0 : index
    %c0_62 = arith.constant 0 : index
    %127 = vector.load %arg11[%c0_61, %c0_62] : memref<1x128xf32, #tpu.memory_space<vmem>>, vector<1x128xf32>
    %128 = vector.broadcast %127 : vector<1x128xf32> to vector<8x128xf32>
    %129 = arith.addf %126, %128 : vector<8x128xf32>
    %130 = math.tanh %129 : vector<8x128xf32>
    %c2 = arith.constant 2 : index
    %131 = memref.load %arg1[%c2] : memref<64xi32, #tpu.memory_space<smem>>
    %132 = arith.index_cast %131 : i32 to index
    %c0_63 = arith.constant 0 : index
    %133 = vector.load %arg7[%132, %c0_63] : memref<128x128xf32, #tpu.memory_space<vmem>>, vector<1x128xf32>
    %c10 = arith.constant 10 : index
    %134 = memref.load %arg1[%c10] : memref<64xi32, #tpu.memory_space<smem>>
    %135 = arith.index_cast %134 : i32 to index
    %c0_64 = arith.constant 0 : index
    %136 = vector.load %arg7[%135, %c0_64] : memref<128x128xf32, #tpu.memory_space<vmem>>, vector<1x128xf32>
    %c18 = arith.constant 18 : index
    %137 = memref.load %arg1[%c18] : memref<64xi32, #tpu.memory_space<smem>>
    %138 = arith.index_cast %137 : i32 to index
    %c0_65 = arith.constant 0 : index
    %139 = vector.load %arg7[%138, %c0_65] : memref<128x128xf32, #tpu.memory_space<vmem>>, vector<1x128xf32>
    %c26 = arith.constant 26 : index
    %140 = memref.load %arg1[%c26] : memref<64xi32, #tpu.memory_space<smem>>
    %141 = arith.index_cast %140 : i32 to index
    %c0_66 = arith.constant 0 : index
    %142 = vector.load %arg7[%141, %c0_66] : memref<128x128xf32, #tpu.memory_space<vmem>>, vector<1x128xf32>
    %c34 = arith.constant 34 : index
    %143 = memref.load %arg1[%c34] : memref<64xi32, #tpu.memory_space<smem>>
    %144 = arith.index_cast %143 : i32 to index
    %c0_67 = arith.constant 0 : index
    %145 = vector.load %arg7[%144, %c0_67] : memref<128x128xf32, #tpu.memory_space<vmem>>, vector<1x128xf32>
    %c42 = arith.constant 42 : index
    %146 = memref.load %arg1[%c42] : memref<64xi32, #tpu.memory_space<smem>>
    %147 = arith.index_cast %146 : i32 to index
    %c0_68 = arith.constant 0 : index
    %148 = vector.load %arg7[%147, %c0_68] : memref<128x128xf32, #tpu.memory_space<vmem>>, vector<1x128xf32>
    %c50 = arith.constant 50 : index
    %149 = memref.load %arg1[%c50] : memref<64xi32, #tpu.memory_space<smem>>
    %150 = arith.index_cast %149 : i32 to index
    %c0_69 = arith.constant 0 : index
    %151 = vector.load %arg7[%150, %c0_69] : memref<128x128xf32, #tpu.memory_space<vmem>>, vector<1x128xf32>
    %c58 = arith.constant 58 : index
    %152 = memref.load %arg1[%c58] : memref<64xi32, #tpu.memory_space<smem>>
    %153 = arith.index_cast %152 : i32 to index
    %c0_70 = arith.constant 0 : index
    %154 = vector.load %arg7[%153, %c0_70] : memref<128x128xf32, #tpu.memory_space<vmem>>, vector<1x128xf32>
    %155 = tpu.concatenate %133, %136, %139, %142, %145, %148, %151, %154 in 0 : vector<1x128xf32>, vector<1x128xf32>, vector<1x128xf32>, vector<1x128xf32>, vector<1x128xf32>, vector<1x128xf32>, vector<1x128xf32>, vector<1x128xf32> -> vector<8x128xf32>
    %156 = tpu.concatenate %155, %123 in 1 : vector<8x128xf32>, vector<8x128xf32> -> vector<8x256xf32>
    %c0_71 = arith.constant 0 : index
    %c0_72 = arith.constant 0 : index
    %157 = vector.load %arg8[%c0_71, %c0_72] : memref<256x128xf32, #tpu.memory_space<vmem>>, vector<256x128xf32>
    %cst_73 = arith.constant dense<0.000000e+00> : vector<8x128xf32>
    %158 = tpu.matmul %156, %157, %cst_73 {dimension_numbers = #tpu.dot_dimension_numbers<[1], [0], [0], [1], [0, 0, 1, 1], [], []>} : vector<8x256xf32>, vector<256x128xf32>, vector<8x128xf32> -> vector<8x128xf32>
    %c0_74 = arith.constant 0 : index
    %c0_75 = arith.constant 0 : index
    %159 = vector.load %arg9[%c0_74, %c0_75] : memref<1x128xf32, #tpu.memory_space<vmem>>, vector<1x128xf32>
    %160 = vector.broadcast %159 : vector<1x128xf32> to vector<8x128xf32>
    %161 = arith.addf %158, %160 : vector<8x128xf32>
    %162 = math.tanh %161 : vector<8x128xf32>
    %163 = tpu.concatenate %162, %130 in 1 : vector<8x128xf32>, vector<8x128xf32> -> vector<8x256xf32>
    %c0_76 = arith.constant 0 : index
    %c0_77 = arith.constant 0 : index
    %164 = vector.load %arg10[%c0_76, %c0_77] : memref<256x128xf32, #tpu.memory_space<vmem>>, vector<256x128xf32>
    %cst_78 = arith.constant dense<0.000000e+00> : vector<8x128xf32>
    %165 = tpu.matmul %163, %164, %cst_78 {dimension_numbers = #tpu.dot_dimension_numbers<[1], [0], [0], [1], [0, 0, 1, 1], [], []>} : vector<8x256xf32>, vector<256x128xf32>, vector<8x128xf32> -> vector<8x128xf32>
    %c0_79 = arith.constant 0 : index
    %c0_80 = arith.constant 0 : index
    %166 = vector.load %arg11[%c0_79, %c0_80] : memref<1x128xf32, #tpu.memory_space<vmem>>, vector<1x128xf32>
    %167 = vector.broadcast %166 : vector<1x128xf32> to vector<8x128xf32>
    %168 = arith.addf %165, %167 : vector<8x128xf32>
    %169 = math.tanh %168 : vector<8x128xf32>
    %c3 = arith.constant 3 : index
    %170 = memref.load %arg1[%c3] : memref<64xi32, #tpu.memory_space<smem>>
    %171 = arith.index_cast %170 : i32 to index
    %c0_81 = arith.constant 0 : index
    %172 = vector.load %arg7[%171, %c0_81] : memref<128x128xf32, #tpu.memory_space<vmem>>, vector<1x128xf32>
    %c11 = arith.constant 11 : index
    %173 = memref.load %arg1[%c11] : memref<64xi32, #tpu.memory_space<smem>>
    %174 = arith.index_cast %173 : i32 to index
    %c0_82 = arith.constant 0 : index
    %175 = vector.load %arg7[%174, %c0_82] : memref<128x128xf32, #tpu.memory_space<vmem>>, vector<1x128xf32>
    %c19 = arith.constant 19 : index
    %176 = memref.load %arg1[%c19] : memref<64xi32, #tpu.memory_space<smem>>
    %177 = arith.index_cast %176 : i32 to index
    %c0_83 = arith.constant 0 : index
    %178 = vector.load %arg7[%177, %c0_83] : memref<128x128xf32, #tpu.memory_space<vmem>>, vector<1x128xf32>
    %c27 = arith.constant 27 : index
    %179 = memref.load %arg1[%c27] : memref<64xi32, #tpu.memory_space<smem>>
    %180 = arith.index_cast %179 : i32 to index
    %c0_84 = arith.constant 0 : index
    %181 = vector.load %arg7[%180, %c0_84] : memref<128x128xf32, #tpu.memory_space<vmem>>, vector<1x128xf32>
    %c35 = arith.constant 35 : index
    %182 = memref.load %arg1[%c35] : memref<64xi32, #tpu.memory_space<smem>>
    %183 = arith.index_cast %182 : i32 to index
    %c0_85 = arith.constant 0 : index
    %184 = vector.load %arg7[%183, %c0_85] : memref<128x128xf32, #tpu.memory_space<vmem>>, vector<1x128xf32>
    %c43 = arith.constant 43 : index
    %185 = memref.load %arg1[%c43] : memref<64xi32, #tpu.memory_space<smem>>
    %186 = arith.index_cast %185 : i32 to index
    %c0_86 = arith.constant 0 : index
    %187 = vector.load %arg7[%186, %c0_86] : memref<128x128xf32, #tpu.memory_space<vmem>>, vector<1x128xf32>
    %c51 = arith.constant 51 : index
    %188 = memref.load %arg1[%c51] : memref<64xi32, #tpu.memory_space<smem>>
    %189 = arith.index_cast %188 : i32 to index
    %c0_87 = arith.constant 0 : index
    %190 = vector.load %arg7[%189, %c0_87] : memref<128x128xf32, #tpu.memory_space<vmem>>, vector<1x128xf32>
    %c59 = arith.constant 59 : index
    %191 = memref.load %arg1[%c59] : memref<64xi32, #tpu.memory_space<smem>>
    %192 = arith.index_cast %191 : i32 to index
    %c0_88 = arith.constant 0 : index
    %193 = vector.load %arg7[%192, %c0_88] : memref<128x128xf32, #tpu.memory_space<vmem>>, vector<1x128xf32>
    %194 = tpu.concatenate %172, %175, %178, %181, %184, %187, %190, %193 in 0 : vector<1x128xf32>, vector<1x128xf32>, vector<1x128xf32>, vector<1x128xf32>, vector<1x128xf32>, vector<1x128xf32>, vector<1x128xf32>, vector<1x128xf32> -> vector<8x128xf32>
    %195 = tpu.concatenate %194, %162 in 1 : vector<8x128xf32>, vector<8x128xf32> -> vector<8x256xf32>
    %c0_89 = arith.constant 0 : index
    %c0_90 = arith.constant 0 : index
    %196 = vector.load %arg8[%c0_89, %c0_90] : memref<256x128xf32, #tpu.memory_space<vmem>>, vector<256x128xf32>
    %cst_91 = arith.constant dense<0.000000e+00> : vector<8x128xf32>
    %197 = tpu.matmul %195, %196, %cst_91 {dimension_numbers = #tpu.dot_dimension_numbers<[1], [0], [0], [1], [0, 0, 1, 1], [], []>} : vector<8x256xf32>, vector<256x128xf32>, vector<8x128xf32> -> vector<8x128xf32>
    %c0_92 = arith.constant 0 : index
    %c0_93 = arith.constant 0 : index
    %198 = vector.load %arg9[%c0_92, %c0_93] : memref<1x128xf32, #tpu.memory_space<vmem>>, vector<1x128xf32>
    %199 = vector.broadcast %198 : vector<1x128xf32> to vector<8x128xf32>
    %200 = arith.addf %197, %199 : vector<8x128xf32>
    %201 = math.tanh %200 : vector<8x128xf32>
    %202 = tpu.concatenate %201, %169 in 1 : vector<8x128xf32>, vector<8x128xf32> -> vector<8x256xf32>
    %c0_94 = arith.constant 0 : index
    %c0_95 = arith.constant 0 : index
    %203 = vector.load %arg10[%c0_94, %c0_95] : memref<256x128xf32, #tpu.memory_space<vmem>>, vector<256x128xf32>
    %cst_96 = arith.constant dense<0.000000e+00> : vector<8x128xf32>
    %204 = tpu.matmul %202, %203, %cst_96 {dimension_numbers = #tpu.dot_dimension_numbers<[1], [0], [0], [1], [0, 0, 1, 1], [], []>} : vector<8x256xf32>, vector<256x128xf32>, vector<8x128xf32> -> vector<8x128xf32>
    %c0_97 = arith.constant 0 : index
    %c0_98 = arith.constant 0 : index
    %205 = vector.load %arg11[%c0_97, %c0_98] : memref<1x128xf32, #tpu.memory_space<vmem>>, vector<1x128xf32>
    %206 = vector.broadcast %205 : vector<1x128xf32> to vector<8x128xf32>
    %207 = arith.addf %204, %206 : vector<8x128xf32>
    %208 = math.tanh %207 : vector<8x128xf32>
    %c4 = arith.constant 4 : index
    %209 = memref.load %arg1[%c4] : memref<64xi32, #tpu.memory_space<smem>>
    %210 = arith.index_cast %209 : i32 to index
    %c0_99 = arith.constant 0 : index
    %211 = vector.load %arg7[%210, %c0_99] : memref<128x128xf32, #tpu.memory_space<vmem>>, vector<1x128xf32>
    %c12 = arith.constant 12 : index
    %212 = memref.load %arg1[%c12] : memref<64xi32, #tpu.memory_space<smem>>
    %213 = arith.index_cast %212 : i32 to index
    %c0_100 = arith.constant 0 : index
    %214 = vector.load %arg7[%213, %c0_100] : memref<128x128xf32, #tpu.memory_space<vmem>>, vector<1x128xf32>
    %c20 = arith.constant 20 : index
    %215 = memref.load %arg1[%c20] : memref<64xi32, #tpu.memory_space<smem>>
    %216 = arith.index_cast %215 : i32 to index
    %c0_101 = arith.constant 0 : index
    %217 = vector.load %arg7[%216, %c0_101] : memref<128x128xf32, #tpu.memory_space<vmem>>, vector<1x128xf32>
    %c28 = arith.constant 28 : index
    %218 = memref.load %arg1[%c28] : memref<64xi32, #tpu.memory_space<smem>>
    %219 = arith.index_cast %218 : i32 to index
    %c0_102 = arith.constant 0 : index
    %220 = vector.load %arg7[%219, %c0_102] : memref<128x128xf32, #tpu.memory_space<vmem>>, vector<1x128xf32>
    %c36 = arith.constant 36 : index
    %221 = memref.load %arg1[%c36] : memref<64xi32, #tpu.memory_space<smem>>
    %222 = arith.index_cast %221 : i32 to index
    %c0_103 = arith.constant 0 : index
    %223 = vector.load %arg7[%222, %c0_103] : memref<128x128xf32, #tpu.memory_space<vmem>>, vector<1x128xf32>
    %c44 = arith.constant 44 : index
    %224 = memref.load %arg1[%c44] : memref<64xi32, #tpu.memory_space<smem>>
    %225 = arith.index_cast %224 : i32 to index
    %c0_104 = arith.constant 0 : index
    %226 = vector.load %arg7[%225, %c0_104] : memref<128x128xf32, #tpu.memory_space<vmem>>, vector<1x128xf32>
    %c52 = arith.constant 52 : index
    %227 = memref.load %arg1[%c52] : memref<64xi32, #tpu.memory_space<smem>>
    %228 = arith.index_cast %227 : i32 to index
    %c0_105 = arith.constant 0 : index
    %229 = vector.load %arg7[%228, %c0_105] : memref<128x128xf32, #tpu.memory_space<vmem>>, vector<1x128xf32>
    %c60 = arith.constant 60 : index
    %230 = memref.load %arg1[%c60] : memref<64xi32, #tpu.memory_space<smem>>
    %231 = arith.index_cast %230 : i32 to index
    %c0_106 = arith.constant 0 : index
    %232 = vector.load %arg7[%231, %c0_106] : memref<128x128xf32, #tpu.memory_space<vmem>>, vector<1x128xf32>
    %233 = tpu.concatenate %211, %214, %217, %220, %223, %226, %229, %232 in 0 : vector<1x128xf32>, vector<1x128xf32>, vector<1x128xf32>, vector<1x128xf32>, vector<1x128xf32>, vector<1x128xf32>, vector<1x128xf32>, vector<1x128xf32> -> vector<8x128xf32>
    %234 = tpu.concatenate %233, %201 in 1 : vector<8x128xf32>, vector<8x128xf32> -> vector<8x256xf32>
    %c0_107 = arith.constant 0 : index
    %c0_108 = arith.constant 0 : index
    %235 = vector.load %arg8[%c0_107, %c0_108] : memref<256x128xf32, #tpu.memory_space<vmem>>, vector<256x128xf32>
    %cst_109 = arith.constant dense<0.000000e+00> : vector<8x128xf32>
    %236 = tpu.matmul %234, %235, %cst_109 {dimension_numbers = #tpu.dot_dimension_numbers<[1], [0], [0], [1], [0, 0, 1, 1], [], []>} : vector<8x256xf32>, vector<256x128xf32>, vector<8x128xf32> -> vector<8x128xf32>
    %c0_110 = arith.constant 0 : index
    %c0_111 = arith.constant 0 : index
    %237 = vector.load %arg9[%c0_110, %c0_111] : memref<1x128xf32, #tpu.memory_space<vmem>>, vector<1x128xf32>
    %238 = vector.broadcast %237 : vector<1x128xf32> to vector<8x128xf32>
    %239 = arith.addf %236, %238 : vector<8x128xf32>
    %240 = math.tanh %239 : vector<8x128xf32>
    %241 = tpu.concatenate %240, %208 in 1 : vector<8x128xf32>, vector<8x128xf32> -> vector<8x256xf32>
    %c0_112 = arith.constant 0 : index
    %c0_113 = arith.constant 0 : index
    %242 = vector.load %arg10[%c0_112, %c0_113] : memref<256x128xf32, #tpu.memory_space<vmem>>, vector<256x128xf32>
    %cst_114 = arith.constant dense<0.000000e+00> : vector<8x128xf32>
    %243 = tpu.matmul %241, %242, %cst_114 {dimension_numbers = #tpu.dot_dimension_numbers<[1], [0], [0], [1], [0, 0, 1, 1], [], []>} : vector<8x256xf32>, vector<256x128xf32>, vector<8x128xf32> -> vector<8x128xf32>
    %c0_115 = arith.constant 0 : index
    %c0_116 = arith.constant 0 : index
    %244 = vector.load %arg11[%c0_115, %c0_116] : memref<1x128xf32, #tpu.memory_space<vmem>>, vector<1x128xf32>
    %245 = vector.broadcast %244 : vector<1x128xf32> to vector<8x128xf32>
    %246 = arith.addf %243, %245 : vector<8x128xf32>
    %247 = math.tanh %246 : vector<8x128xf32>
    %c5 = arith.constant 5 : index
    %248 = memref.load %arg1[%c5] : memref<64xi32, #tpu.memory_space<smem>>
    %249 = arith.index_cast %248 : i32 to index
    %c0_117 = arith.constant 0 : index
    %250 = vector.load %arg7[%249, %c0_117] : memref<128x128xf32, #tpu.memory_space<vmem>>, vector<1x128xf32>
    %c13 = arith.constant 13 : index
    %251 = memref.load %arg1[%c13] : memref<64xi32, #tpu.memory_space<smem>>
    %252 = arith.index_cast %251 : i32 to index
    %c0_118 = arith.constant 0 : index
    %253 = vector.load %arg7[%252, %c0_118] : memref<128x128xf32, #tpu.memory_space<vmem>>, vector<1x128xf32>
    %c21 = arith.constant 21 : index
    %254 = memref.load %arg1[%c21] : memref<64xi32, #tpu.memory_space<smem>>
    %255 = arith.index_cast %254 : i32 to index
    %c0_119 = arith.constant 0 : index
    %256 = vector.load %arg7[%255, %c0_119] : memref<128x128xf32, #tpu.memory_space<vmem>>, vector<1x128xf32>
    %c29 = arith.constant 29 : index
    %257 = memref.load %arg1[%c29] : memref<64xi32, #tpu.memory_space<smem>>
    %258 = arith.index_cast %257 : i32 to index
    %c0_120 = arith.constant 0 : index
    %259 = vector.load %arg7[%258, %c0_120] : memref<128x128xf32, #tpu.memory_space<vmem>>, vector<1x128xf32>
    %c37 = arith.constant 37 : index
    %260 = memref.load %arg1[%c37] : memref<64xi32, #tpu.memory_space<smem>>
    %261 = arith.index_cast %260 : i32 to index
    %c0_121 = arith.constant 0 : index
    %262 = vector.load %arg7[%261, %c0_121] : memref<128x128xf32, #tpu.memory_space<vmem>>, vector<1x128xf32>
    %c45 = arith.constant 45 : index
    %263 = memref.load %arg1[%c45] : memref<64xi32, #tpu.memory_space<smem>>
    %264 = arith.index_cast %263 : i32 to index
    %c0_122 = arith.constant 0 : index
    %265 = vector.load %arg7[%264, %c0_122] : memref<128x128xf32, #tpu.memory_space<vmem>>, vector<1x128xf32>
    %c53 = arith.constant 53 : index
    %266 = memref.load %arg1[%c53] : memref<64xi32, #tpu.memory_space<smem>>
    %267 = arith.index_cast %266 : i32 to index
    %c0_123 = arith.constant 0 : index
    %268 = vector.load %arg7[%267, %c0_123] : memref<128x128xf32, #tpu.memory_space<vmem>>, vector<1x128xf32>
    %c61 = arith.constant 61 : index
    %269 = memref.load %arg1[%c61] : memref<64xi32, #tpu.memory_space<smem>>
    %270 = arith.index_cast %269 : i32 to index
    %c0_124 = arith.constant 0 : index
    %271 = vector.load %arg7[%270, %c0_124] : memref<128x128xf32, #tpu.memory_space<vmem>>, vector<1x128xf32>
    %272 = tpu.concatenate %250, %253, %256, %259, %262, %265, %268, %271 in 0 : vector<1x128xf32>, vector<1x128xf32>, vector<1x128xf32>, vector<1x128xf32>, vector<1x128xf32>, vector<1x128xf32>, vector<1x128xf32>, vector<1x128xf32> -> vector<8x128xf32>
    %273 = tpu.concatenate %272, %240 in 1 : vector<8x128xf32>, vector<8x128xf32> -> vector<8x256xf32>
    %c0_125 = arith.constant 0 : index
    %c0_126 = arith.constant 0 : index
    %274 = vector.load %arg8[%c0_125, %c0_126] : memref<256x128xf32, #tpu.memory_space<vmem>>, vector<256x128xf32>
    %cst_127 = arith.constant dense<0.000000e+00> : vector<8x128xf32>
    %275 = tpu.matmul %273, %274, %cst_127 {dimension_numbers = #tpu.dot_dimension_numbers<[1], [0], [0], [1], [0, 0, 1, 1], [], []>} : vector<8x256xf32>, vector<256x128xf32>, vector<8x128xf32> -> vector<8x128xf32>
    %c0_128 = arith.constant 0 : index
    %c0_129 = arith.constant 0 : index
    %276 = vector.load %arg9[%c0_128, %c0_129] : memref<1x128xf32, #tpu.memory_space<vmem>>, vector<1x128xf32>
    %277 = vector.broadcast %276 : vector<1x128xf32> to vector<8x128xf32>
    %278 = arith.addf %275, %277 : vector<8x128xf32>
    %279 = math.tanh %278 : vector<8x128xf32>
    %280 = tpu.concatenate %279, %247 in 1 : vector<8x128xf32>, vector<8x128xf32> -> vector<8x256xf32>
    %c0_130 = arith.constant 0 : index
    %c0_131 = arith.constant 0 : index
    %281 = vector.load %arg10[%c0_130, %c0_131] : memref<256x128xf32, #tpu.memory_space<vmem>>, vector<256x128xf32>
    %cst_132 = arith.constant dense<0.000000e+00> : vector<8x128xf32>
    %282 = tpu.matmul %280, %281, %cst_132 {dimension_numbers = #tpu.dot_dimension_numbers<[1], [0], [0], [1], [0, 0, 1, 1], [], []>} : vector<8x256xf32>, vector<256x128xf32>, vector<8x128xf32> -> vector<8x128xf32>
    %c0_133 = arith.constant 0 : index
    %c0_134 = arith.constant 0 : index
    %283 = vector.load %arg11[%c0_133, %c0_134] : memref<1x128xf32, #tpu.memory_space<vmem>>, vector<1x128xf32>
    %284 = vector.broadcast %283 : vector<1x128xf32> to vector<8x128xf32>
    %285 = arith.addf %282, %284 : vector<8x128xf32>
    %286 = math.tanh %285 : vector<8x128xf32>
    %c6 = arith.constant 6 : index
    %287 = memref.load %arg1[%c6] : memref<64xi32, #tpu.memory_space<smem>>
    %288 = arith.index_cast %287 : i32 to index
    %c0_135 = arith.constant 0 : index
    %289 = vector.load %arg7[%288, %c0_135] : memref<128x128xf32, #tpu.memory_space<vmem>>, vector<1x128xf32>
    %c14 = arith.constant 14 : index
    %290 = memref.load %arg1[%c14] : memref<64xi32, #tpu.memory_space<smem>>
    %291 = arith.index_cast %290 : i32 to index
    %c0_136 = arith.constant 0 : index
    %292 = vector.load %arg7[%291, %c0_136] : memref<128x128xf32, #tpu.memory_space<vmem>>, vector<1x128xf32>
    %c22 = arith.constant 22 : index
    %293 = memref.load %arg1[%c22] : memref<64xi32, #tpu.memory_space<smem>>
    %294 = arith.index_cast %293 : i32 to index
    %c0_137 = arith.constant 0 : index
    %295 = vector.load %arg7[%294, %c0_137] : memref<128x128xf32, #tpu.memory_space<vmem>>, vector<1x128xf32>
    %c30 = arith.constant 30 : index
    %296 = memref.load %arg1[%c30] : memref<64xi32, #tpu.memory_space<smem>>
    %297 = arith.index_cast %296 : i32 to index
    %c0_138 = arith.constant 0 : index
    %298 = vector.load %arg7[%297, %c0_138] : memref<128x128xf32, #tpu.memory_space<vmem>>, vector<1x128xf32>
    %c38 = arith.constant 38 : index
    %299 = memref.load %arg1[%c38] : memref<64xi32, #tpu.memory_space<smem>>
    %300 = arith.index_cast %299 : i32 to index
    %c0_139 = arith.constant 0 : index
    %301 = vector.load %arg7[%300, %c0_139] : memref<128x128xf32, #tpu.memory_space<vmem>>, vector<1x128xf32>
    %c46 = arith.constant 46 : index
    %302 = memref.load %arg1[%c46] : memref<64xi32, #tpu.memory_space<smem>>
    %303 = arith.index_cast %302 : i32 to index
    %c0_140 = arith.constant 0 : index
    %304 = vector.load %arg7[%303, %c0_140] : memref<128x128xf32, #tpu.memory_space<vmem>>, vector<1x128xf32>
    %c54 = arith.constant 54 : index
    %305 = memref.load %arg1[%c54] : memref<64xi32, #tpu.memory_space<smem>>
    %306 = arith.index_cast %305 : i32 to index
    %c0_141 = arith.constant 0 : index
    %307 = vector.load %arg7[%306, %c0_141] : memref<128x128xf32, #tpu.memory_space<vmem>>, vector<1x128xf32>
    %c62 = arith.constant 62 : index
    %308 = memref.load %arg1[%c62] : memref<64xi32, #tpu.memory_space<smem>>
    %309 = arith.index_cast %308 : i32 to index
    %c0_142 = arith.constant 0 : index
    %310 = vector.load %arg7[%309, %c0_142] : memref<128x128xf32, #tpu.memory_space<vmem>>, vector<1x128xf32>
    %311 = tpu.concatenate %289, %292, %295, %298, %301, %304, %307, %310 in 0 : vector<1x128xf32>, vector<1x128xf32>, vector<1x128xf32>, vector<1x128xf32>, vector<1x128xf32>, vector<1x128xf32>, vector<1x128xf32>, vector<1x128xf32> -> vector<8x128xf32>
    %312 = tpu.concatenate %311, %279 in 1 : vector<8x128xf32>, vector<8x128xf32> -> vector<8x256xf32>
    %c0_143 = arith.constant 0 : index
    %c0_144 = arith.constant 0 : index
    %313 = vector.load %arg8[%c0_143, %c0_144] : memref<256x128xf32, #tpu.memory_space<vmem>>, vector<256x128xf32>
    %cst_145 = arith.constant dense<0.000000e+00> : vector<8x128xf32>
    %314 = tpu.matmul %312, %313, %cst_145 {dimension_numbers = #tpu.dot_dimension_numbers<[1], [0], [0], [1], [0, 0, 1, 1], [], []>} : vector<8x256xf32>, vector<256x128xf32>, vector<8x128xf32> -> vector<8x128xf32>
    %c0_146 = arith.constant 0 : index
    %c0_147 = arith.constant 0 : index
    %315 = vector.load %arg9[%c0_146, %c0_147] : memref<1x128xf32, #tpu.memory_space<vmem>>, vector<1x128xf32>
    %316 = vector.broadcast %315 : vector<1x128xf32> to vector<8x128xf32>
    %317 = arith.addf %314, %316 : vector<8x128xf32>
    %318 = math.tanh %317 : vector<8x128xf32>
    %319 = tpu.concatenate %318, %286 in 1 : vector<8x128xf32>, vector<8x128xf32> -> vector<8x256xf32>
    %c0_148 = arith.constant 0 : index
    %c0_149 = arith.constant 0 : index
    %320 = vector.load %arg10[%c0_148, %c0_149] : memref<256x128xf32, #tpu.memory_space<vmem>>, vector<256x128xf32>
    %cst_150 = arith.constant dense<0.000000e+00> : vector<8x128xf32>
    %321 = tpu.matmul %319, %320, %cst_150 {dimension_numbers = #tpu.dot_dimension_numbers<[1], [0], [0], [1], [0, 0, 1, 1], [], []>} : vector<8x256xf32>, vector<256x128xf32>, vector<8x128xf32> -> vector<8x128xf32>
    %c0_151 = arith.constant 0 : index
    %c0_152 = arith.constant 0 : index
    %322 = vector.load %arg11[%c0_151, %c0_152] : memref<1x128xf32, #tpu.memory_space<vmem>>, vector<1x128xf32>
    %323 = vector.broadcast %322 : vector<1x128xf32> to vector<8x128xf32>
    %324 = arith.addf %321, %323 : vector<8x128xf32>
    %325 = math.tanh %324 : vector<8x128xf32>
    %c7 = arith.constant 7 : index
    %326 = memref.load %arg1[%c7] : memref<64xi32, #tpu.memory_space<smem>>
    %327 = arith.index_cast %326 : i32 to index
    %c0_153 = arith.constant 0 : index
    %328 = vector.load %arg7[%327, %c0_153] : memref<128x128xf32, #tpu.memory_space<vmem>>, vector<1x128xf32>
    %c15 = arith.constant 15 : index
    %329 = memref.load %arg1[%c15] : memref<64xi32, #tpu.memory_space<smem>>
    %330 = arith.index_cast %329 : i32 to index
    %c0_154 = arith.constant 0 : index
    %331 = vector.load %arg7[%330, %c0_154] : memref<128x128xf32, #tpu.memory_space<vmem>>, vector<1x128xf32>
    %c23 = arith.constant 23 : index
    %332 = memref.load %arg1[%c23] : memref<64xi32, #tpu.memory_space<smem>>
    %333 = arith.index_cast %332 : i32 to index
    %c0_155 = arith.constant 0 : index
    %334 = vector.load %arg7[%333, %c0_155] : memref<128x128xf32, #tpu.memory_space<vmem>>, vector<1x128xf32>
    %c31 = arith.constant 31 : index
    %335 = memref.load %arg1[%c31] : memref<64xi32, #tpu.memory_space<smem>>
    %336 = arith.index_cast %335 : i32 to index
    %c0_156 = arith.constant 0 : index
    %337 = vector.load %arg7[%336, %c0_156] : memref<128x128xf32, #tpu.memory_space<vmem>>, vector<1x128xf32>
    %c39 = arith.constant 39 : index
    %338 = memref.load %arg1[%c39] : memref<64xi32, #tpu.memory_space<smem>>
    %339 = arith.index_cast %338 : i32 to index
    %c0_157 = arith.constant 0 : index
    %340 = vector.load %arg7[%339, %c0_157] : memref<128x128xf32, #tpu.memory_space<vmem>>, vector<1x128xf32>
    %c47 = arith.constant 47 : index
    %341 = memref.load %arg1[%c47] : memref<64xi32, #tpu.memory_space<smem>>
    %342 = arith.index_cast %341 : i32 to index
    %c0_158 = arith.constant 0 : index
    %343 = vector.load %arg7[%342, %c0_158] : memref<128x128xf32, #tpu.memory_space<vmem>>, vector<1x128xf32>
    %c55 = arith.constant 55 : index
    %344 = memref.load %arg1[%c55] : memref<64xi32, #tpu.memory_space<smem>>
    %345 = arith.index_cast %344 : i32 to index
    %c0_159 = arith.constant 0 : index
    %346 = vector.load %arg7[%345, %c0_159] : memref<128x128xf32, #tpu.memory_space<vmem>>, vector<1x128xf32>
    %c63 = arith.constant 63 : index
    %347 = memref.load %arg1[%c63] : memref<64xi32, #tpu.memory_space<smem>>
    %348 = arith.index_cast %347 : i32 to index
    %c0_160 = arith.constant 0 : index
    %349 = vector.load %arg7[%348, %c0_160] : memref<128x128xf32, #tpu.memory_space<vmem>>, vector<1x128xf32>
    %350 = tpu.concatenate %328, %331, %334, %337, %340, %343, %346, %349 in 0 : vector<1x128xf32>, vector<1x128xf32>, vector<1x128xf32>, vector<1x128xf32>, vector<1x128xf32>, vector<1x128xf32>, vector<1x128xf32>, vector<1x128xf32> -> vector<8x128xf32>
    %351 = tpu.concatenate %350, %318 in 1 : vector<8x128xf32>, vector<8x128xf32> -> vector<8x256xf32>
    %c0_161 = arith.constant 0 : index
    %c0_162 = arith.constant 0 : index
    %352 = vector.load %arg8[%c0_161, %c0_162] : memref<256x128xf32, #tpu.memory_space<vmem>>, vector<256x128xf32>
    %cst_163 = arith.constant dense<0.000000e+00> : vector<8x128xf32>
    %353 = tpu.matmul %351, %352, %cst_163 {dimension_numbers = #tpu.dot_dimension_numbers<[1], [0], [0], [1], [0, 0, 1, 1], [], []>} : vector<8x256xf32>, vector<256x128xf32>, vector<8x128xf32> -> vector<8x128xf32>
    %c0_164 = arith.constant 0 : index
    %c0_165 = arith.constant 0 : index
    %354 = vector.load %arg9[%c0_164, %c0_165] : memref<1x128xf32, #tpu.memory_space<vmem>>, vector<1x128xf32>
    %355 = vector.broadcast %354 : vector<1x128xf32> to vector<8x128xf32>
    %356 = arith.addf %353, %355 : vector<8x128xf32>
    %357 = math.tanh %356 : vector<8x128xf32>
    %358 = tpu.concatenate %357, %325 in 1 : vector<8x128xf32>, vector<8x128xf32> -> vector<8x256xf32>
    %c0_166 = arith.constant 0 : index
    %c0_167 = arith.constant 0 : index
    %359 = vector.load %arg10[%c0_166, %c0_167] : memref<256x128xf32, #tpu.memory_space<vmem>>, vector<256x128xf32>
    %cst_168 = arith.constant dense<0.000000e+00> : vector<8x128xf32>
    %360 = tpu.matmul %358, %359, %cst_168 {dimension_numbers = #tpu.dot_dimension_numbers<[1], [0], [0], [1], [0, 0, 1, 1], [], []>} : vector<8x256xf32>, vector<256x128xf32>, vector<8x128xf32> -> vector<8x128xf32>
    %c0_169 = arith.constant 0 : index
    %c0_170 = arith.constant 0 : index
    %361 = vector.load %arg11[%c0_169, %c0_170] : memref<1x128xf32, #tpu.memory_space<vmem>>, vector<1x128xf32>
    %362 = vector.broadcast %361 : vector<1x128xf32> to vector<8x128xf32>
    %363 = arith.addf %360, %362 : vector<8x128xf32>
    %364 = math.tanh %363 : vector<8x128xf32>
    %365 = tpu.concatenate %52, %91, %130, %169, %208, %247, %286, %325, %364 in 0 : vector<8x128xf32>, vector<8x128xf32>, vector<8x128xf32>, vector<8x128xf32>, vector<8x128xf32>, vector<8x128xf32>, vector<8x128xf32>, vector<8x128xf32>, vector<8x128xf32> -> vector<72x128xf32>
    %c0_171 = arith.constant 0 : index
    %c0_172 = arith.constant 0 : index
    %366 = vector.load %arg12[%c0_171, %c0_172] : memref<128x128xf32, #tpu.memory_space<vmem>>, vector<128x128xf32>
    %cst_173 = arith.constant dense<0.000000e+00> : vector<72x128xf32>
    %367 = tpu.matmul %365, %366, %cst_173 {dimension_numbers = #tpu.dot_dimension_numbers<[1], [0], [0], [1], [0, 0, 1, 1], [], []>} : vector<72x128xf32>, vector<128x128xf32>, vector<72x128xf32> -> vector<72x128xf32>
    %c0_174 = arith.constant 0 : index
    %c0_175 = arith.constant 0 : index
    %368 = vector.load %arg13[%c0_174, %c0_175] : memref<1x128xf32, #tpu.memory_space<vmem>>, vector<1x128xf32>
    %369 = vector.broadcast %368 : vector<1x128xf32> to vector<72x128xf32>
    %370 = arith.addf %367, %369 : vector<72x128xf32>
    %c0_176 = arith.constant 0 : index
    %c0_177 = arith.constant 0 : index
    %371 = vector.load %arg14[%c0_176, %c0_177] : memref<72x128xf32, #tpu.memory_space<vmem>>, vector<72x128xf32>
    tpu.vector_store %arg14[%c0_176, %c0_177], %370 {strides = array<i32>} : memref<72x128xf32, #tpu.memory_space<vmem>>, vector<72x128xf32>,
    return
  }
  func.func @transform_0(%arg0: i32, %arg1: memref<64xi32, #tpu.memory_space<smem>>) -> (i32, i32) {
    %c0_i32 = arith.constant 0 : i32
    %c0_i32_0 = arith.constant 0 : i32
    %c0_i32_1 = arith.constant 0 : i32
    return %c0_i32, %c0_i32_0 : i32, i32
  }
  func.func @transform_1(%arg0: i32, %arg1: memref<64xi32, #tpu.memory_space<smem>>) -> (i32, i32) {
    %c0_i32 = arith.constant 0 : i32
    %c0_i32_0 = arith.constant 0 : i32
    %c0_i32_1 = arith.constant 0 : i32
    return %c0_i32, %c0_i32_0 : i32, i32
  }
  func.func @transform_2(%arg0: i32, %arg1: memref<64xi32, #tpu.memory_space<smem>>) -> (i32, i32) {
    %c0_i32 = arith.constant 0 : i32
    %c0_i32_0 = arith.constant 0 : i32
    %c0_i32_1 = arith.constant 0 : i32
    return %c0_i32, %c0_i32_0 : i32, i32
  }
  func.func @transform_3(%arg0: i32, %arg1: memref<64xi32, #tpu.memory_space<smem>>) -> (i32, i32) {
    %c0_i32 = arith.constant 0 : i32
    %c0_i32_0 = arith.constant 0 : i32
    %c0_i32_1 = arith.constant 0 : i32
    return %c0_i32, %c0_i32_0 : i32, i32
  }
  func.func @transform_4(%arg0: i32, %arg1: memref<64xi32, #tpu.memory_space<smem>>) -> (i32, i32) {
    %c0_i32 = arith.constant 0 : i32
    %c0_i32_0 = arith.constant 0 : i32
    %c0_i32_1 = arith.constant 0 : i32
    return %c0_i32, %c0_i32_0 : i32, i32
  }
  func.func @transform_5(%arg0: i32, %arg1: memref<64xi32, #tpu.memory_space<smem>>) -> (i32, i32) {
    %c0_i32 = arith.constant 0 : i32
    %c0_i32_0 = arith.constant 0 : i32
    %c0_i32_1 = arith.constant 0 : i32
    return %c0_i32, %c0_i32_0 : i32, i32
  }
  func.func @transform_6(%arg0: i32, %arg1: memref<64xi32, #tpu.memory_space<smem>>) -> (i32, i32) {
    %c0_i32 = arith.constant 0 : i32
    %c0_i32_0 = arith.constant 0 : i32
    %c0_i32_1 = arith.constant 0 : i32
    return %c0_i32, %c0_i32_0 : i32, i32
  }
  func.func @transform_7(%arg0: i32, %arg1: memref<64xi32, #tpu.memory_space<smem>>) -> (i32, i32) {
    %c0_i32 = arith.constant 0 : i32
    %c0_i32_0 = arith.constant 0 : i32
    %c0_i32_1 = arith.constant 0 : i32
    return %c0_i32, %c0_i32_0 : i32, i32
  }
  func.func @transform_8(%arg0: i32, %arg1: memref<64xi32, #tpu.memory_space<smem>>) -> (i32, i32) {
    %c0_i32 = arith.constant 0 : i32
    %c0_i32_0 = arith.constant 0 : i32
    %c0_i32_1 = arith.constant 0 : i32
    return %c0_i32, %c0_i32_0 : i32, i32
  }
  func.func @transform_9(%arg0: i32, %arg1: memref<64xi32, #tpu.memory_space<smem>>) -> (i32, i32) {
    %c0_i32 = arith.constant 0 : i32
    %c0_i32_0 = arith.constant 0 : i32
    %c0_i32_1 = arith.constant 0 : i32
    return %c0_i32, %c0_i32_0 : i32, i32
  }
  func.func @transform_10(%arg0: i32, %arg1: memref<64xi32, #tpu.memory_space<smem>>) -> (i32, i32) {
    %c0_i32 = arith.constant 0 : i32
    %c0_i32_0 = arith.constant 0 : i32
    %c0_i32_1 = arith.constant 0 : i32
    return %c0_i32, %c0_i32_0 : i32, i32
  }
  func.func @transform_11(%arg0: i32, %arg1: memref<64xi32, #tpu.memory_space<smem>>) -> (i32, i32) {
    %c0_i32 = arith.constant 0 : i32
    %c0_i32_0 = arith.constant 0 : i32
    %c0_i32_1 = arith.constant 0 : i32
    return %c0_i32, %c0_i32_0 : i32, i32
  }
  func.func @transform_12(%arg0: i32, %arg1: memref<64xi32, #tpu.memory_space<smem>>) -> (i32, i32) {
    %c0_i32 = arith.constant 0 : i32
    %c0_i32_0 = arith.constant 0 : i32
    %c0_i32_1 = arith.constant 0 : i32
    return %c0_i32, %c0_i32_0 : i32, i32
  }
}

</mosaic_0001>

<bundles_post_ra>
// kernel: custom-call
= control target key start
LH: loop header
LB: loop body
LE: loop exit
PB: predicated region body
PF: predicated region fallthrough
CT: control target
= control target key end

     0   :  { %s6_s0 = inlined_call_operand.hbm [shape: f32[15,40], index: 0, kind: output, shape index: {}]  }

// kernel: decoder_forward.1
= control target key start
LH: loop header
LB: loop body
LE: loop exit
PB: predicated region body
PF: predicated region fallthrough
CT: control target
= control target key end

     0   :  { %s5996_s0 = inlined_call_operand.vmem [shape: s32[64], index: 0, kind: input, shape index: {}]   ;;  %s5997_s1 = inlined_call_operand.vmem [shape: f32[8,2048], index: 1, kind: input, shape index: {}]   ;;  %s5998_s2 = inlined_call_operand.hbm [shape: f32[2048,128], index: 2, kind: input, shape index: {}]   ;;  %s5999_s3 = inlined_call_operand.vmem [shape: f32[1,128], index: 3, kind: input, shape index: {}]   ;;  %s6000_s4 = inlined_call_operand.vmem [shape: f32[1,128], index: 4, kind: input, shape index: {}]   ;;  %s6001_s5 = inlined_call_operand.vmem [shape: f32[1,128], index: 5, kind: input, shape index: {}]   ;;  %s6002_s6 = inlined_call_operand.vmem [shape: f32[128,128], index: 6, kind: input, shape index: {}]   ;;  %s6003_s7 = inlined_call_operand.hbm [shape: f32[256,128], index: 7, kind: input, shape index: {}]   ;;  %s6004_s8 = inlined_call_operand.vmem [shape: f32[1,128], index: 8, kind: input, shape index: {}]   ;;  %s6005_s9 = inlined_call_operand.hbm [shape: f32[256,128], index: 9, kind: input, shape index: {}]   ;;  %s6006_s10 = inlined_call_operand.vmem [shape: f32[1,128], index: 10, kind: input, shape index: {}]   ;;  %s6007_s11 = inlined_call_operand.hbm [shape: f32[128,128], index: 11, kind: input, shape index: {}]   ;;  %s6008_s12 = inlined_call_operand.vmem [shape: f32[1,128], index: 12, kind: input, shape index: {}]   ;;  %s6009_s13 = inlined_call_operand.vmem [shape: f32[72,128], index: 13, kind: output, shape index: {}]  }
   0x1   :  { %s18_s27 = sshll.u32 %s5996_s0, 4  ;;  %s19_s27 = int_to_ptr.vmem [resolvable:$true] %s18_s27 }
   0x2   :  { %s4946_s28 = scalar_lea.vmem %s19_s27, 16  ;;  %p4951_p1 = scmp.lt.s32.totalorder %s19_s27, %s19_s27 }
   0x3   :  { %p4947_p0 = scmp.ne.s32.totalorder %s19_s27, %s4946_s28  ;;  %p4952_p2 = scmp.lt.s32.totalorder %s4946_s28, %s4946_s28 }
   0x5   :  { %p4953_p3 = por %p4952_p2, %p4951_p1 }
   0x7   :  { %p4954_p4 = pnand %p4953_p3, %p4947_p0 }
   0x9   :  { %4957 = shalt.err (!%p4954_p4)  }
   0xa   :  { %s5054_s29 = smov [#allocation3]  }
   0xb   :  { %21 = dma.vmem_to_smem %s19_s27, 16, %s5054_s29, [#allocation2] }
   0xc   :  { %5046 = dma.done.wait [#allocation2], 16 }
   0xd   :  { %5047 = vsyncadd [#allocation2], 4294967280 }
   0xe   :  { %23 = sfence }
   0xf   :  { %24 = vsyncpa [#allocation5], 0 }
  0x10   :  { %25 = vsyncpa [#allocation7], 0 }
  0x11   :  { %26 = vsyncpa [#allocation10], 0  ;;  %s5055_s30 = smov [#allocation6]   ;;  %s5056_s15 = smov [#allocation4]  }
  0x12   :  { %s54_s14 = sshll.u32 %s5055_s30, 4  ;;  %s34_s0 = sshll.u32 %s5056_s15, 4  ;;  %s55_s14 = int_to_ptr.vmem [resolvable:$true] %s54_s14  ;;  %s5137_s0 = int_to_ptr.vmem [resolvable:$true] %s34_s0 }
  0x13   :  { %s4958_s18 = scalar_lea.hbm %s6003_s7, 4096 }
  0x14   :  { %p4959_p5 = scmp.ne.s32.totalorder %s6003_s7, %s4958_s18  ;;  %p4962_p6 = scmp.lt.u32.totalorder %s4958_s18, %s6003_s7 }
  0x16   :  { %p4964_p7 = pnand %p4962_p6, %p4959_p5 }
  0x18   :  { %4967 = shalt.err (!%p4964_p7)
}
  0x19   :  { %s4968_s23 = scalar_lea.vmem %s55_s14, 4096  ;;  %p4973_p9 = scmp.lt.s32.totalorder %s55_s14, %s55_s14 }
  0x1a   :  { %p4969_p8 = scmp.ne.s32.totalorder %s55_s14, %s4968_s23  ;;  %p4974_p10 = scmp.lt.s32.totalorder %s4968_s23, %s4968_s23 }
  0x1c   :  { %p4975_p11 = por %p4974_p10, %p4973_p9 }
  0x1e   :  { %p4976_p12 = pnand %p4975_p11, %p4969_p8 }
  0x20   :  { %4979 = shalt.err (!%p4976_p12)
}
  0x21   :  { %s5057_s24 = smov 128   ;;  %s5058_s25 = smov 8  }
  0x22   :  { %60 = dma.hbm_to_vmem [thread:$0]  %s6003_s7, 4096, %s55_s14, [#allocation7], %s5057_s24, %s5057_s24, %s5058_s25  }
  0x23   :  { %s4980_s30 = scalar_lea.hbm %s5998_s2, 32768 }
  0x24   :  { %p4981_p13 = scmp.ne.s32.totalorder %s5998_s2, %s4980_s30  ;;  %p4984_p0 = scmp.lt.u32.totalorder %s4980_s30, %s5998_s2 }
  0x26   :  { %p4986_p1 = pnand %p4984_p0, %p4981_p13 }
  0x28   :  { %4989 = shalt.err (!%p4986_p1)
}
  0x29   :  { %s4990_s19 = scalar_lea.vmem %s5137_s0, 32768  ;;  %p4995_p3 = scmp.lt.s32.totalorder %s5137_s0, %s5137_s0 }
  0x2a   :  { %p4991_p2 = scmp.ne.s32.totalorder %s5137_s0, %s4990_s19  ;;  %p4996_p4 = scmp.lt.s32.totalorder %s4990_s19, %s4990_s19 }
  0x2c   :  { %p4997_p5 = por %p4996_p4, %p4995_p3 }
  0x2e   :  { %p4998_p6 = pnand %p4997_p5, %p4991_p2 }
  0x30   :  { %5001 = shalt.err (!%p4998_p6)
}
  0x31   :  { %40 = dma.hbm_to_vmem [thread:$0]  %s5998_s2, 32768, %s5137_s0, [#allocation5], %s5057_s24, %s5057_s24, %s5058_s25  }
  0x32   :  { %s5059_s20 = smov [#allocation8]   ;;  %s5060_s22 = smov [#allocation9]  }
  0x33   :  { %s68_s21 = sshll.u32 %s5059_s20, 4  ;;  %s82_s23 = sshll.u32 %s5060_s22, 4  ;;  %s69_s21 = int_to_ptr.vmem [resolvable:$true] %s68_s21  ;;  %s5174_s23 = int_to_ptr.vmem [resolvable:$true] %s82_s23 }
  0x34   :  { %s5002_s28 = scalar_lea.hbm %s6005_s9, 4096 }
  0x35   :  { %p5003_p7 = scmp.ne.s32.totalorder %s6005_s9, %s5002_s28  ;;  %p5006_p8 = scmp.lt.u32.totalorder %s5002_s28, %s6005_s9 }
  0x37   :  { %p5008_p9 = pnand %p5006_p8, %p5003_p7 }
  0x39   :  { %5011 = shalt.err (!%p5008_p9)
}
  0x3a   :  { %s5012_s2 = scalar_lea.vmem %s69_s21, 4096  ;;  %p5017_p11 = scmp.lt.s32.totalorder %s69_s21, %s69_s21 }
  0x3b   :  { %p5013_p10 = scmp.ne.s32.totalorder %s69_s21, %s5012_s2  ;;  %p5018_p12 = scmp.lt.s32.totalorder %s5012_s2, %s5012_s2 }
  0x3d   :  { %p5019_p13 = por %p5018_p12, %p5017_p11 }
  0x3f   :  { %p5020_p0 = pnand %p5019_p13, %p5013_p10 }
  0x41   :  { %5023 = shalt.err (!%p5020_p0)
}
  0x42   :  { %74 = dma.hbm_to_vmem [thread:$0]  %s6005_s9, 4096, %s69_s21, [#allocation7], %s5057_s24, %s5057_s24, %s5058_s25  }
  0x43   :  { %s5024_s7 = scalar_lea.hbm %s6007_s11, 2048 }
  0x44   :  { %p5025_p1 = scmp.ne.s32.totalorder %s6007_s11, %s5024_s7  ;;  %p5028_p2 = scmp.lt.u32.totalorder %s5024_s7, %s6007_s11 }
  0x46   :  { %p5030_p3 = pnand %p5028_p2, %p5025_p1 }
  0x48   :  { %5033 = shalt.err (!%p5030_p3)
}
  0x49   :  { %s5034_s27 = scalar_lea.vmem %s5174_s23, 2048  ;;  %p5039_p5 = scmp.lt.s32.totalorder %s5174_s23, %s5174_s23 }
  0x4a   :  { %p5035_p4 = scmp.ne.s32.totalorder %s5174_s23, %s5034_s27  ;;  %p5040_p6 = scmp.lt.s32.totalorder %s5034_s27, %s5034_s27 }
  0x4c   :  { %p5041_p7 = por %p5040_p6, %p5039_p5 }
  0x4e   :  { %p5042_p8 = pnand %p5041_p7, %p5035_p4 }
  0x50   :  { %5045 = shalt.err (!%p5042_p8)
}
  0x51   :  { %88 = dma.hbm_to_vmem [thread:$0]  %s6007_s11, 2048, %s5174_s23, [#allocation10], %s5057_s24, %s5057_s24, %s5058_s25  }
  0x52   :  { %5048 = dma.done.wait [#allocation5], 32768  }
  0x53   :  { %5049 = vsyncadd [#allocation5], 4294934528 }
  0x54   :  { %5050 = dma.done.wait [#allocation7], 8192  }
  0x55   :  { %5051 = vsyncadd [#allocation7], 4294959104 }
  0x56   :  { %5052 = dma.done.wait [#allocation10], 2048  }
  0x57   :  { %5053 = vsyncadd [#allocation10], 4294965248  ;;  %v135_v0 = vld [vmem:[#allocation4 + $0x80] sm:$0xff]  ;;  %v136_v1 = vld [vmem:[#allocation4 + $0x88] sm:$0xff]  ;;  %s1204_s7 = sld [smem:[#allocation3]]  ;;  %vm1249_vm1 = vcmask 1040384  }
  0x58   :  { %v119_v2 = vld [vmem:[#allocation4] sm:$0xff]  ;;  %v4040_v3 = vpack.c.bf16 %v136_v1, %v135_v0  ;;  %v120_v4 = vld [vmem:[#allocation4 + $0x8] sm:$0xff]  ;;  %v137_v5 = vld [vmem:[#allocation4 + $0x90] sm:$0xff]  ;;  %s2984_s14 = sld [smem:[#allocation3 + $0x18]]  ;;  %vm1251_vm2 = vcmask 1041408   ;;  %vm1253_vm3 = vcmask 1042432  }
  0x59   :  { %v138_v6 = vld [vmem:[#allocation4 + $0x98] sm:$0xff]  ;;  %v4042_v7 = vpack.c.bf16 %v120_v4, %v119_v2  ;;  %v121_v9 = vld [vmem:[#allocation4 + $0x10] sm:$0xff]  ;;  %v139_v11 = vld [vmem:[#allocation4 + $0xa0] sm:$0xff]  ;;  %s2985_s27 = sld [smem:[#allocation3 + $0x20]]  ;;  %vm1255_vm4 = vcmask 1043456   ;;  %vm1257_vm5 = vcmask 1044480  }
  0x5a   :  { %v4044_v8 = vpack.c.bf16 %v138_v6, %v137_v5  ;;  %v122_v10 = vld [vmem:[#allocation4 + $0x18] sm:$0xff]  ;;  %4041 = vmatprep.subr.bf16.mxu1 %v4040_v3  ;;  %v140_v12 = vld [vmem:[#allocation4 + $0xa8] sm:$0xff]  ;;  %v123_v15 = vld [vmem:[#allocation4 + $0x20] sm:$0xff]  ;;  %s2986_s28 = sld [smem:[#allocation3 + $0x28]]  ;;  %vm1259_vm6 = vcmask 1045504   ;;  %vm1261_vm7 = vcmask 1046528  }
  0x5b   :  { %4043 = vmatpush3.bf16.msra.mxu1 %v4042_v7  ;;  %v4046_v13 = vpack.c.bf16 %v122_v10, %v121_v9  ;;  %v4048_v14 = vpack.c.bf16 %v140_v12, %v139_v11  ;;  %v124_v16 = vld [vmem:[#allocation4 + $0x28] sm:$0xff]  ;;  %v141_v17 = vld [vmem:[#allocation4 + $0xb0] sm:$0xff]  ;;  %v142_v18 = vld [vmem:[#allocation4 + $0xb8] sm:$0xff]  ;;  %s2987_s16 = sld [smem:[#allocation3 + $0x30]]  ;;  %s2990_s9 = sld [smem:[#allocation3 + $0x9]]  ;;  %vm5063_vm8 = vmmov 0  }
  0x5c   :  { %4045 = vmatprep.subr.bf16.mxu1 %v4044_v8  ;;  %v4050_v19 = vpack.c.bf16 %v124_v16, %v123_v15  ;;  %v4052_v20 = vpack.c.bf16 %v142_v18, %v141_v17  ;;  %v125_v21 = vld [vmem:[#allocation4 + $0x30] sm:$0xff]  ;;  %v126_v22 = vld [vmem:[#allocation4 + $0x38] sm:$0xff]  ;;  %v143_v23 = vld [vmem:[#allocation4 + $0xc0] sm:$0xff]  ;;  %s2991_s21 = sld [smem:[#allocation3 + $0x11]]  ;;  %s2998_s30 = sld [smem:[#allocation3 + $0xa]] }
  0x5d   :  { %v144_v24 = vld [vmem:[#allocation4 + $0xc8] sm:$0xff]  ;;  %v4054_v26 = vpack.c.bf16 %v126_v22, %v125_v21  ;;  %v127_v27 = vld [vmem:[#allocation4 + $0x40] sm:$0xff]  ;;  %v145_v34 = vld [vmem:[#allocation4 + $0xd0] sm:$0xff]  ;;  %s1205_s23 = scalar_lea.vmem %s6002_s6, %s1204_s7  ;;  %s2992_s24 = sld [smem:[#allocation3 + $0x19]] }
  0x5e   :  { %v104_v25 = vld [vmem:[%s5997_s1 + $0x8] sm:$0xff]  ;;  %v199_v29 = vld [vmem:[#allocation4 + $0x280] sm:$0xff]  ;;  %v4056_v30 = vpack.c.bf16 %v144_v24, %v143_v23  ;;  %v146_v35 = vld [vmem:[#allocation4 + $0xd8] sm:$0xff]  ;;  %s1214_s15 = scalar_lea.vmem %s6002_s6, %s2984_s14  ;;  %s2993_s29 = sld [smem:[#allocation3 + $0x21]] }
  0x5f   :  { %4047 = vmatpush3.bf16.msra.mxu1 %v4046_v13  ;;  %446 = vmatprep.mubr.f32.mxu1 %v104_v25  ;;  %v128_v28 = vld [vmem:[#allocation4 + $0x48] sm:$0xff]  ;;  %v183_v32 = vld [vmem:[#allocation4 + $0x200] sm:$0xff]  ;;  %v201_v38 = vld [vmem:[#allocation4 + $0x290] sm:$0xff]  ;;  %v4060_v45 = vpack.c.bf16 %v146_v35, %v145_v34  ;;  %s1217_s0 = scalar_lea.vmem %s6002_s6, %s2985_s27  ;;  %s3000_s2 = sld [smem:[#allocation3 + $0x1a]] }
  0x60   :  { %4049 = vmatprep.subr.bf16.mxu1 %v4048_v14  ;;  %v200_v31 = vld [vmem:[#allocation4 + $0x288] sm:$0xff]  ;;  %v202_v39 = vld [vmem:[#allocation4 + $0x298] sm:$0xff]  ;;  %v4058_v40 = vpack.c.bf16 %v128_v28, %v127_v27  ;;  %v129_v41 = vld [vmem:[#allocation4 + $0x50] sm:$0xff]  ;;  %s1220_s19 = scalar_lea.vmem %s6002_s6, %s2986_s28  ;;  %s3001_s17 = sld [smem:[#allocation3 + $0x22]] }
  0x61   :  { %v184_v33 = vld [vmem:[#allocation4 + $0x208] sm:$0xff]  ;;  %v4104_v36 = vpack.c.bf16 %v200_v31, %v199_v29  ;;  %v4108_v42 = vpack.c.bf16 %v202_v39, %v201_v38  ;;  %v185_v43 = vld [vmem:[#allocation4 + $0x210] sm:$0xff]  ;;  %v186_v44 = vld [vmem:[#allocation4 + $0x218] sm:$0xff]  ;;  %s1223_s20 = scalar_lea.vmem %s6002_s6, %s2987_s16  ;;  %s1409_s28 = scalar_lea.vmem %s6002_s6, %s2990_s9 }
  0x62   :  { %v4106_v37 = vpack.c.bf16 %v184_v33, %v183_v32  ;;  %v130_v46 = vld [vmem:[#allocation4 + $0x58] sm:$0xff]  ;;  %v147_v47 = vld [vmem:[#allocation4 + $0xe0] sm:$0xff]  ;;  %v148_v48 = vld [vmem:[#allocation4 + $0xe8] sm:$0xff]  ;;  %v4110_v49 = vpack.c.bf16 %v186_v44, %v185_v43  ;;  %s1412_s16 = scalar_lea.vmem %s6002_s6, %s2991_s21  ;;  %s3003_s9 = sld [smem:[#allocation3 + $0x32]] }
  0x63   :  { %4051 = vmatpush3.bf16.msra.mxu1 %v4050_v19  ;;  %4105 = vmatprep.subr.bf16.mxu0 %v4104_v36  ;;  %v203_v50 = vld [vmem:[#allocation4 + $0x2a0] sm:$0xff]  ;;  %v204_v51 = vld [vmem:[#allocation4 + $0x2a8] sm:$0xff]  ;;  %v4062_v55 = vpack.c.bf16 %v130_v46, %v129_v41  ;;  %v205_v57 = vld [vmem:[#allocation4 + $0x2b0] sm:$0xff]  ;;  %v4064_v58 = vpack.c.bf16 %v148_v48, %v147_v47  ;;  %s3005_s18 = sld [smem:[#allocation3 + $0x3]]  ;;  %s3016_s22 = sld [smem:[#allocation3 + $0x1c]] }
  0x64   :  { %4053 = vmatprep.subr.bf16.mxu1 %v4052_v20  ;;  %4107 = vmatpush3.bf16.msra.mxu0 %v4106_v37  ;;  %v187_v52 = vld [vmem:[#allocation4 + $0x220] sm:$0xff]  ;;  %v4112_v53 = vpack.c.bf16 %v204_v51, %v203_v50  ;;  %v188_v54 = vld [vmem:[#allocation4 + $0x228] sm:$0xff]  ;;  %v149_v60 = vld [vmem:[#allocation4 + $0xf0] sm:$0xff]  ;;  %s1418_s14 = scalar_lea.vmem %s6002_s6, %s2993_s29 }
  0x65   :  { %4109 = vmatprep.subr.bf16.mxu0 %v4108_v42  ;;  %v131_v56 = vld [vmem:[#allocation4 + $0x60] sm:$0xff]  ;;  %v132_v59 = vld [vmem:[#allocation4 + $0x68] sm:$0xff]  ;;  %v4114_v61 = vpack.c.bf16 %v188_v54, %v187_v52  ;;  %v206_v62 = vld [vmem:[#allocation4 + $0x2b8] sm:$0xff] }
  0x66   :  { %v150_v63 = vld [vmem:[#allocation4 + $0xf8] sm:$0xff]  ;;  %v4116_v0 = vpack.c.bf16 %v206_v62, %v205_v57  ;;  %v189_v1 = vld [vmem:[#allocation4 + $0x230] sm:$0xff]  ;;  %v207_v3 = vld [vmem:[#allocation4 + $0x2c0] sm:$0xff]  ;;  %v4066_v5 = vpack.c.bf16 %v132_v59, %v131_v56 }
  0x67   :  { %4055 = vmatpush3.bf16.msra.mxu1 %v4054_v26  ;;  %v190_v2 = vld [vmem:[#allocation4 + $0x238] sm:$0xff]  ;;  %v208_v4 = vld [vmem:[#allocation4 + $0x2c8] sm:$0xff]  ;;  %v4068_v6 = vpack.c.bf16 %v150_v63, %v149_v60  ;;  %v133_v7 = vld [vmem:[#allocation4 + $0x70] sm:$0xff] }
  0x68   :  { %4057 = vmatprep.subr.bf16.mxu1 %v4056_v30  ;;  %4111 = vmatpush3.bf16.msra.mxu0 %v4110_v49  ;;  %v134_v8 = vld [vmem:[#allocation4 + $0x78] sm:$0xff]  ;;  %v167_v9 = vld [vmem:[#allocation4 + $0x180] sm:$0xff]  ;;  %v4118_v10 = vpack.c.bf16 %v190_v2, %v189_v1  ;;  %v168_v11 = vld [vmem:[#allocation4 + $0x188] sm:$0xff]  ;;  %v4120_v12 = vpack.c.bf16 %v208_v4, %v207_v3 }
  0x69   :  { %4113 = vmatprep.subr.bf16.mxu0 %v4112_v53  ;;  %v191_v13 = vld [vmem:[#allocation4 + $0x240] sm:$0xff]  ;;  %v192_v14 = vld [vmem:[#allocation4 + $0x248] sm:$0xff]  ;;  %v209_v15 = vld [vmem:[#allocation4 + $0x2d0] sm:$0xff]  ;;  %v4070_v17 = vpack.c.bf16 %v134_v8, %v133_v7  ;;  %v4072_v18 = vpack.c.bf16 %v168_v11, %v167_v9  ;;  %s1794_s21 = scalar_lea.vmem %s6002_s6, %s3005_s18 }
  0x6a   :  { %v210_v16 = vld [vmem:[#allocation4 + $0x2d8] sm:$0xff]  ;;  %v151_v19 = vld [vmem:[#allocation4 + $0x100] sm:$0xff]  ;;  %v152_v20 = vld [vmem:[#allocation4 + $0x108] sm:$0xff]  ;;  %v4122_v22 = vpack.c.bf16 %v192_v14, %v191_v13 }
  0x6b   :  { %4059 = vmatpush3.bf16.msra.mxu1 %v4058_v40  ;;  %v169_v21 = vld [vmem:[#allocation4 + $0x190] sm:$0xff]  ;;  %v170_v23 = vld [vmem:[#allocation4 + $0x198] sm:$0xff]  ;;  %v4124_v24 = vpack.c.bf16 %v210_v16, %v209_v15  ;;  %v211_v27 = vld [vmem:[#allocation4 + $0x2e0] sm:$0xff]  ;;  %v4074_v30 = vpack.c.bf16 %v152_v20, %v151_v19 }
  0x6c   :  { %4061 = vmatprep.subr.bf16.mxu1 %v4060_v45  ;;  %4115 = vmatpush3.bf16.msra.mxu0 %v4114_v61  ;;  %v193_v25 = vld [vmem:[#allocation4 + $0x250] sm:$0xff]  ;;  %v194_v26 = vld [vmem:[#allocation4 + $0x258] sm:$0xff]  ;;  %v212_v28 = vld [vmem:[#allocation4 + $0x2e8] sm:$0xff]  ;;  %v4076_v33 = vpack.c.bf16 %v170_v23, %v169_v21 }
  0x6d   :  { %4117 = vmatprep.subr.bf16.mxu0 %v4116_v0  ;;  %v103_v29 = vld [vmem:[%s5997_s1] sm:$0xff]  ;;  %v153_v31 = vld [vmem:[#allocation4 + $0x110] sm:$0xff]  ;;  %v154_v32 = vld [vmem:[#allocation4 + $0x118] sm:$0xff]  ;;  %v4126_v36 = vpack.c.bf16 %v194_v26, %v193_v25  ;;  %v4128_v38 = vpack.c.bf16 %v212_v28, %v211_v27 }
  0x6e   :  { %v171_v34 = vld [vmem:[#allocation4 + $0x1a0] sm:$0xff]  ;;  %v172_v35 = vld [vmem:[#allocation4 + $0x1a8] sm:$0xff]  ;;  %v106_v37 = vld [vmem:[%s5997_s1 + $0x18] sm:$0xff]  ;;  %v4078_v44 = vpack.c.bf16 %v154_v32, %v153_v31 }
  0x6f   :  { %4063 = vmatpush3.bf16.msra.mxu1 %v4062_v55  ;;  %v195_v39 = vld [vmem:[#allocation4 + $0x260] sm:$0xff]  ;;  %v196_v40 = vld [vmem:[#allocation4 + $0x268] sm:$0xff]  ;;  %v213_v42 = vld [vmem:[#allocation4 + $0x2f0] sm:$0xff]  ;;  %v4080_v45 = vpack.c.bf16 %v172_v35, %v171_v34 }
  0x70   :  { %4065 = vmatprep.subr.bf16.mxu1 %v4064_v58  ;;  %4119 = vmatpush3.bf16.msra.mxu0 %v4118_v10  ;;  %v108_v41 = vld [vmem:[%s5997_s1 + $0x28] sm:$0xff]  ;;  %v214_v43 = vld [vmem:[#allocation4 + $0x2f8] sm:$0xff]  ;;  %v155_v46 = vld [vmem:[#allocation4 + $0x120] sm:$0xff]  ;;  %v4130_v49 = vpack.c.bf16 %v196_v40, %v195_v39 }
  0x71   :  { %4121 = vmatprep.subr.bf16.mxu0 %v4120_v12  ;;  %586 = vmatprep.mubr.f32.mxu0 %v108_v41  ;;  %v156_v47 = vld [vmem:[#allocation4 + $0x128] sm:$0xff]  ;;  %v173_v48 = vld [vmem:[#allocation4 + $0x1b0] sm:$0xff]  ;;  %v174_v50 = vld [vmem:[#allocation4 + $0x1b8] sm:$0xff]  ;;  %v4132_v51 = vpack.c.bf16 %v214_v43, %v213_v42 }
  0x72   :  { %v197_v52 = vld [vmem:[#allocation4 + $0x270] sm:$0xff]  ;;  %v198_v53 = vld [vmem:[#allocation4 + $0x278] sm:$0xff]  ;;  %v263_v54 = vld [vmem:[#allocation4 + $0x480] sm:$0xff]  ;;  %v4082_v56 = vpack.c.bf16 %v156_v47, %v155_v46  ;;  %v4084_v57 = vpack.c.bf16 %v174_v50, %v173_v48 }
  0x73   :  { %4067 = vmatpush3.bf16.msra.mxu1 %v4066_v5  ;;  %v264_v55 = vld [vmem:[#allocation4 + $0x488] sm:$0xff]  ;;  %v157_v58 = vld [vmem:[#allocation4 + $0x130] sm:$0xff]  ;;  %v158_v59 = vld [vmem:[#allocation4 + $0x138] sm:$0xff]  ;;  %v4134_v61 = vpack.c.bf16 %v198_v53, %v197_v52 }
  0x74   :  { %4069 = vmatprep.subr.bf16.mxu1 %v4068_v6  ;;  %4123 = vmatpush3.bf16.msra.mxu0 %v4122_v22  ;;  %v175_v60 = vld [vmem:[#allocation4 + $0x1c0] sm:$0xff]  ;;  %v176_v62 = vld [vmem:[#allocation4 + $0x1c8] sm:$0xff]  ;;  %v4168_v63 = vpack.c.bf16 %v264_v55, %v263_v54  ;;  %v265_v2 = vld [vmem:[#allocation4 + $0x490] sm:$0xff]  ;;  %v4086_v4 = vpack.c.bf16 %v158_v59, %v157_v58 }
  0x75   :  { %4125 = vmatprep.subr.bf16.mxu0 %v4124_v24  ;;  %v247_v0 = vld [vmem:[#allocation4 + $0x400] sm:$0xff]  ;;  %v248_v1 = vld [vmem:[#allocation4 + $0x408] sm:$0xff]  ;;  %v266_v3 = vld [vmem:[#allocation4 + $0x498] sm:$0xff]  ;;  %v4088_v6 = vpack.c.bf16 %v176_v62, %v175_v60 }
  0x76   :  { %v159_v5 = vld [vmem:[#allocation4 + $0x140] sm:$0xff]  ;;  %v160_v7 = vld [vmem:[#allocation4 + $0x148] sm:$0xff]  ;;  %v177_v8 = vld [vmem:[#allocation4 + $0x1d0] sm:$0xff]  ;;  %v4170_v10 = vpack.c.bf16 %v248_v1, %v247_v0  ;;  %v4172_v12 = vpack.c.bf16 %v266_v3, %v265_v2 }
  0x77   :  { %4071 = vmatpush3.bf16.msra.mxu1 %v4070_v17  ;;  %v107_v9 = vld [vmem:[%s5997_s1 + $0x20] sm:$0xff]  ;;  %v178_v11 = vld [vmem:[#allocation4 + $0x1d8] sm:$0xff]  ;;  %v249_v13 = vld [vmem:[#allocation4 + $0x410] sm:$0xff]  ;;  %v4090_v17 = vpack.c.bf16 %v160_v7, %v159_v5 }
  0x78   :  { %4073 = vmatprep.subr.bf16.mxu1 %v4072_v18  ;;  %4127 = vmatpush3.bf16.msra.mxu0 %v4126_v36  ;;  %v250_v14 = vld [vmem:[#allocation4 + $0x418] sm:$0xff]  ;;  %v267_v15 = vld [vmem:[#allocation4 + $0x4a0] sm:$0xff]  ;;  %v268_v16 = vld [vmem:[#allocation4 + $0x4a8] sm:$0xff]  ;;  %v4092_v18 = vpack.c.bf16 %v178_v11, %v177_v8 }
  0x79   :  { %4129 = vmatprep.subr.bf16.mxu0 %v4128_v38  ;;  %v161_v19 = vld [vmem:[#allocation4 + $0x150] sm:$0xff]  ;;  %v162_v20 = vld [vmem:[#allocation4 + $0x158] sm:$0xff]  ;;  %v179_v21 = vld [vmem:[#allocation4 + $0x1e0] sm:$0xff]  ;;  %v4174_v22 = vpack.c.bf16 %v250_v14, %v249_v13  ;;  %v4176_v24 = vpack.c.bf16 %v268_v16, %v267_v15 }
  0x7a   :  { %447 = vmatmul.mubr.f32.vlgmr.msra.gmra.mrb[0].mxu1 %v103_v29  ;;  %v180_v23 = vld [vmem:[#allocation4 + $0x1e8] sm:$0xff]  ;;  %v251_v25 = vld [vmem:[#allocation4 + $0x420] sm:$0xff]  ;;  %v269_v27 = vld [vmem:[#allocation4 + $0x4b0] sm:$0xff]  ;;  %v4094_v29 = vpack.c.bf16 %v162_v20, %v161_v19 }
  0x7b   :  { %4075 = vmatpush3.bf16.msra.mxu1 %v4074_v30  ;;  %516 = vmatprep.mubr.f32.mxu1 %v106_v37  ;;  %v252_v26 = vld [vmem:[#allocation4 + $0x428] sm:$0xff]  ;;  %v270_v28 = vld [vmem:[#allocation4 + $0x4b8] sm:$0xff]  ;;  %v4096_v30 = vpack.c.bf16 %v180_v23, %v179_v21  ;;  %v163_v31 = vld [vmem:[#allocation4 + $0x160] sm:$0xff] }
  0x7c   :  { %4077 = vmatprep.subr.bf16.mxu1 %v4076_v33  ;;  %4131 = vmatpush3.bf16.msra.mxu0 %v4130_v49  ;;  %v164_v32 = vld [vmem:[#allocation4 + $0x168] sm:$0xff]  ;;  %v181_v33 = vld [vmem:[#allocation4 + $0x1f0] sm:$0xff]  ;;  %v4178_v34 = vpack.c.bf16 %v252_v26, %v251_v25  ;;  %v182_v35 = vld [vmem:[#allocation4 + $0x1f8] sm:$0xff]  ;;  %v4180_v36 = vpack.c.bf16 %v270_v28, %v269_v27 }
  0x7d   :  { %4133 = vmatprep.subr.bf16.mxu0 %v4132_v51  ;;  %v253_v37 = vld [vmem:[#allocation4 + $0x430] sm:$0xff]  ;;  %v254_v38 = vld [vmem:[#allocation4 + $0x438] sm:$0xff]  ;;  %v271_v39 = vld [vmem:[#allocation4 + $0x4c0] sm:$0xff]  ;;  %v4098_v41 = vpack.c.bf16 %v164_v32, %v163_v31  ;;  %v4100_v43 = vpack.c.bf16 %v182_v35, %v181_v33 }
  0x7e   :  { %v272_v40 = vld [vmem:[#allocation4 + $0x4c8] sm:$0xff]  ;;  %v231_v46 = vld [vmem:[#allocation4 + $0x380] sm:$0xff]  ;;  %v4182_v47 = vpack.c.bf16 %v254_v38, %v253_v37  ;;  %v273_v52 = vld [vmem:[#allocation4 + $0x4d0] sm:$0xff] }
  0x7f   :  { %4079 = vmatpush3.bf16.msra.mxu1 %v4078_v44  ;;  %v112_v42 = vld [vmem:[%s5997_s1 + $0x48] sm:$0xff]  ;;  %v165_v44 = vld [vmem:[#allocation4 + $0x170] sm:$0xff]  ;;  %v4184_v49 = vpack.c.bf16 %v272_v40, %v271_v39  ;;  %v255_v50 = vld [vmem:[#allocation4 + $0x440] sm:$0xff] }
  0x80   :  { %4081 = vmatprep.subr.bf16.mxu1 %v4080_v45  ;;  %4135 = vmatpush3.bf16.msra.mxu0 %v4134_v61  ;;  %v166_v45 = vld [vmem:[#allocation4 + $0x178] sm:$0xff]  ;;  %v232_v48 = vld [vmem:[#allocation4 + $0x388] sm:$0xff]  ;;  %v233_v58 = vld [vmem:[#allocation4 + $0x390] sm:$0xff] }
  0x81   :  { %4169 = vmatprep.subr.bf16.mxu0 %v4168_v63  ;;  %v256_v51 = vld [vmem:[#allocation4 + $0x448] sm:$0xff]  ;;  %v274_v53 = vld [vmem:[#allocation4 + $0x4d8] sm:$0xff]  ;;  %v4102_v54 = vpack.c.bf16 %v166_v45, %v165_v44  ;;  %v4136_v55 = vpack.c.bf16 %v232_v48, %v231_v46  ;;  %v257_v62 = vld [vmem:[#allocation4 + $0x450] sm:$0xff] }
  0x82   :  { %v4186_v59 = vpack.c.bf16 %v256_v51, %v255_v50  ;;  %v234_v60 = vld [vmem:[#allocation4 + $0x398] sm:$0xff]  ;;  %v4188_v61 = vpack.c.bf16 %v274_v53, %v273_v52  ;;  %v275_v0 = vld [vmem:[#allocation4 + $0x4e0] sm:$0xff]  ;;  %v276_v1 = vld [vmem:[#allocation4 + $0x4e8] sm:$0xff] }
  0x83   :  { %4083 = vmatpush3.bf16.msra.mxu1 %v4082_v56  ;;  %587 = vmatmul.mubr.f32.vlgmr.msra.gmra.mrb[0].mxu0 %v107_v9  ;;  %v215_v56 = vld [vmem:[#allocation4 + $0x300] sm:$0xff]  ;;  %v258_v63 = vld [vmem:[#allocation4 + $0x458] sm:$0xff]  ;;  %v105_v2 = vld [vmem:[%s5997_s1 + $0x10] sm:$0xff]  ;;  %v4140_v5 = vpack.c.bf16 %v234_v60, %v233_v58  ;;  %v4192_v11 = vpack.c.bf16 %v276_v1, %v275_v0 }
  0x84   :  { %4085 = vmatprep.subr.bf16.mxu1 %v4084_v57  ;;  %4171 = vmatpush3.bf16.msra.mxu0 %v4170_v10  ;;  %v216_v57 = vld [vmem:[#allocation4 + $0x308] sm:$0xff]  ;;  %v235_v7 = vld [vmem:[#allocation4 + $0x3a0] sm:$0xff]  ;;  %v4190_v8 = vpack.c.bf16 %v258_v63, %v257_v62  ;;  %v110_v9 = vld [vmem:[%s5997_s1 + $0x38] sm:$0xff] }
  0x85   :  { %4173 = vmatprep.subr.bf16.mxu0 %v4172_v12  ;;  %726 = vmatprep.mubr.f32.mxu0 %v112_v42  ;;  %v4138_v3 = vpack.c.bf16 %v216_v57, %v215_v56  ;;  %v236_v10 = vld [vmem:[#allocation4 + $0x3a8] sm:$0xff]  ;;  %v259_v12 = vld [vmem:[#allocation4 + $0x460] sm:$0xff]  ;;  %v277_v14 = vld [vmem:[#allocation4 + $0x4f0] sm:$0xff] }
  0x86   :  { %v260_v13 = vld [vmem:[#allocation4 + $0x468] sm:$0xff]  ;;  %v278_v15 = vld [vmem:[#allocation4 + $0x4f8] sm:$0xff]  ;;  %v237_v20 = vld [vmem:[#allocation4 + $0x3b0] sm:$0xff] }
  0x87   :  { %4087 = vmatpush3.bf16.msra.mxu1 %v4086_v4  ;;  %v217_v4 = vld [vmem:[#allocation4 + $0x310] sm:$0xff]  ;;  %v220_v19 = vld [vmem:[#allocation4 + $0x328] sm:$0xff]  ;;  %v4194_v21 = vpack.c.bf16 %v260_v13, %v259_v12  ;;  %v4196_v23 = vpack.c.bf16 %v278_v15, %v277_v14  ;;  %v262_v25 = vld [vmem:[#allocation4 + $0x478] sm:$0xff] }
  0x88   :  { %4089 = vmatprep.subr.bf16.mxu1 %v4088_v6  ;;  %4175 = vmatpush3.bf16.msra.mxu0 %v4174_v22  ;;  %v218_v6 = vld [vmem:[#allocation4 + $0x318] sm:$0xff]  ;;  %v327_v26 = vld [vmem:[#allocation4 + $0x680] sm:$0xff]  ;;  %v328_v27 = vld [vmem:[#allocation4 + $0x688] sm:$0xff] }
  0x89   :  { %4177 = vmatprep.subr.bf16.mxu0 %v4176_v24  ;;  %v4142_v16 = vpack.c.bf16 %v218_v6, %v217_v4  ;;  %v238_v22 = vld [vmem:[#allocation4 + $0x3b8] sm:$0xff]  ;;  %v261_v24 = vld [vmem:[#allocation4 + $0x470] sm:$0xff]  ;;  %v239_v32 = vld [vmem:[#allocation4 + $0x3c0] sm:$0xff]  ;;  %v4232_v35 = vpack.c.bf16 %v328_v27, %v327_v26 }
  0x8a   :  { %v222_v31 = vld [vmem:[#allocation4 + $0x338] sm:$0xff]  ;;  %v4198_v33 = vpack.c.bf16 %v262_v25, %v261_v24  ;;  %v312_v37 = vld [vmem:[#allocation4 + $0x608] sm:$0xff]  ;;  %v329_v38 = vld [vmem:[#allocation4 + $0x690] sm:$0xff] }
  0x8b   :  { %4091 = vmatpush3.bf16.msra.mxu1 %v4090_v17  ;;  %v4144_v17 = vpack.c.bf16 %v236_v10, %v235_v7  ;;  %v330_v39 = vld [vmem:[#allocation4 + $0x698] sm:$0xff]  ;;  %v241_v44 = vld [vmem:[#allocation4 + $0x3d0] sm:$0xff]  ;;  %v111_v45 = vld [vmem:[%s5997_s1 + $0x40] sm:$0xff] }
  0x8c   :  { %4093 = vmatprep.subr.bf16.mxu1 %v4092_v18  ;;  %4179 = vmatpush3.bf16.msra.mxu0 %v4178_v34  ;;  %v219_v18 = vld [vmem:[#allocation4 + $0x320] sm:$0xff]  ;;  %v240_v34 = vld [vmem:[#allocation4 + $0x3c8] sm:$0xff]  ;;  %v4236_v48 = vpack.c.bf16 %v330_v39, %v329_v38  ;;  %v314_v50 = vld [vmem:[#allocation4 + $0x618] sm:$0xff] }
  0x8d   :  { %4181 = vmatprep.subr.bf16.mxu0 %v4180_v36  ;;  %v4146_v28 = vpack.c.bf16 %v220_v19, %v219_v18  ;;  %v311_v36 = vld [vmem:[#allocation4 + $0x600] sm:$0xff]  ;;  %v4152_v42 = vpack.c.bf16 %v240_v34, %v239_v32  ;;  %v332_v52 = vld [vmem:[#allocation4 + $0x6a8] sm:$0xff]  ;;  %v225_v56 = vld [vmem:[#allocation4 + $0x350] sm:$0xff] }
  0x8e   :  { %v4234_v46 = vpack.c.bf16 %v312_v37, %v311_v36  ;;  %v331_v51 = vld [vmem:[#allocation4 + $0x6a0] sm:$0xff]  ;;  %v116_v53 = vld [vmem:[%s5997_s1 + $0x68] sm:$0xff]  ;;  %v226_v57 = vld [vmem:[#allocation4 + $0x358] sm:$0xff] }
  0x8f   :  { %4095 = vmatpush3.bf16.msra.mxu1 %v4094_v29  ;;  %v4148_v29 = vpack.c.bf16 %v238_v22, %v237_v20  ;;  %v243_v58 = vld [vmem:[#allocation4 + $0x3e0] sm:$0xff]  ;;  %v244_v60 = vld [vmem:[#allocation4 + $0x3e8] sm:$0xff]  ;;  %v333_v0 = vld [vmem:[#allocation4 + $0x6b0] sm:$0xff] }
  0x90   :  { %4097 = vmatprep.subr.bf16.mxu1 %v4096_v30  ;;  %4183 = vmatpush3.bf16.msra.mxu0 %v4182_v47  ;;  %v221_v30 = vld [vmem:[#allocation4 + $0x330] sm:$0xff]  ;;  %v242_v47 = vld [vmem:[#allocation4 + $0x3d8] sm:$0xff]  ;;  %v315_v62 = vld [vmem:[#allocation4 + $0x620] sm:$0xff] }
  0x91   :  { %4185 = vmatprep.subr.bf16.mxu0 %v4184_v49  ;;  %v4150_v40 = vpack.c.bf16 %v222_v31, %v221_v30  ;;  %v313_v49 = vld [vmem:[#allocation4 + $0x610] sm:$0xff]  ;;  %v316_v63 = vld [vmem:[#allocation4 + $0x628] sm:$0xff]  ;;  %v334_v1 = vld [vmem:[#allocation4 + $0x6b8] sm:$0xff] }
  0x92   :  { %v227_v4 = vld [vmem:[#allocation4 + $0x360] sm:$0xff]  ;;  %v245_v6 = vld [vmem:[#allocation4 + $0x3f0] sm:$0xff]  ;;  %v4242_v7 = vpack.c.bf16 %v316_v63, %v315_v62  ;;  %v336_v13 = vld [vmem:[#allocation4 + $0x6c8] sm:$0xff] }
  0x93   :  { %4099 = vmatpush3.bf16.msra.mxu1 %v4098_v41  ;;  %v223_v41 = vld [vmem:[#allocation4 + $0x340] sm:$0xff]  ;;  %v317_v10 = vld [vmem:[#allocation4 + $0x630] sm:$0xff]  ;;  %v296_v20 = vld [vmem:[#allocation4 + $0x588] sm:$0xff] }
  0x94   :  { %4101 = vmatprep.subr.bf16.mxu1 %v4100_v43  ;;  %4187 = vmatpush3.bf16.msra.mxu0 %v4186_v59  ;;  %v224_v43 = vld [vmem:[#allocation4 + $0x348] sm:$0xff]  ;;  %v4238_v59 = vpack.c.bf16 %v314_v50, %v313_v49  ;;  %v335_v12 = vld [vmem:[#allocation4 + $0x6c0] sm:$0xff]  ;;  %v337_v24 = vld [vmem:[#allocation4 + $0x6d0] sm:$0xff] }
  0x95   :  { %4189 = vmatprep.subr.bf16.mxu0 %v4188_v61  ;;  %v4240_v61 = vpack.c.bf16 %v332_v52, %v331_v51  ;;  %v295_v18 = vld [vmem:[#allocation4 + $0x580] sm:$0xff]  ;;  %v338_v25 = vld [vmem:[#allocation4 + $0x6d8] sm:$0xff]  ;;  %v297_v30 = vld [vmem:[#allocation4 + $0x590] sm:$0xff] }
  0x96   :  { %v319_v22 = vld [vmem:[#allocation4 + $0x640] sm:$0xff]  ;;  %v4200_v27 = vpack.c.bf16 %v296_v20, %v295_v18  ;;  %v298_v32 = vld [vmem:[#allocation4 + $0x598] sm:$0xff]  ;;  %v321_v34 = vld [vmem:[#allocation4 + $0x650] sm:$0xff] }
  0x97   :  { %4103 = vmatpush3.bf16.msra.mxu1 %v4102_v54  ;;  %v4154_v54 = vpack.c.bf16 %v224_v43, %v223_v41  ;;  %v339_v36 = vld [vmem:[#allocation4 + $0x6e0] sm:$0xff]  ;;  %v340_v37 = vld [vmem:[#allocation4 + $0x6e8] sm:$0xff]  ;;  %v109_v38 = vld [vmem:[%s5997_s1 + $0x30] sm:$0xff]  ;;  %v4204_v41 = vpack.c.bf16 %v298_v32, %v297_v30 }
  0x98   :  { %4137 = vmatprep.subr.bf16.mxu1 %v4136_v55  ;;  %4191 = vmatpush3.bf16.msra.mxu0 %v4190_v8  ;;  %v4156_v55 = vpack.c.bf16 %v242_v47, %v241_v44  ;;  %v246_v8 = vld [vmem:[#allocation4 + $0x3f8] sm:$0xff]  ;;  %v299_v43 = vld [vmem:[#allocation4 + $0x5a0] sm:$0xff]  ;;  %v4256_v47 = vpack.c.bf16 %v340_v37, %v339_v36  ;;  %v324_v49 = vld [vmem:[#allocation4 + $0x668] sm:$0xff] }
  0x99   :  { %4193 = vmatprep.subr.bf16.mxu0 %v4192_v11  ;;  %v318_v11 = vld [vmem:[#allocation4 + $0x638] sm:$0xff]  ;;  %v4164_v15 = vpack.c.bf16 %v246_v8, %v245_v6  ;;  %v341_v50 = vld [vmem:[#allocation4 + $0x6f0] sm:$0xff]  ;;  %v288_v8 = vld [vmem:[#allocation4 + $0x548] sm:$0xff] }
  0x9a   :  { %517 = vmatmul.mubr.f32.vlgmr.msra.gmra.mrb[2].mxu1 %v105_v2  ;;  %v4158_v2 = vpack.c.bf16 %v226_v57, %v225_v56  ;;  %v4246_v19 = vpack.c.bf16 %v318_v11, %v317_v10  ;;  %v342_v51 = vld [vmem:[#allocation4 + $0x6f8] sm:$0xff]  ;;  %v301_v56 = vld [vmem:[#allocation4 + $0x5b0] sm:$0xff]  ;;  %v291_v20 = vld [vmem:[#allocation4 + $0x560] sm:$0xff] }
  0x9b   :  { %4139 = vmatpush3.bf16.msra.mxu1 %v4138_v3  ;;  %656 = vmatprep.mubr.f32.mxu1 %v110_v9  ;;  %v4160_v3 = vpack.c.bf16 %v244_v60, %v243_v58  ;;  %v4244_v9 = vpack.c.bf16 %v334_v1, %v333_v0  ;;  %v302_v58 = vld [vmem:[#allocation4 + $0x5b8] sm:$0xff]  ;;  %v325_v60 = vld [vmem:[#allocation4 + $0x670] sm:$0xff]  ;;  %v343_v32 = vld [vmem:[#allocation4 + $0x700] sm:$0xff] }
  0x9c   :  { %4141 = vmatprep.subr.bf16.mxu1 %v4140_v5  ;;  %4195 = vmatpush3.bf16.msra.mxu0 %v4194_v21  ;;  %v228_v5 = vld [vmem:[#allocation4 + $0x368] sm:$0xff]  ;;  %v4248_v21 = vpack.c.bf16 %v336_v13, %v335_v12  ;;  %v4212_v63 = vpack.c.bf16 %v302_v58, %v301_v56  ;;  %v285_v0 = vld [vmem:[#allocation4 + $0x530] sm:$0xff]  ;;  %v286_v1 = vld [vmem:[#allocation4 + $0x538] sm:$0xff] }
  0x9d   :  { %4197 = vmatprep.subr.bf16.mxu0 %v4196_v23  ;;  %v4162_v14 = vpack.c.bf16 %v228_v5, %v227_v4  ;;  %v320_v23 = vld [vmem:[#allocation4 + $0x648] sm:$0xff]  ;;  %v4214_v5 = vpack.c.bf16 %v286_v1, %v285_v0  ;;  %v305_v10 = vld [vmem:[#allocation4 + $0x5d0] sm:$0xff]  ;;  %v306_v11 = vld [vmem:[#allocation4 + $0x5d8] sm:$0xff] }
  0x9e   :  { %v4250_v31 = vpack.c.bf16 %v320_v23, %v319_v22  ;;  %v304_v4 = vld [vmem:[#allocation4 + $0x5c8] sm:$0xff]  ;;  %v4220_v13 = vpack.c.bf16 %v306_v11, %v305_v10  ;;  %v309_v22 = vld [vmem:[#allocation4 + $0x5f0] sm:$0xff]  ;;  %v310_v23 = vld [vmem:[#allocation4 + $0x5f8] sm:$0xff] }
  0x9f   :  { %4143 = vmatpush3.bf16.msra.mxu1 %v4142_v16  ;;  %v229_v16 = vld [vmem:[#allocation4 + $0x370] sm:$0xff]  ;;  %v351_v58 = vld [vmem:[#allocation4 + $0x740] sm:$0xff]  ;;  %v354_v1 = vld [vmem:[#allocation4 + $0x758] sm:$0xff] }
  0xa0   :  { %4145 = vmatprep.subr.bf16.mxu1 %v4144_v17  ;;  %4199 = vmatpush3.bf16.msra.mxu0 %v4198_v33  ;;  %v230_v17 = vld [vmem:[#allocation4 + $0x378] sm:$0xff]  ;;  %v4252_v33 = vpack.c.bf16 %v338_v25, %v337_v24  ;;  %v4228_v25 = vpack.c.bf16 %v310_v23, %v309_v22  ;;  %v113_v36 = vld [vmem:[%s5997_s1 + $0x50] sm:$0xff]  ;;  %v1000_v23 = vld [vmem:[#allocation6 + $0x80] sm:$0xff] }
  0xa1   :  { %4233 = vmatprep.subr.bf16.mxu0 %v4232_v35  ;;  %v4166_v26 = vpack.c.bf16 %v230_v17, %v229_v16  ;;  %v322_v35 = vld [vmem:[#allocation4 + $0x658] sm:$0xff]  ;;  %v307_v16 = vld [vmem:[#allocation4 + $0x5e0] sm:$0xff]  ;;  %v308_v17 = vld [vmem:[#allocation4 + $0x5e8] sm:$0xff] }
  0xa2   :  { %v4254_v44 = vpack.c.bf16 %v322_v35, %v321_v34  ;;  %v361_v34 = vld [vmem:[#allocation4 + $0x790] sm:$0xff]  ;;  %v362_v35 = vld [vmem:[#allocation4 + $0x798] sm:$0xff] }
  0xa3   :  { %4147 = vmatpush3.bf16.msra.mxu1 %v4146_v28  ;;  %727 = vmatmul.mubr.f32.vlgmr.msra.gmra.mrb[2].mxu0 %v111_v45  ;;  %v279_v28 = vld [vmem:[#allocation4 + $0x500] sm:$0xff]  ;;  %v114_v45 = vld [vmem:[%s5997_s1 + $0x58] sm:$0xff]  ;;  %v353_v0 = vld [vmem:[#allocation4 + $0x750] sm:$0xff] }
  0xa4   :  { %4149 = vmatprep.subr.bf16.mxu1 %v4148_v29  ;;  %4235 = vmatpush3.bf16.msra.mxu0 %v4234_v46  ;;  %v280_v29 = vld [vmem:[#allocation4 + $0x508] sm:$0xff] }
  0xa5   :  { %4237 = vmatprep.subr.bf16.mxu0 %v4236_v48  ;;  %866 = vmatprep.mubr.f32.mxu0 %v116_v53  ;;  %v4202_v39 = vpack.c.bf16 %v280_v29, %v279_v28  ;;  %v300_v46 = vld [vmem:[#allocation4 + $0x5a8] sm:$0xff]  ;;  %v323_v48 = vld [vmem:[#allocation4 + $0x660] sm:$0xff] }
  0xa6   :  { %v4208_v53 = vpack.c.bf16 %v300_v46, %v299_v43  ;;  %v4258_v57 = vpack.c.bf16 %v324_v49, %v323_v48  ;;  %v359_v28 = vld [vmem:[#allocation4 + $0x780] sm:$0xff]  ;;  %v360_v29 = vld [vmem:[#allocation4 + $0x788] sm:$0xff]  ;;  %v365_v48 = vld [vmem:[#allocation4 + $0x7b0] sm:$0xff] }
  0xa7   :  { %4151 = vmatpush3.bf16.msra.mxu1 %v4150_v40  ;;  %v281_v40 = vld [vmem:[#allocation4 + $0x510] sm:$0xff]  ;;  %v364_v43 = vld [vmem:[#allocation4 + $0x7a8] sm:$0xff]  ;;  %v347_v46 = vld [vmem:[#allocation4 + $0x720] sm:$0xff] }
  0xa8   :  { %4153 = vmatprep.subr.bf16.mxu1 %v4152_v42  ;;  %4239 = vmatpush3.bf16.msra.mxu0 %v4238_v59  ;;  %v282_v42 = vld [vmem:[#allocation4 + $0x518] sm:$0xff]  ;;  %v4260_v59 = vpack.c.bf16 %v342_v51, %v341_v50 }
  0xa9   :  { %4241 = vmatprep.subr.bf16.mxu0 %v4240_v61  ;;  %v4206_v52 = vpack.c.bf16 %v282_v42, %v281_v40  ;;  %v326_v61 = vld [vmem:[#allocation4 + $0x678] sm:$0xff]  ;;  %v363_v42 = vld [vmem:[#allocation4 + $0x7a0] sm:$0xff] }
  0xaa   :  { %v346_v40 = vld [vmem:[#allocation4 + $0x718] sm:$0xff] }
  0xab   :  { %4155 = vmatpush3.bf16.msra.mxu1 %v4154_v54  ;;  %v283_v54 = vld [vmem:[#allocation4 + $0x520] sm:$0xff]  ;;  %v366_v49 = vld [vmem:[#allocation4 + $0x7b8] sm:$0xff] }
  0xac   :  { %4157 = vmatprep.subr.bf16.mxu1 %v4156_v55  ;;  %4243 = vmatpush3.bf16.msra.mxu0 %v4242_v7  ;;  %v284_v55 = vld [vmem:[#allocation4 + $0x528] sm:$0xff]  ;;  %v287_v7 = vld [vmem:[#allocation4 + $0x540] sm:$0xff]  ;;  %v4276_v51 = vpack.c.bf16 %v366_v49, %v365_v48  ;;  %v1006_v48 = vld [vmem:[#allocation6 + $0xb0] sm:$0xff] }
  0xad   :  { %4245 = vmatprep.subr.bf16.mxu0 %v4244_v9  ;;  %v4210_v62 = vpack.c.bf16 %v284_v55, %v283_v54  ;;  %v115_v9 = vld [vmem:[%s5997_s1 + $0x60] sm:$0xff]  ;;  %v4218_v12 = vpack.c.bf16 %v288_v8, %v287_v7  ;;  %v368_v55 = vld [vmem:[#allocation4 + $0x7c8] sm:$0xff]  ;;  %v373_v8 = vld [vmem:[#allocation4 + $0x7f0] sm:$0xff] }
  0xae   :  { %v367_v54 = vld [vmem:[#allocation4 + $0x7c0] sm:$0xff]  ;;  %v356_v7 = vld [vmem:[#allocation4 + $0x768] sm:$0xff]  ;;  %v1007_v49 = vld [vmem:[#allocation6 + $0xb8] sm:$0xff] }
  0xaf   :  { %4159 = vmatpush3.bf16.msra.mxu1 %v4158_v2  ;;  %v4262_v2 = vpack.c.bf16 %v326_v61, %v325_v60  ;;  %v369_v60 = vld [vmem:[#allocation4 + $0x7d0] sm:$0xff]  ;;  %v370_v61 = vld [vmem:[#allocation4 + $0x7d8] sm:$0xff] }
  0xb0   :  { %4161 = vmatprep.subr.bf16.mxu1 %v4160_v3  ;;  %4247 = vmatpush3.bf16.msra.mxu0 %v4246_v19  ;;  %v303_v3 = vld [vmem:[#allocation4 + $0x5c0] sm:$0xff]  ;;  %v4224_v19 = vpack.c.bf16 %v308_v17, %v307_v16 }
  0xb1   :  { %4249 = vmatprep.subr.bf16.mxu0 %v4248_v21  ;;  %v4216_v6 = vpack.c.bf16 %v304_v4, %v303_v3  ;;  %v292_v21 = vld [vmem:[#allocation4 + $0x568] sm:$0xff]  ;;  %v4286_v4 = vpack.c.bf16 %v354_v1, %v353_v0 }
  0xb2   :  { %v4226_v24 = vpack.c.bf16 %v292_v21, %v291_v20  ;;  %v372_v3 = vld [vmem:[#allocation4 + $0x7e8] sm:$0xff] }
  0xb3   :  { %4163 = vmatpush3.bf16.msra.mxu1 %v4162_v14  ;;  %v289_v14 = vld [vmem:[#allocation4 + $0x550] sm:$0xff] }
  0xb4   :  { %4165 = vmatprep.subr.bf16.mxu1 %v4164_v15  ;;  %4251 = vmatpush3.bf16.msra.mxu0 %v4250_v31  ;;  %v290_v15 = vld [vmem:[#allocation4 + $0x558] sm:$0xff]  ;;  %v4264_v31 = vpack.c.bf16 %v360_v29, %v359_v28  ;;  %v1002_v29 = vld [vmem:[#allocation6 + $0x90] sm:$0xff] }
  0xb5   :  { %4253 = vmatprep.subr.bf16.mxu0 %v4252_v33  ;;  %v4222_v18 = vpack.c.bf16 %v290_v15, %v289_v14  ;;  %v344_v33 = vld [vmem:[#allocation4 + $0x708] sm:$0xff]  ;;  %v117_v15 = vld [vmem:[%s5997_s1 + $0x70] sm:$0xff] }
  0xb6   :  { %v4266_v37 = vpack.c.bf16 %v344_v33, %v343_v32  ;;  %v986_v33 = vld [vmem:[#allocation6 + $0x10] sm:$0xff] }
  0xb7   :  { %4167 = vmatpush3.bf16.msra.mxu1 %v4166_v26  ;;  %v293_v26 = vld [vmem:[#allocation4 + $0x570] sm:$0xff] }
  0xb8   :  { %4201 = vmatprep.subr.bf16.mxu1 %v4200_v27  ;;  %4255 = vmatpush3.bf16.msra.mxu0 %v4254_v44  ;;  %v294_v27 = vld [vmem:[#allocation4 + $0x578] sm:$0xff] }
  0xb9   :  { %4257 = vmatprep.subr.bf16.mxu0 %v4256_v47  ;;  %v4230_v30 = vpack.c.bf16 %v294_v27, %v293_v26  ;;  %v348_v47 = vld [vmem:[#allocation4 + $0x728] sm:$0xff]  ;;  %v984_v26 = vld [vmem:[#allocation6] sm:$0xff] }
  0xba   :  { %657 = vmatmul.mubr.f32.vlgmr.msra.gmra.mrb[4].mxu1 %v109_v38  ;;  %v4268_v38 = vpack.c.bf16 %v362_v35, %v361_v34  ;;  %v4274_v50 = vpack.c.bf16 %v348_v47, %v347_v46  ;;  %v985_v27 = vld [vmem:[#allocation6 + $0x8] sm:$0xff]  ;;  %v987_v34 = vld [vmem:[#allocation6 + $0x18] sm:$0xff] }
  0xbb   :  { %4203 = vmatpush3.bf16.msra.mxu1 %v4202_v39  ;;  %796 = vmatprep.mubr.f32.mxu1 %v114_v45  ;;  %v345_v39 = vld [vmem:[#allocation4 + $0x710] sm:$0xff]  ;;  %v4272_v45 = vpack.c.bf16 %v364_v43, %v363_v42  ;;  %v5263_v28 = vpack.c.bf16 %v985_v27, %v984_v26  ;;  %v988_v43 = vld [vmem:[#allocation6 + $0x20] sm:$0xff] }
  0xbc   :  { %4205 = vmatprep.subr.bf16.mxu1 %v4204_v41  ;;  %4259 = vmatpush3.bf16.msra.mxu0 %v4258_v57  ;;  %v118_v41 = vld [vmem:[%s5997_s1 + $0x78] sm:$0xff]  ;;  %v4270_v44 = vpack.c.bf16 %v346_v40, %v345_v39  ;;  %v4280_v57 = vpack.c.bf16 %v368_v55, %v367_v54  ;;  %v1004_v40 = vld [vmem:[#allocation6 + $0xa0] sm:$0xff]  ;;  %v1009_v55 = vld [vmem:[#allocation6 + $0xc8] sm:$0xff]  ;;  %s3019_s1 = sld [smem:[#allocation3 + $0x34]] }
  0xbd   :  { %4261 = vmatprep.subr.bf16.mxu0 %v4260_v59  ;;  %v352_v59 = vld [vmem:[#allocation4 + $0x748] sm:$0xff]  ;;  %v1008_v54 = vld [vmem:[#allocation6 + $0xc0] sm:$0xff] }
  0xbf   :  { %4207 = vmatpush3.bf16.msra.mxu1 %v4206_v52  ;;  %v349_v52 = vld [vmem:[#allocation4 + $0x730] sm:$0xff] }
  0xc0   :  { %4209 = vmatprep.subr.bf16.mxu1 %v4208_v53  ;;  %4263 = vmatpush3.bf16.msra.mxu0 %v4262_v2  ;;  %v350_v53 = vld [vmem:[#allocation4 + $0x738] sm:$0xff]  ;;  %v371_v2 = vld [vmem:[#allocation4 + $0x7e0] sm:$0xff] }
  0xc1   :  { %v4278_v56 = vpack.c.bf16 %v350_v53, %v349_v52  ;;  %v991_v52 = vld [vmem:[#allocation6 + $0x38] sm:$0xff] }
  0xc3   :  { %4211 = vmatpush3.bf16.msra.mxu1 %v4210_v62  ;;  %867 = vmatmul.mubr.f32.vlgmr.msra.gmra.mrb[4].mxu0 %v115_v9  ;;  %v4282_v62 = vpack.c.bf16 %v352_v59, %v351_v58  ;;  %v374_v9 = vld [vmem:[#allocation4 + $0x7f8] sm:$0xff]  ;;  %v993_v58 = vld [vmem:[#allocation6 + $0x48] sm:$0xff] }
  0xc4   :  { %4213 = vmatprep.subr.bf16.mxu1 %v4212_v63  ;;  %v4284_v63 = vpack.c.bf16 %v370_v61, %v369_v60  ;;  %v4292_v11 = vpack.c.bf16 %v374_v9, %v373_v8  ;;  %v996_v8 = vld [vmem:[#allocation6 + $0x60] sm:$0xff]  ;;  %v997_v9 = vld [vmem:[#allocation6 + $0x68] sm:$0xff] }
  0xc7   :  { %4215 = vmatpush3.bf16.msra.mxu1 %v4214_v5  ;;  %v4288_v5 = vpack.c.bf16 %v372_v3, %v371_v2  ;;  %v994_v2 = vld [vmem:[#allocation6 + $0x50] sm:$0xff]  ;;  %v995_v3 = vld [vmem:[#allocation6 + $0x58] sm:$0xff] }
  0xc8   :  { %4217 = vmatprep.subr.bf16.mxu1 %v4216_v6  ;;  %v355_v6 = vld [vmem:[#allocation4 + $0x760] sm:$0xff] }
  0xc9   :  { %v4290_v10 = vpack.c.bf16 %v356_v7, %v355_v6  ;;  %v1013_v6 = vld [vmem:[#allocation6 + $0xe8] sm:$0xff] }
  0xcb   :  { %4219 = vmatpush3.bf16.msra.mxu1 %v4218_v12  ;;  %v357_v12 = vld [vmem:[#allocation4 + $0x770] sm:$0xff] }
  0xcc   :  { %4221 = vmatprep.subr.bf16.mxu1 %v4220_v13  ;;  %v358_v13 = vld [vmem:[#allocation4 + $0x778] sm:$0xff] }
  0xcd   :  { %v4294_v14 = vpack.c.bf16 %v358_v13, %v357_v12  ;;  %v1015_v12 = vld [vmem:[#allocation6 + $0xf8] sm:$0xff] }
  0xcf   :  { %4223 = vmatpush3.bf16.msra.mxu1 %v4222_v18 }
  0xd0   :  { %4225 = vmatprep.subr.bf16.mxu1 %v4224_v19  ;;  %v5061_v19 = vmov 0.0  }
  0xd1   :  { %1087 = vmatprep.mubr.f32.mxu0 %v5061_v19 }
  0xd3   :  { %4227 = vmatpush3.bf16.msra.mxu1 %v4226_v24  ;;  %v1001_v24 = vld [vmem:[#allocation6 + $0x88] sm:$0xff] }
  0xd4   :  { %4229 = vmatprep.subr.bf16.mxu1 %v4228_v25  ;;  %v5261_v25 = vpack.c.bf16 %v1001_v24, %v1000_v23  ;;  %v1112_v23 = vld [vmem:[#allocation8 + $0x90] sm:$0xff]  ;;  %v1113_v24 = vld [vmem:[#allocation8 + $0x98] sm:$0xff] }
  0xd5   :  { %v5319_v27 = vpack.c.bf16 %v1113_v24, %v1112_v23 }
  0xd6   :  { %4297 = vmatprep.subr.bf16.mxu0 %v5261_v25 }
  0xd7   :  { %4231 = vmatpush3.bf16.msra.mxu1 %v4230_v30  ;;  %4299 = vmatpush3.bf16.msra.mxu0 %v5263_v28  ;;  %v1003_v30 = vld [vmem:[#allocation6 + $0x98] sm:$0xff] }
  0xd8   :  { %4265 = vmatprep.subr.bf16.mxu1 %v4264_v31  ;;  %v2976_v31 = vld [vmem:[%s5999_s3] ss:$0 sm:$0xff]  ;;  %v5270_v32 = vpack.c.bf16 %v1003_v30, %v1002_v29  ;;  %v1096_v29 = vld [vmem:[#allocation8 + $0x10] sm:$0xff]  ;;  %v1097_v30 = vld [vmem:[#allocation8 + $0x18] sm:$0xff]  ;;  %s2988_s3 = sld [smem:[#allocation3 + $0x38]] }
  0xda   :  { %797 = vmatmul.mubr.f32.vlgmr.msra.gmra.mrb[6].mxu1 %v113_v36  ;;  %v5272_v36 = vpack.c.bf16 %v987_v34, %v986_v33  ;;  %4301 = vmatprep.subr.bf16.mxu0 %v5270_v32  ;;  %v5323_v34 = vpack.c.bf16 %v1097_v30, %v1096_v29 }
  0xdb   :  { %4267 = vmatpush3.bf16.msra.mxu1 %v4266_v37  ;;  %936 = vmatprep.mubr.f32.mxu1 %v118_v41  ;;  %v1005_v41 = vld [vmem:[#allocation6 + $0xa8] sm:$0xff] }
  0xdc   :  { %4269 = vmatprep.subr.bf16.mxu1 %v4268_v38  ;;  %4303 = vmatpush3.bf16.msra.mxu0 %v5272_v36  ;;  %v5276_v42 = vpack.c.bf16 %v1005_v41, %v1004_v40  ;;  %v1099_v41 = vld [vmem:[#allocation8 + $0x28] sm:$0xff] }
  0xde   :  { %4305 = vmatprep.subr.bf16.mxu0 %v5276_v42  ;;  %s1226_s27 = scalar_lea.vmem %s6002_s6, %s2988_s3  ;;  %s2994_s3 = sld [smem:[#allocation3 + $0x29]] }
  0xdf   :  { %4271 = vmatpush3.bf16.msra.mxu1 %v4270_v44  ;;  %v989_v44 = vld [vmem:[#allocation6 + $0x28] sm:$0xff] }
  0xe0   :  { %4273 = vmatprep.subr.bf16.mxu1 %v4272_v45  ;;  %v5278_v46 = vpack.c.bf16 %v989_v44, %v988_v43 }
  0xe2   :  { %4307 = vmatpush3.bf16.msra.mxu0 %v5278_v46 }
  0xe3   :  { %4275 = vmatpush3.bf16.msra.mxu1 %v4274_v50  ;;  %v5284_v50 = vpack.c.bf16 %v1007_v49, %v1006_v48  ;;  %v1116_v48 = vld [vmem:[#allocation8 + $0xb0] sm:$0xff]  ;;  %v1117_v49 = vld [vmem:[#allocation8 + $0xb8] sm:$0xff] }
  0xe4   :  { %4277 = vmatprep.subr.bf16.mxu1 %v4276_v51  ;;  %v990_v51 = vld [vmem:[#allocation6 + $0x30] sm:$0xff] }
  0xe5   :  { %v5286_v53 = vpack.c.bf16 %v991_v52, %v990_v51  ;;  %4309 = vmatprep.subr.bf16.mxu0 %v5284_v50  ;;  %v1100_v51 = vld [vmem:[#allocation8 + $0x30] sm:$0xff]  ;;  %v5333_v52 = vpack.c.bf16 %v1117_v49, %v1116_v48  ;;  %v2978_v48 = vld [vmem:[%s6000_s4] ss:$0 sm:$0xff]  ;;  %s2982_s4 = sld [smem:[#allocation3 + $0x8]] }
  0xe7   :  { %4279 = vmatpush3.bf16.msra.mxu1 %v4278_v56  ;;  %4311 = vmatpush3.bf16.msra.mxu0 %v5286_v53  ;;  %v5290_v56 = vpack.c.bf16 %v1009_v55, %v1008_v54  ;;  %v1101_v54 = vld [vmem:[#allocation8 + $0x38] sm:$0xff] }
  0xe8   :  { %4281 = vmatprep.subr.bf16.mxu1 %v4280_v57  ;;  %v992_v57 = vld [vmem:[#allocation6 + $0x40] sm:$0xff]  ;;  %v5336_v55 = vpack.c.bf16 %v1101_v54, %v1100_v51 }
  0xe9   :  { %v5292_v59 = vpack.c.bf16 %v993_v58, %v992_v57  ;;  %4313 = vmatprep.subr.bf16.mxu0 %v5290_v56  ;;  %v2979_v51 = vld [vmem:[%s6001_s5] ss:$0 sm:$0xff]  ;;  %s2983_s5 = sld [smem:[#allocation3 + $0x10]] }
  0xeb   :  { %4283 = vmatpush3.bf16.msra.mxu1 %v4282_v62  ;;  %4315 = vmatpush3.bf16.msra.mxu0 %v5292_v59  ;;  %v1010_v62 = vld [vmem:[#allocation6 + $0xd0] sm:$0xff]  ;;  %s1208_s26 = scalar_lea.vmem %s6002_s6, %s2982_s4  ;;  %s2995_s4 = sld [smem:[#allocation3 + $0x31]] }
  0xec   :  { %4285 = vmatprep.subr.bf16.mxu1 %v4284_v63  ;;  %v1011_v63 = vld [vmem:[#allocation6 + $0xd8] sm:$0xff] }
  0xed   :  { %v5296_v1 = vpack.c.bf16 %v1011_v63, %v1010_v62 }
  0xef   :  { %4287 = vmatpush3.bf16.msra.mxu1 %v4286_v4  ;;  %v5298_v4 = vpack.c.bf16 %v995_v3, %v994_v2  ;;  %4317 = vmatprep.subr.bf16.mxu0 %v5296_v1  ;;  %v942_v2 = vlaneseq  ;;  %s1211_s11 = scalar_lea.vmem %s6002_s6, %s2983_s5 }
  0xf0   :  { %4289 = vmatprep.subr.bf16.mxu1 %v4288_v5  ;;  %v1012_v5 = vld [vmem:[#allocation6 + $0xe0] sm:$0xff] }
  0xf1   :  { %4319 = vmatpush3.bf16.msra.mxu0 %v5298_v4  ;;  %v5302_v7 = vpack.c.bf16 %v1013_v6, %v1012_v5  ;;  %v943_v3 = vshrl.u32 %v942_v2, 7  ;;  %v1121_v2 = vld [vmem:[#allocation8 + $0xd8] sm:$0xff]  ;;  %s1424_s25 = scalar_lea.vmem %s6002_s6, %s2995_s4 }
  0xf3   :  { %4291 = vmatpush3.bf16.msra.mxu1 %v4290_v10  ;;  %v5304_v10 = vpack.c.bf16 %v997_v9, %v996_v8  ;;  %4321 = vmatprep.subr.bf16.mxu0 %v5302_v7  ;;  %vm944_vm0 = vcmp.lt.s32.totalorder %v943_v3, 2 }
  0xf4   :  { %4293 = vmatprep.subr.bf16.mxu1 %v4292_v11  ;;  %v1014_v11 = vld [vmem:[#allocation6 + $0xf0] sm:$0xff]  ;;  %v2977_v9 = vsel %vm944_vm0, 1.0, %v5061_v19 }
  0xf5   :  { %4323 = vmatpush3.bf16.msra.mxu0 %v5304_v10  ;;  %v5308_v13 = vpack.c.bf16 %v1015_v12, %v1014_v11 }
  0xf7   :  { %4295 = vmatpush3.bf16.msra.mxu1 %v4294_v14  ;;  %v998_v14 = vld [vmem:[#allocation6 + $0x70] sm:$0xff]  ;;  %4325 = vmatprep.subr.bf16.mxu0 %v5308_v13 }
  0xfa   :  { %937 = vmatmul.mubr.f32.vlgmr.msra.gmra.mrb[8].mxu1 %v117_v15  ;;  %v999_v15 = vld [vmem:[#allocation6 + $0x78] sm:$0xff] }
  0xfb   :  { %1197 = vmatprep.mubr.f32.mxu1 %v5061_v19 }
 0x14d   :  { %v3078_v16 = vpop.f32.mrb[0].mxu1 }
 0x14e   :  { %v3079_v17 = vpop.f32.mrb[1].mxu1 }
 0x14f   :  { %v3080_v18 = vadd.f32 %v3079_v17, %v3078_v16  ;;  %v5310_v16 = vpack.c.bf16 %v999_v15, %v998_v14  ;;  %v1110_v17 = vld [vmem:[#allocation8 + $0x80] sm:$0xff] }
 0x151   :  { %v449_v38 = vadd.f32 %v3080_v18, %v2976_v31  ;;  %4327 = vmatpush3.bf16.msra.mxu0 %v5310_v16  ;;  %v1111_v18 = vld [vmem:[#allocation8 + $0x88] sm:$0xff] }
 0x152   :  { %4361 = vmatprep.subr.bf16.mxu0 %v5261_v25 }
 0x156   :  { %v3148_v20 = vpop.f32.mrb[0].mxu0 }
 0x157   :  { %v3149_v21 = vpop.f32.mrb[1].mxu0 }
 0x158   :  { %v3150_v22 = vadd.f32 %v3149_v21, %v3148_v20  ;;  %v1094_v20 = vld [vmem:[#allocation8] sm:$0xff]  ;;  %v5315_v21 = vpack.c.bf16 %v1111_v18, %v1110_v17 }
 0x15a   :  { %4329 = vmatprep.subr.bf16.mxu1 %v5315_v21 }
 0x16d   :  { %v3113_v35 = vpop.f32.mrb[2].mxu1 }
 0x16e   :  { %v3114_v37 = vpop.f32.mrb[3].mxu1 }
 0x16f   :  { %v3115_v39 = vadd.f32 %v3114_v37, %v3113_v35  ;;  %v1114_v37 = vld [vmem:[#allocation8 + $0xa0] sm:$0xff] }
 0x171   :  { %v519_v45 = vadd.f32 %v3115_v39, %v449_v38  ;;  %v1115_v38 = vld [vmem:[#allocation8 + $0xa8] sm:$0xff]  ;;  %v1098_v39 = vld [vmem:[#allocation8 + $0x20] sm:$0xff] }
 0x172   :  { %v5326_v40 = vpack.c.bf16 %v1115_v38, %v1114_v37  ;;  %v5330_v44 = vpack.c.bf16 %v1099_v41, %v1098_v39 }
 0x173   :  { %v5281_v47 = vadd.f32 %v3150_v22, %v519_v45  ;;  %v1095_v22 = vld [vmem:[#allocation8 + $0x8] sm:$0xff] }
 0x174   :  { %v5317_v26 = vpack.c.bf16 %v1095_v22, %v1094_v20 }
 0x176   :  { %v3218_v60 = vpop.f32.mrb[2].mxu0  ;;  %4331 = vmatpush3.bf16.msra.mxu1 %v5317_v26 }
 0x177   :  { %v3219_v61 = vpop.f32.mrb[3].mxu0  ;;  %4333 = vmatprep.subr.bf16.mxu1 %v5319_v27 }
 0x178   :  { %v3220_v0 = vadd.f32 %v3219_v61, %v3218_v60 }
 0x17a   :  { %4335 = vmatpush3.bf16.msra.mxu1 %v5323_v34 }
 0x17b   :  { %4337 = vmatprep.subr.bf16.mxu1 %v5326_v40 }
 0x17e   :  { %4339 = vmatpush3.bf16.msra.mxu1 %v5330_v44 }
 0x17f   :  { %4341 = vmatprep.subr.bf16.mxu1 %v5333_v52 }
 0x182   :  { %4343 = vmatpush3.bf16.msra.mxu1 %v5336_v55 }
 0x18d   :  { %v3183_v31 = vpop.f32.mrb[4].mxu1 }
 0x18e   :  { %v3184_v33 = vpop.f32.mrb[5].mxu1 }
 0x18f   :  { %v3185_v35 = vadd.f32 %v3184_v33, %v3183_v31 }
 0x191   :  { %v659_v43 = vadd.f32 %v3185_v35, %v5281_v47 }
 0x193   :  { %v729_v45 = vadd.f32 %v3220_v0, %v659_v43 }
 0x196   :  { %v3288_v47 = vpop.f32.mrb[4].mxu0 }
 0x197   :  { %v3289_v57 = vpop.f32.mrb[5].mxu0 }
 0x198   :  { %v3290_v58 = vadd.f32 %v3289_v57, %v3288_v47  ;;  %v1118_v57 = vld [vmem:[#allocation8 + $0xc0] sm:$0xff] }
 0x1ad   :  { %v3253_v60 = vpop.f32.mrb[6].mxu1 }
 0x1ae   :  { %v3254_v61 = vpop.f32.mrb[7].mxu1 }
 0x1af   :  { %v3255_v62 = vadd.f32 %v3254_v61, %v3253_v60  ;;  %v1102_v61 = vld [vmem:[#allocation8 + $0x40] sm:$0xff] }
 0x1b1   :  { %v799_v63 = vadd.f32 %v3255_v62, %v729_v45  ;;  %v1103_v62 = vld [vmem:[#allocation8 + $0x48] sm:$0xff] }
 0x1b3   :  { %v869_v0 = vadd.f32 %v3290_v58, %v799_v63  ;;  %v1119_v58 = vld [vmem:[#allocation8 + $0xc8] sm:$0xff]  ;;  %v5365_v63 = vpack.c.bf16 %v1103_v62, %v1102_v61  ;;  %v1224_v62 = vld [vmem:[%s1223_s20] sm:$0x1]  ;;  %s2996_s20 = sld [smem:[#allocation3 + $0x39]] }
 0x1b4   :  { %v5363_v60 = vpack.c.bf16 %v1119_v58, %v1118_v57 }
 0x1b6   :  { %4345 = vmatprep.subr.bf16.mxu1 %v5363_v60 }
 0x1b7   :  { %4347 = vmatpush3.bf16.msra.mxu1 %v5365_v63 }
 0x1b9   :  { %s1427_s29 = scalar_lea.vmem %s6002_s6, %s2996_s20  ;;  %s3002_s20 = sld [smem:[#allocation3 + $0x2a]] }
 0x1cd   :  { %v3323_v5 = vpop.f32.mrb[8].mxu1 }
 0x1ce   :  { %v3324_v6 = vpop.f32.mrb[9].mxu1 }
 0x1cf   :  { %v3325_v8 = vadd.f32 %v3324_v6, %v3323_v5  ;;  %v1104_v5 = vld [vmem:[#allocation8 + $0x50] sm:$0xff]  ;;  %v1105_v6 = vld [vmem:[#allocation8 + $0x58] sm:$0xff] }
 0x1d1   :  { %v939_v11 = vadd.f32 %v3325_v8, %v869_v0  ;;  %v1120_v0 = vld [vmem:[#allocation8 + $0xd0] sm:$0xff]  ;;  %v5371_v8 = vpack.c.bf16 %v1105_v6, %v1104_v5  ;;  %v1227_v5 = vld [vmem:[%s1226_s27] sm:$0x1]  ;;  %v1244_v6 = vrot.slane %v1224_v62, 2  ;;  %s1421_s27 = scalar_lea.vmem %s6002_s6, %s2994_s3  ;;  %s1603_s3 = scalar_lea.vmem %s6002_s6, %s2998_s30 }
 0x1d2   :  { %v5369_v3 = vpack.c.bf16 %v1121_v2, %v1120_v0  ;;  %s3018_s30 = sld [smem:[#allocation3 + $0x2c]] }
 0x1d3   :  { %v947_v12 = vmul.f32 %v2977_v9, %v939_v11 }
 0x1d4   :  { %4349 = vmatprep.subr.bf16.mxu1 %v5369_v3 }
 0x1d5   :  { %v948_v14 = vrot.slane %v947_v12, 4  ;;  %4351 = vmatpush3.bf16.msra.mxu1 %v5371_v8 }
 0x1d7   :  { %v949_v15 = vadd.f32 %v948_v14, %v947_v12  ;;  %v1106_v12 = vld [vmem:[#allocation8 + $0x60] sm:$0xff] }
 0x1d9   :  { %v950_v17 = vrot.slane %v949_v15, 2 }
 0x1db   :  { %v951_v18 = vadd.f32 %v950_v17, %v949_v15  ;;  %v1107_v15 = vld [vmem:[#allocation8 + $0x68] sm:$0xff]  ;;  %v1124_v17 = vld [vmem:[#allocation8 + $0xf0] sm:$0xff] }
 0x1dd   :  { %v952_v20 = vrot.slane %v951_v18, 1 }
 0x1df   :  { %v953_v22 = vadd.f32 %v952_v20, %v951_v18  ;;  %v1125_v18 = vld [vmem:[#allocation8 + $0xf8] sm:$0xff]  ;;  %v5377_v20 = vpack.c.bf16 %v1107_v15, %v1106_v12 }
 0x1e1   :  { %v954_v23 = vmul.f32 0.5, %v953_v22  ;;  %v5379_v22 = vpack.c.bf16 %v1125_v18, %v1124_v17  ;;  %v1410_v18 = vld [vmem:[%s1409_s28] sm:$0x1]  ;;  %s3011_s28 = sld [smem:[#allocation3 + $0x33]] }
 0x1e3   :  { %v955_v24 = vsub.f32 %v939_v11, %v954_v23  ;;  %v1123_v11 = vld [vmem:[#allocation8 + $0xe8] sm:$0xff]  ;;  %v1108_v23 = vld [vmem:[#allocation8 + $0x70] sm:$0xff] }
 0x1e5   :  { %v956_v29 = vmul.f32 %v955_v24, %v955_v24 }
 0x1e7   :  { %v957_v30 = vmul.f32 %v2977_v9, %v956_v29  ;;  %v1122_v9 = vld [vmem:[#allocation8 + $0xe0] sm:$0xff]  ;;  %s1812_s18 = scalar_lea.vmem %s6002_s6, %s3011_s28 }
 0x1e8   :  { %v5375_v14 = vpack.c.bf16 %v1123_v11, %v1122_v9  ;;  %v1247_v11 = vrot.slane %v1227_v5, 1 }
 0x1e9   :  { %v958_v31 = vrot.slane %v957_v30, 4 }
 0x1ea   :  { %4353 = vmatprep.subr.bf16.mxu1 %v5375_v14 }
 0x1eb   :  { %v959_v33 = vadd.f32 %v958_v31, %v957_v30  ;;  %4355 = vmatpush3.bf16.msra.mxu1 %v5377_v20  ;;  %v1209_v30 = vld [vmem:[%s1208_s26] sm:$0x1] }
 0x1ec   :  { %4357 = vmatprep.subr.bf16.mxu1 %v5379_v22  ;;  %v1212_v31 = vld [vmem:[%s1211_s11] sm:$0x1]  ;;  %s2989_s11 = sld [smem:[#allocation3 + $0x1]] }
 0x1ed   :  { %v960_v35 = vrot.slane %v959_v33, 2 }
 0x1ef   :  { %v961_v37 = vadd.f32 %v960_v35, %v959_v33  ;;  %v1229_v33 = vrot.slane %v1209_v30, 7  ;;  %v1206_v35 = vld [vmem:[%s1205_s23] sm:$0x1] }
 0x1f1   :  { %v962_v38 = vrot.slane %v961_v37, 1 }
 0x1f3   :  { %v963_v39 = vadd.f32 %v962_v38, %v961_v37  ;;  %v1215_v37 = vld [vmem:[%s1214_s15] sm:$0x1]  ;;  %v1232_v38 = vrot.slane %v1212_v31, 6  ;;  %s2999_s15 = sld [smem:[#allocation3 + $0x12]] }
 0x1f5   :  { %v964_v41 = vmul.f32 0.5, %v963_v39  ;;  %v1250_v39 = vsel %vm1249_vm1, %v1206_v35, %v1229_v33 }
 0x1f7   :  { %v965_v43 = vadd.f32 1e-05, %v964_v41  ;;  %v1218_v41 = vld [vmem:[%s1217_s0] sm:$0x1]  ;;  %s1406_s0 = scalar_lea.vmem %s6002_s6, %s2989_s11  ;;  %s3010_s11 = sld [smem:[#allocation3 + $0x2b]] }
 0x1f8   :  { %v1238_v57 = vrot.slane %v1218_v41, 4  ;;  %v1407_v30 = vld [vmem:[%s1406_s0] sm:$0x1] }
 0x1f9   :  { %4906 = vrsqrt.f32 %v965_v43  ;;  %v1235_v43 = vrot.slane %v1215_v37, 5  ;;  %v5479_v41 = vld [vmem:[%s6006_s10] ss:$0 sm:$0xff]  ;;  %s1606_s4 = scalar_lea.vmem %s6002_s6, %s2999_s15 }
 0x203   :  { %v4907_v45 = vpop.eup %4906 }
 0x204   :  { %v967_v49 = vmul.f32 %v4907_v45, %v955_v24  ;;  %v1109_v24 = vld [vmem:[#allocation8 + $0x78] sm:$0xff] }
 0x205   :  { %v5383_v29 = vpack.c.bf16 %v1109_v24, %v1108_v23  ;;  %v1413_v23 = vld [vmem:[%s1412_s16] sm:$0x1]  ;;  %v1430_v24 = vrot.slane %v1410_v18, 7  ;;  %s2997_s16 = sld [smem:[#allocation3 + $0x2]] }
 0x206   :  { %v975_v54 = vmul.f32 %v2978_v48, %v967_v49  ;;  %v1252_v48 = vsel %vm1251_vm2, %v1250_v39, %v1232_v38  ;;  %v5411_v49 = vld [vmem:[%s6004_s8] ss:$0 sm:$0xff]  ;;  %v1433_v33 = vrot.slane %v1413_v23, 6 }
 0x207   :  { %4359 = vmatpush3.bf16.msra.mxu1 %v5383_v29  ;;  %v1254_v58 = vsel %vm1253_vm3, %v1252_v48, %v1235_v43  ;;  %v1450_v35 = vsel %vm1249_vm1, %v1407_v30, %v1430_v24  ;;  %v1419_v38 = vld [vmem:[%s1418_s14] sm:$0x1] }
 0x208   :  { %v983_v47 = vadd.f32 %v2979_v51, %v975_v54  ;;  %4393 = vmatprep.subr.bf16.mxu1 %v5315_v21  ;;  %v1256_v2 = vsel %vm1255_vm4, %v1254_v58, %v1238_v57  ;;  %v1451_v48 = vsel %vm1251_vm2, %v1450_v35, %v1433_v33  ;;  %v1422_v57 = vld [vmem:[%s1421_s27] sm:$0x1]  ;;  %v1439_v58 = vrot.slane %v1419_v38, 4  ;;  %s1609_s27 = scalar_lea.vmem %s6002_s6, %s3000_s2  ;;  %s1997_s2 = scalar_lea.vmem %s6002_s6, %s3016_s22 }
 0x209   :  { %v1442_v5 = vrot.slane %v1422_v57, 3  ;;  %v1604_v30 = vld [vmem:[%s1603_s3] sm:$0x1]  ;;  %s3006_s3 = sld [smem:[#allocation3 + $0xb]] }
 0x20a   :  { %1088 = vmatmul.mubr.f32.vlgmr.msra.gmra.mrb[6].mxu0 %v983_v47  ;;  %v1221_v47 = vld [vmem:[%s1220_s19] sm:$0x1]  ;;  %s1415_s19 = scalar_lea.vmem %s6002_s6, %s2992_s24  ;;  %v1624_v33 = vrot.slane %v1604_v30, 7  ;;  %s1612_s24 = scalar_lea.vmem %s6002_s6, %s3001_s17 }
 0x20b   :  { %4363 = vmatpush3.bf16.msra.mxu0 %v5263_v28  ;;  %v1241_v0 = vrot.slane %v1221_v47, 3  ;;  %v1416_v31 = vld [vmem:[%s1415_s19] sm:$0x1]  ;;  %s1600_s14 = scalar_lea.vmem %s6002_s6, %s2997_s16  ;;  %s1618_s16 = scalar_lea.vmem %s6002_s6, %s3003_s9 }
 0x20c   :  { %4365 = vmatprep.subr.bf16.mxu0 %v5270_v32  ;;  %v1436_v39 = vrot.slane %v1416_v31, 5  ;;  %v1607_v31 = vld [vmem:[%s1606_s4] sm:$0x1]  ;;  %s3007_s17 = sld [smem:[#allocation3 + $0x13]]  ;;  %s3027_s4 = sld [smem:[#allocation3 + $0x35]] }
 0x20d   :  { %v1258_v9 = vsel %vm1257_vm5, %v1256_v2, %v1241_v0  ;;  %v1425_v2 = vld [vmem:[%s1424_s25] sm:$0x1]  ;;  %v1627_v38 = vrot.slane %v1607_v31, 6  ;;  %s3004_s25 = sld [smem:[#allocation3 + $0x3a]]  ;;  %s3008_s19 = sld [smem:[#allocation3 + $0x1b]] }
 0x20e   :  { %v1260_v12 = vsel %vm1259_vm6, %v1258_v9, %v1244_v6  ;;  %v1452_v62 = vsel %vm1253_vm3, %v1451_v48, %v1436_v39  ;;  %v1428_v9 = vld [vmem:[%s1427_s29] sm:$0x1]  ;;  %s1615_s29 = scalar_lea.vmem %s6002_s6, %s3002_s20  ;;  %s3013_s20 = sld [smem:[#allocation3 + $0x4]] }
 0x20f   :  { %4367 = vmatpush3.bf16.msra.mxu0 %v5272_v36  ;;  %v1262_v15 = vsel %vm1261_vm7, %v1260_v12, %v1247_v11  ;;  %v1453_v6 = vsel %vm1255_vm4, %v1452_v62, %v1439_v58  ;;  %v1445_v11 = vrot.slane %v1425_v2, 2  ;;  %v1601_v35 = vld [vmem:[%s1600_s14] sm:$0x1]  ;;  %s1797_s7 = scalar_lea.vmem %s6002_s6, %s3006_s3  ;;  %s3009_s14 = sld [smem:[#allocation3 + $0x23]] }
 0x210   :  { %4369 = vmatprep.subr.bf16.mxu0 %v5276_v42  ;;  %v1454_v12 = vsel %vm1257_vm5, %v1453_v6, %v1442_v5  ;;  %v1644_v39 = vsel %vm1249_vm1, %v1601_v35, %v1624_v33  ;;  %v1616_v62 = vld [vmem:[%s1615_s29] sm:$0x1]  ;;  %s3026_s3 = sld [smem:[#allocation3 + $0x2d]] }
 0x212   :  { %s1800_s26 = scalar_lea.vmem %s6002_s6, %s3007_s17 }
 0x213   :  { %4371 = vmatpush3.bf16.msra.mxu0 %v5278_v46  ;;  %s1621_s0 = scalar_lea.vmem %s6002_s6, %s3004_s25  ;;  %s1803_s23 = scalar_lea.vmem %s6002_s6, %s3008_s19 }
 0x214   :  { %4373 = vmatprep.subr.bf16.mxu0 %v5284_v50  ;;  %s1988_s29 = scalar_lea.vmem %s6002_s6, %s3013_s20  ;;  %s2006_s20 = scalar_lea.vmem %s6002_s6, %s3019_s1 }
 0x215   :  { %s1806_s15 = scalar_lea.vmem %s6002_s6, %s3009_s14  ;;  %s3015_s14 = sld [smem:[#allocation3 + $0x14]] }
 0x217   :  { %4375 = vmatpush3.bf16.msra.mxu0 %v5286_v53 }
 0x218   :  { %4377 = vmatprep.subr.bf16.mxu0 %v5290_v56 }
 0x21b   :  { %4379 = vmatpush3.bf16.msra.mxu0 %v5292_v59  ;;  %s1994_s25 = scalar_lea.vmem %s6002_s6, %s3015_s14 }
 0x21c   :  { %4381 = vmatprep.subr.bf16.mxu0 %v5296_v1 }
 0x21f   :  { %4383 = vmatpush3.bf16.msra.mxu0 %v5298_v4 }
 0x220   :  { %4385 = vmatprep.subr.bf16.mxu0 %v5302_v7 }
 0x223   :  { %4387 = vmatpush3.bf16.msra.mxu0 %v5304_v10 }
 0x224   :  { %4389 = vmatprep.subr.bf16.mxu0 %v5308_v13 }
 0x227   :  { %4391 = vmatpush3.bf16.msra.mxu0 %v5310_v16 }
 0x228   :  { %4425 = vmatprep.subr.bf16.mxu0 %v5261_v25 }
 0x2dd   :  { %v3358_v45 = vpop.f32.mrb[6].mxu0 }
 0x2de   :  { %v3359_v51 = vpop.f32.mrb[7].mxu0 }
 0x2df   :  { %v3360_v54 = vadd.f32 %v3359_v51, %v3358_v45 }
 0x2e1   :  { %v1090_v61 = vadd.f32 %v3360_v54, %v5411_v49 }
 0x2e3   :  { %4908 = vtanh.f32 %v1090_v61 }
 0x2ed   :  { %v4909_v17 = vpop.eup %4908 }
 0x2ee   :  { %1198 = vmatmul.mubr.f32.vlgmr.msra.gmra.mrb[10].mxu1 %v4909_v17  ;;  %1327 = vmatprep.mubr.f32.mxu0 %v4909_v17  ;;  %v1455_v17 = vsel %vm1259_vm6, %v1454_v12, %v1445_v11  ;;  %v1636_v11 = vrot.slane %v1616_v62, 3 }
 0x2ef   :  { %1328 = vmatmul.mubr.f32.vlgmr.msra.gmra.mrb[8].mxu0 %v1262_v15  ;;  %4395 = vmatpush3.bf16.msra.mxu1 %v5317_v26  ;;  %v1448_v15 = vrot.slane %v1428_v9, 1  ;;  %v1619_v9 = vld [vmem:[%s1618_s16] sm:$0x1]  ;;  %s3012_s16 = sld [smem:[#allocation3 + $0x3b]] }
 0x2f0   :  { %4427 = vmatpush3.bf16.msra.mxu0 %v5263_v28  ;;  %4397 = vmatprep.subr.bf16.mxu1 %v5319_v27 }
 0x2f1   :  { %4429 = vmatprep.subr.bf16.mxu0 %v5270_v32  ;;  %v1456_v23 = vsel %vm1261_vm7, %v1455_v17, %v1448_v15  ;;  %v1622_v15 = vld [vmem:[%s1621_s0] sm:$0x1]  ;;  %v1639_v17 = vrot.slane %v1619_v9, 2  ;;  %s1809_s0 = scalar_lea.vmem %s6002_s6, %s3010_s11  ;;  %s3021_s11 = sld [smem:[#allocation3 + $0x5]] }
 0x2f3   :  { %4399 = vmatpush3.bf16.msra.mxu1 %v5323_v34 }
 0x2f4   :  { %4431 = vmatpush3.bf16.msra.mxu0 %v5272_v36  ;;  %4401 = vmatprep.subr.bf16.mxu1 %v5326_v40 }
 0x2f5   :  { %4433 = vmatprep.subr.bf16.mxu0 %v5276_v42  ;;  %s1815_s5 = scalar_lea.vmem %s6002_s6, %s3012_s16 }
 0x2f7   :  { %4403 = vmatpush3.bf16.msra.mxu1 %v5330_v44 }
 0x2f8   :  { %4435 = vmatpush3.bf16.msra.mxu0 %v5278_v46  ;;  %4405 = vmatprep.subr.bf16.mxu1 %v5333_v52 }
 0x2f9   :  { %4437 = vmatprep.subr.bf16.mxu0 %v5284_v50 }
 0x2fb   :  { %4407 = vmatpush3.bf16.msra.mxu1 %v5336_v55 }
 0x2fc   :  { %4439 = vmatpush3.bf16.msra.mxu0 %v5286_v53  ;;  %4409 = vmatprep.subr.bf16.mxu1 %v5363_v60 }
 0x2fd   :  { %4441 = vmatprep.subr.bf16.mxu0 %v5290_v56 }
 0x2ff   :  { %4411 = vmatpush3.bf16.msra.mxu1 %v5365_v63 }
 0x300   :  { %4443 = vmatpush3.bf16.msra.mxu0 %v5292_v59  ;;  %4413 = vmatprep.subr.bf16.mxu1 %v5369_v3 }
 0x301   :  { %4445 = vmatprep.subr.bf16.mxu0 %v5296_v1 }
 0x303   :  { %4415 = vmatpush3.bf16.msra.mxu1 %v5371_v8 }
 0x304   :  { %4447 = vmatpush3.bf16.msra.mxu0 %v5298_v4  ;;  %4417 = vmatprep.subr.bf16.mxu1 %v5375_v14 }
 0x305   :  { %4449 = vmatprep.subr.bf16.mxu0 %v5302_v7 }
 0x307   :  { %4419 = vmatpush3.bf16.msra.mxu1 %v5377_v20 }
 0x308   :  { %4451 = vmatpush3.bf16.msra.mxu0 %v5304_v10  ;;  %4421 = vmatprep.subr.bf16.mxu1 %v5379_v22 }
 0x309   :  { %4453 = vmatprep.subr.bf16.mxu0 %v5308_v13 }
 0x30b   :  { %4423 = vmatpush3.bf16.msra.mxu1 %v5383_v29 }
 0x30c   :  { %4455 = vmatpush3.bf16.msra.mxu0 %v5310_v16  ;;  %4457 = vmatprep.subr.bf16.mxu1 %v5315_v21 }
 0x30d   :  { %4489 = vmatprep.subr.bf16.mxu0 %v5261_v25 }
 0x3c1   :  { %v3393_v37 = vpop.f32.mrb[10].mxu1 }
 0x3c2   :  { %v3394_v43 = vpop.f32.mrb[11].mxu1  ;;  %v3428_v45 = vpop.f32.mrb[8].mxu0 }
 0x3c3   :  { %v3395_v51 = vadd.f32 %v3394_v43, %v3393_v37  ;;  %v3429_v54 = vpop.f32.mrb[9].mxu0  ;;  %v1610_v37 = vld [vmem:[%s1609_s27] sm:$0x1] }
 0x3c4   :  { %v3430_v47 = vadd.f32 %v3429_v54, %v3428_v45  ;;  %v1613_v45 = vld [vmem:[%s1612_s24] sm:$0x1]  ;;  %v1630_v48 = vrot.slane %v1610_v37, 5  ;;  %s3024_s24 = sld [smem:[#allocation3 + $0x1d]] }
 0x3c5   :  { %v1200_v61 = vadd.f32 %v3395_v51, %v5479_v41  ;;  %v1798_v37 = vld [vmem:[%s1797_s7] sm:$0x1]  ;;  %s3014_s7 = sld [smem:[#allocation3 + $0xc]] }
 0x3c6   :  { %v1330_v0 = vadd.f32 %v3430_v47, %v5411_v49  ;;  %v1645_v47 = vsel %vm1251_vm2, %v1644_v39, %v1627_v38  ;;  %v1801_v38 = vld [vmem:[%s1800_s26] sm:$0x1]  ;;  %v1818_v39 = vrot.slane %v1798_v37, 7  ;;  %s3035_s26 = sld [smem:[#allocation3 + $0x36]] }
 0x3c7   :  { %4910 = vtanh.f32 %v1200_v61  ;;  %v1646_v5 = vsel %vm1253_vm3, %v1645_v47, %v1630_v48  ;;  %v1821_v48 = vrot.slane %v1801_v38, 6  ;;  %v1807_v47 = vld [vmem:[%s1806_s15] sm:$0x1]  ;;  %s3032_s15 = sld [smem:[#allocation3 + $0x1e]] }
 0x3c8   :  { %4912 = vtanh.f32 %v1330_v0  ;;  %v1633_v0 = vrot.slane %v1613_v45, 4  ;;  %v1804_v45 = vld [vmem:[%s1803_s23] sm:$0x1]  ;;  %v1827_v9 = vrot.slane %v1807_v47, 4 }
 0x3c9   :  { %v1989_v47 = vld [vmem:[%s1988_s29] sm:$0x1]  ;;  %s3025_s29 = sld [smem:[#allocation3 + $0x25]] }
 0x3ca   :  { %v1647_v12 = vsel %vm1255_vm4, %v1646_v5, %v1633_v0  ;;  %s2191_s19 = scalar_lea.vmem %s6002_s6, %s3024_s24 }
 0x3cb   :  { %s1991_s9 = scalar_lea.vmem %s6002_s6, %s3014_s7  ;;  %s3034_s7 = sld [smem:[#allocation3 + $0x2e]] }
 0x3cd   :  { %s2385_s22 = scalar_lea.vmem %s6002_s6, %s3032_s15  ;;  %s3044_s15 = sld [smem:[#allocation3 + $0x3f]] }
 0x3cf   :  { %s2194_s14 = scalar_lea.vmem %s6002_s6, %s3025_s29  ;;  %s3031_s29 = sld [smem:[#allocation3 + $0x16]] }
 0x3d1   :  { %v5494_v18 = vpop.eup %4910 }
 0x3d2   :  { %v4913_v24 = vpop.eup %4912  ;;  %1398 = vmatprep.mubr.f32.mxu1 %v5494_v18 }
 0x3d3   :  { %1399 = vmatmul.mubr.f32.vlgmr.msra.gmra.mrb[12].mxu1 %v4913_v24  ;;  %1521 = vmatprep.mubr.f32.mxu0 %v4913_v24  ;;  %v1642_v24 = vrot.slane %v1622_v15, 1 }
 0x3d4   :  { %1522 = vmatmul.mubr.f32.vlgmr.msra.gmra.mrb[10].mxu0 %v1456_v23  ;;  %4459 = vmatpush3.bf16.msra.mxu1 %v5317_v26  ;;  %v1648_v23 = vsel %vm1257_vm5, %v1647_v12, %v1636_v11 }
 0x3d5   :  { %4491 = vmatpush3.bf16.msra.mxu0 %v5263_v28  ;;  %4461 = vmatprep.subr.bf16.mxu1 %v5319_v27  ;;  %v1649_v30 = vsel %vm1259_vm6, %v1648_v23, %v1639_v17  ;;  %v1813_v17 = vld [vmem:[%s1812_s18] sm:$0x1]  ;;  %s3020_s18 = sld [smem:[#allocation3 + $0x3c]] }
 0x3d6   :  { %4493 = vmatprep.subr.bf16.mxu0 %v5270_v32  ;;  %v1650_v33 = vsel %vm1261_vm7, %v1649_v30, %v1642_v24  ;;  %v1816_v30 = vld [vmem:[%s1815_s5] sm:$0x1]  ;;  %s2003_s5 = scalar_lea.vmem %s6002_s6, %s3018_s30  ;;  %s3029_s30 = sld [smem:[#allocation3 + $0x6]] }
 0x3d7   :  { %v1836_v37 = vrot.slane %v1816_v30, 1 }
 0x3d8   :  { %4463 = vmatpush3.bf16.msra.mxu1 %v5323_v34 }
 0x3d9   :  { %4495 = vmatpush3.bf16.msra.mxu0 %v5272_v36  ;;  %4465 = vmatprep.subr.bf16.mxu1 %v5326_v40 }
 0x3da   :  { %4497 = vmatprep.subr.bf16.mxu0 %v5276_v42 }
 0x3db   :  { %s2009_s27 = scalar_lea.vmem %s6002_s6, %s3020_s18  ;;  %s2382_s18 = scalar_lea.vmem %s6002_s6, %s3031_s29 }
 0x3dc   :  { %4467 = vmatpush3.bf16.msra.mxu1 %v5330_v44 }
 0x3dd   :  { %4499 = vmatpush3.bf16.msra.mxu0 %v5278_v46  ;;  %4469 = vmatprep.subr.bf16.mxu1 %v5333_v52 }
 0x3de   :  { %4501 = vmatprep.subr.bf16.mxu0 %v5284_v50 }
 0x3e0   :  { %4471 = vmatpush3.bf16.msra.mxu1 %v5336_v55 }
 0x3e1   :  { %4503 = vmatpush3.bf16.msra.mxu0 %v5286_v53  ;;  %4473 = vmatprep.subr.bf16.mxu1 %v5363_v60 }
 0x3e2   :  { %4505 = vmatprep.subr.bf16.mxu0 %v5290_v56 }
 0x3e4   :  { %4475 = vmatpush3.bf16.msra.mxu1 %v5365_v63 }
 0x3e5   :  { %4507 = vmatpush3.bf16.msra.mxu0 %v5292_v59  ;;  %4477 = vmatprep.subr.bf16.mxu1 %v5369_v3 }
 0x3e6   :  { %4509 = vmatprep.subr.bf16.mxu0 %v5296_v1 }
 0x3e8   :  { %4479 = vmatpush3.bf16.msra.mxu1 %v5371_v8 }
 0x3e9   :  { %4511 = vmatpush3.bf16.msra.mxu0 %v5298_v4  ;;  %4481 = vmatprep.subr.bf16.mxu1 %v5375_v14 }
 0x3ea   :  { %4513 = vmatprep.subr.bf16.mxu0 %v5302_v7 }
 0x3ec   :  { %4483 = vmatpush3.bf16.msra.mxu1 %v5377_v20 }
 0x3ed   :  { %4515 = vmatpush3.bf16.msra.mxu0 %v5304_v10  ;;  %4485 = vmatprep.subr.bf16.mxu1 %v5379_v22 }
 0x3ee   :  { %4517 = vmatprep.subr.bf16.mxu0 %v5308_v13 }
 0x3f0   :  { %4487 = vmatpush3.bf16.msra.mxu1 %v5383_v29 }
 0x3f1   :  { %4519 = vmatpush3.bf16.msra.mxu0 %v5310_v16  ;;  %4521 = vmatprep.subr.bf16.mxu1 %v5315_v21 }
 0x3f2   :  { %4553 = vmatprep.subr.bf16.mxu0 %v5261_v25 }
 0x4a6   :  { %v3463_v43 = vpop.f32.mrb[12].mxu1 }
 0x4a7   :  { %v3464_v51 = vpop.f32.mrb[13].mxu1  ;;  %v3498_v54 = vpop.f32.mrb[10].mxu0 }
 0x4a8   :  { %v3465_v57 = vadd.f32 %v3464_v51, %v3463_v43  ;;  %v3499_v58 = vpop.f32.mrb[11].mxu0  ;;  %v1795_v43 = vld [vmem:[%s1794_s21] sm:$0x1]  ;;  %s3017_s21 = sld [smem:[#allocation3 + $0x24]] }
 0x4a9   :  { %v3500_v61 = vadd.f32 %v3499_v58, %v3498_v54  ;;  %v1838_v51 = vsel %vm1249_vm1, %v1795_v43, %v1818_v39 }
 0x4aa   :  { %v1401_v2 = vadd.f32 %v3465_v57, %v5479_v41  ;;  %v1824_v57 = vrot.slane %v1804_v45, 5  ;;  %v1839_v62 = vsel %vm1251_vm2, %v1838_v51, %v1821_v48  ;;  %v1992_v48 = vld [vmem:[%s1991_s9] sm:$0x1]  ;;  %s3022_s9 = sld [smem:[#allocation3 + $0xd]] }
 0x4ab   :  { %v1524_v6 = vadd.f32 %v3500_v61, %v5411_v49  ;;  %v1995_v51 = vld [vmem:[%s1994_s25] sm:$0x1] }
 0x4ac   :  { %4914 = vtanh.f32 %v1401_v2  ;;  %v1840_v12 = vsel %vm1253_vm3, %v1839_v62, %v1824_v57  ;;  %v1998_v57 = vld [vmem:[%s1997_s2] sm:$0x1] }
 0x4ad   :  { %4916 = vtanh.f32 %v1524_v6  ;;  %v1810_v6 = vld [vmem:[%s1809_s0] sm:$0x1]  ;;  %v1841_v24 = vsel %vm1255_vm4, %v1840_v12, %v1827_v9  ;;  %s2182_s0 = scalar_lea.vmem %s6002_s6, %s3021_s11  ;;  %s2200_s11 = scalar_lea.vmem %s6002_s6, %s3027_s4 }
 0x4ae   :  { %v1830_v23 = vrot.slane %v1810_v6, 3  ;;  %s2000_s17 = scalar_lea.vmem %s6002_s6, %s3017_s21  ;;  %s3023_s21 = sld [smem:[#allocation3 + $0x15]] }
 0x4b0   :  { %s2185_s28 = scalar_lea.vmem %s6002_s6, %s3022_s9 }
 0x4b4   :  { %s2188_s16 = scalar_lea.vmem %s6002_s6, %s3023_s21 }
 0x4b6   :  { %v5562_v31 = vpop.eup %4914 }
 0x4b7   :  { %v4917_v35 = vpop.eup %4916  ;;  %1592 = vmatprep.mubr.f32.mxu1 %v5562_v31 }
 0x4b8   :  { %1593 = vmatmul.mubr.f32.vlgmr.msra.gmra.mrb[14].mxu1 %v4917_v35  ;;  %1715 = vmatprep.mubr.f32.mxu0 %v4917_v35  ;;  %v1842_v35 = vsel %vm1257_vm5, %v1841_v24, %v1830_v23 }
 0x4b9   :  { %1716 = vmatmul.mubr.f32.vlgmr.msra.gmra.mrb[12].mxu0 %v1650_v33  ;;  %4523 = vmatpush3.bf16.msra.mxu1 %v5317_v26  ;;  %v1833_v33 = vrot.slane %v1813_v17, 2  ;;  %v2004_v17 = vld [vmem:[%s2003_s5] sm:$0x1]  ;;  %s2376_s5 = scalar_lea.vmem %s6002_s6, %s3029_s30  ;;  %s2394_s30 = scalar_lea.vmem %s6002_s6, %s3035_s26 }
 0x4ba   :  { %4555 = vmatpush3.bf16.msra.mxu0 %v5263_v28  ;;  %4525 = vmatprep.subr.bf16.mxu1 %v5319_v27 }
 0x4bb   :  { %4557 = vmatprep.subr.bf16.mxu0 %v5270_v32  ;;  %v1843_v38 = vsel %vm1259_vm6, %v1842_v35, %v1833_v33  ;;  %v2007_v35 = vld [vmem:[%s2006_s20] sm:$0x1]  ;;  %s3028_s20 = sld [smem:[#allocation3 + $0x3d]] }
 0x4bc   :  { %v1844_v43 = vsel %vm1261_vm7, %v1843_v38, %v1836_v37  ;;  %v2024_v37 = vrot.slane %v2004_v17, 3 }
 0x4bd   :  { %4527 = vmatpush3.bf16.msra.mxu1 %v5323_v34 }
 0x4be   :  { %4559 = vmatpush3.bf16.msra.mxu0 %v5272_v36  ;;  %4529 = vmatprep.subr.bf16.mxu1 %v5326_v40 }
 0x4bf   :  { %4561 = vmatprep.subr.bf16.mxu0 %v5276_v42 }
 0x4c1   :  { %4531 = vmatpush3.bf16.msra.mxu1 %v5330_v44  ;;  %s2203_s23 = scalar_lea.vmem %s6002_s6, %s3028_s20 }
 0x4c2   :  { %4563 = vmatpush3.bf16.msra.mxu0 %v5278_v46  ;;  %4533 = vmatprep.subr.bf16.mxu1 %v5333_v52 }
 0x4c3   :  { %4565 = vmatprep.subr.bf16.mxu0 %v5284_v50 }
 0x4c5   :  { %4535 = vmatpush3.bf16.msra.mxu1 %v5336_v55 }
 0x4c6   :  { %4567 = vmatpush3.bf16.msra.mxu0 %v5286_v53  ;;  %4537 = vmatprep.subr.bf16.mxu1 %v5363_v60 }
 0x4c7   :  { %4569 = vmatprep.subr.bf16.mxu0 %v5290_v56 }
 0x4c9   :  { %4539 = vmatpush3.bf16.msra.mxu1 %v5365_v63 }
 0x4ca   :  { %4571 = vmatpush3.bf16.msra.mxu0 %v5292_v59  ;;  %4541 = vmatprep.subr.bf16.mxu1 %v5369_v3 }
 0x4cb   :  { %4573 = vmatprep.subr.bf16.mxu0 %v5296_v1 }
 0x4cd   :  { %4543 = vmatpush3.bf16.msra.mxu1 %v5371_v8 }
 0x4ce   :  { %4575 = vmatpush3.bf16.msra.mxu0 %v5298_v4  ;;  %4545 = vmatprep.subr.bf16.mxu1 %v5375_v14 }
 0x4cf   :  { %4577 = vmatprep.subr.bf16.mxu0 %v5302_v7 }
 0x4d1   :  { %4547 = vmatpush3.bf16.msra.mxu1 %v5377_v20 }
 0x4d2   :  { %4579 = vmatpush3.bf16.msra.mxu0 %v5304_v10  ;;  %4549 = vmatprep.subr.bf16.mxu1 %v5379_v22 }
 0x4d3   :  { %4581 = vmatprep.subr.bf16.mxu0 %v5308_v13 }
 0x4d5   :  { %4551 = vmatpush3.bf16.msra.mxu1 %v5383_v29 }
 0x4d6   :  { %4583 = vmatpush3.bf16.msra.mxu0 %v5310_v16  ;;  %4585 = vmatprep.subr.bf16.mxu1 %v5315_v21 }
 0x4d7   :  { %4617 = vmatprep.subr.bf16.mxu0 %v5261_v25 }
 0x58b   :  { %v3533_v54 = vpop.f32.mrb[14].mxu1 }
 0x58c   :  { %v3534_v58 = vpop.f32.mrb[15].mxu1  ;;  %v3568_v61 = vpop.f32.mrb[12].mxu0 }
 0x58d   :  { %v3535_v0 = vadd.f32 %v3534_v58, %v3533_v54  ;;  %v3569_v2 = vpop.f32.mrb[13].mxu0  ;;  %v2012_v54 = vrot.slane %v1992_v48, 7  ;;  %v2015_v58 = vrot.slane %v1995_v51, 6 }
 0x58e   :  { %v3570_v5 = vadd.f32 %v3569_v2, %v3568_v61  ;;  %v2018_v2 = vrot.slane %v1998_v57, 5 }
 0x58f   :  { %v1595_v11 = vadd.f32 %v3535_v0, %v5479_v41  ;;  %v2032_v61 = vsel %vm1249_vm1, %v1989_v47, %v2012_v54  ;;  %v2001_v0 = vld [vmem:[%s2000_s17] sm:$0x1]  ;;  %s3037_s17 = sld [smem:[#allocation3 + $0x7]] }
 0x590   :  { %v1718_v15 = vadd.f32 %v3570_v5, %v5411_v49  ;;  %v2033_v9 = vsel %vm1251_vm2, %v2032_v61, %v2015_v58  ;;  %v2021_v23 = vrot.slane %v2001_v0, 4  ;;  %v2186_v61 = vld [vmem:[%s2185_s28] sm:$0x1]  ;;  %s3030_s28 = sld [smem:[#allocation3 + $0xe]] }
 0x591   :  { %4918 = vtanh.f32 %v1595_v11  ;;  %v2034_v30 = vsel %vm1253_vm3, %v2033_v9, %v2018_v2  ;;  %v2206_v0 = vrot.slane %v2186_v61, 7  ;;  %v2183_v2 = vld [vmem:[%s2182_s0] sm:$0x1]  ;;  %s3033_s0 = sld [smem:[#allocation3 + $0x26]] }
 0x592   :  { %4920 = vtanh.f32 %v1718_v15  ;;  %v2035_v38 = vsel %vm1255_vm4, %v2034_v30, %v2021_v23 }
 0x593   :  { %v2036_v48 = vsel %vm1257_vm5, %v2035_v38, %v2024_v37  ;;  %v2226_v9 = vsel %vm1249_vm1, %v2183_v2, %v2206_v0 }
 0x595   :  { %s2570_s9 = scalar_lea.vmem %s6002_s6, %s3037_s17 }
 0x596   :  { %s2379_s1 = scalar_lea.vmem %s6002_s6, %s3030_s28 }
 0x597   :  { %s2388_s21 = scalar_lea.vmem %s6002_s6, %s3033_s0 }
 0x59b   :  { %v5630_v39 = vpop.eup %4918 }
 0x59c   :  { %v4921_v45 = vpop.eup %4920  ;;  %1786 = vmatprep.mubr.f32.mxu1 %v5630_v39 }
 0x59d   :  { %1787 = vmatmul.mubr.f32.vlgmr.msra.gmra.mrb[16].mxu1 %v4921_v45  ;;  %1909 = vmatprep.mubr.f32.mxu0 %v4921_v45  ;;  %v2027_v45 = vrot.slane %v2007_v35, 2 }
 0x59e   :  { %1910 = vmatmul.mubr.f32.vlgmr.msra.gmra.mrb[14].mxu0 %v1844_v43  ;;  %4587 = vmatpush3.bf16.msra.mxu1 %v5317_v26  ;;  %v2010_v43 = vld [vmem:[%s2009_s27] sm:$0x1]  ;;  %s2197_s27 = scalar_lea.vmem %s6002_s6, %s3026_s3  ;;  %s3039_s3 = sld [smem:[#allocation3 + $0x17]] }
 0x59f   :  { %4619 = vmatpush3.bf16.msra.mxu0 %v5263_v28  ;;  %4589 = vmatprep.subr.bf16.mxu1 %v5319_v27  ;;  %v2030_v51 = vrot.slane %v2010_v43, 1  ;;  %v2037_v54 = vsel %vm1259_vm6, %v2036_v48, %v2027_v45  ;;  %v2198_v37 = vld [vmem:[%s2197_s27] sm:$0x1] }
 0x5a0   :  { %4621 = vmatprep.subr.bf16.mxu0 %v5270_v32 }
 0x5a1   :  { %v2038_v57 = vsel %vm1261_vm7, %v2037_v54, %v2030_v51  ;;  %v2201_v51 = vld [vmem:[%s2200_s11] sm:$0x1]  ;;  %v2218_v54 = vrot.slane %v2198_v37, 3  ;;  %s3036_s11 = sld [smem:[#allocation3 + $0x3e]] }
 0x5a2   :  { %4591 = vmatpush3.bf16.msra.mxu1 %v5323_v34  ;;  %v2221_v61 = vrot.slane %v2201_v51, 2 }
 0x5a3   :  { %4623 = vmatpush3.bf16.msra.mxu0 %v5272_v36  ;;  %4593 = vmatprep.subr.bf16.mxu1 %v5326_v40 }
 0x5a4   :  { %4625 = vmatprep.subr.bf16.mxu0 %v5276_v42 }
 0x5a6   :  { %4595 = vmatpush3.bf16.msra.mxu1 %v5330_v44 }
 0x5a7   :  { %4627 = vmatpush3.bf16.msra.mxu0 %v5278_v46  ;;  %4597 = vmatprep.subr.bf16.mxu1 %v5333_v52  ;;  %s2397_s0 = scalar_lea.vmem %s6002_s6, %s3036_s11 }
 0x5a8   :  { %4629 = vmatprep.subr.bf16.mxu0 %v5284_v50 }
 0x5aa   :  { %4599 = vmatpush3.bf16.msra.mxu1 %v5336_v55 }
 0x5ab   :  { %4631 = vmatpush3.bf16.msra.mxu0 %v5286_v53  ;;  %4601 = vmatprep.subr.bf16.mxu1 %v5363_v60 }
 0x5ac   :  { %4633 = vmatprep.subr.bf16.mxu0 %v5290_v56 }
 0x5ae   :  { %4603 = vmatpush3.bf16.msra.mxu1 %v5365_v63 }
 0x5af   :  { %4635 = vmatpush3.bf16.msra.mxu0 %v5292_v59  ;;  %4605 = vmatprep.subr.bf16.mxu1 %v5369_v3 }
 0x5b0   :  { %4637 = vmatprep.subr.bf16.mxu0 %v5296_v1 }
 0x5b2   :  { %4607 = vmatpush3.bf16.msra.mxu1 %v5371_v8 }
 0x5b3   :  { %4639 = vmatpush3.bf16.msra.mxu0 %v5298_v4  ;;  %4609 = vmatprep.subr.bf16.mxu1 %v5375_v14 }
 0x5b4   :  { %4641 = vmatprep.subr.bf16.mxu0 %v5302_v7 }
 0x5b6   :  { %4611 = vmatpush3.bf16.msra.mxu1 %v5377_v20 }
 0x5b7   :  { %4643 = vmatpush3.bf16.msra.mxu0 %v5304_v10  ;;  %4613 = vmatprep.subr.bf16.mxu1 %v5379_v22 }
 0x5b8   :  { %4645 = vmatprep.subr.bf16.mxu0 %v5308_v13 }
 0x5ba   :  { %4615 = vmatpush3.bf16.msra.mxu1 %v5383_v29 }
 0x5bb   :  { %4647 = vmatpush3.bf16.msra.mxu0 %v5310_v16  ;;  %4649 = vmatprep.subr.bf16.mxu1 %v5315_v21 }
 0x5bc   :  { %4681 = vmatprep.subr.bf16.mxu0 %v5261_v25 }
 0x670   :  { %v3603_v62 = vpop.f32.mrb[16].mxu1 }
 0x671   :  { %v3604_v5 = vpop.f32.mrb[17].mxu1  ;;  %v3638_v6 = vpop.f32.mrb[14].mxu0 }
 0x672   :  { %v3605_v11 = vadd.f32 %v3604_v5, %v3603_v62  ;;  %v3639_v12 = vpop.f32.mrb[15].mxu0  ;;  %v2189_v62 = vld [vmem:[%s2188_s16] sm:$0x1] }
 0x673   :  { %v3640_v15 = vadd.f32 %v3639_v12, %v3638_v6  ;;  %v2192_v5 = vld [vmem:[%s2191_s19] sm:$0x1]  ;;  %v2209_v6 = vrot.slane %v2189_v62, 6 }
 0x674   :  { %v1789_v24 = vadd.f32 %v3605_v11, %v5479_v41  ;;  %v2195_v12 = vld [vmem:[%s2194_s14] sm:$0x1] }
 0x675   :  { %v1912_v33 = vadd.f32 %v3640_v15, %v5411_v49  ;;  %v2212_v15 = vrot.slane %v2192_v5, 5  ;;  %v2215_v38 = vrot.slane %v2195_v12, 4  ;;  %v2377_v12 = vld [vmem:[%s2376_s5] sm:$0x1] }
 0x676   :  { %4922 = vtanh.f32 %v1789_v24  ;;  %v2227_v24 = vsel %vm1251_vm2, %v2226_v9, %v2209_v6  ;;  %v2380_v9 = vld [vmem:[%s2379_s1] sm:$0x1] }
 0x677   :  { %4924 = vtanh.f32 %v1912_v33  ;;  %v2228_v45 = vsel %vm1253_vm3, %v2227_v24, %v2212_v15  ;;  %v2386_v15 = vld [vmem:[%s2385_s22] sm:$0x1]  ;;  %s2576_s22 = scalar_lea.vmem %s6002_s6, %s3039_s3 }
 0x680   :  { %v5698_v47 = vpop.eup %4922 }
 0x681   :  { %v4925_v58 = vpop.eup %4924  ;;  %1980 = vmatprep.mubr.f32.mxu1 %v5698_v47 }
 0x682   :  { %1981 = vmatmul.mubr.f32.vlgmr.msra.gmra.mrb[18].mxu1 %v4925_v58  ;;  %2103 = vmatprep.mubr.f32.mxu0 %v4925_v58  ;;  %v2204_v58 = vld [vmem:[%s2203_s23] sm:$0x1]  ;;  %s2391_s23 = scalar_lea.vmem %s6002_s6, %s3034_s7  ;;  %s3041_s7 = sld [smem:[#allocation3 + $0x27]] }
 0x683   :  { %2104 = vmatmul.mubr.f32.vlgmr.msra.gmra.mrb[16].mxu0 %v2038_v57  ;;  %4651 = vmatpush3.bf16.msra.mxu1 %v5317_v26  ;;  %v2229_v57 = vsel %vm1255_vm4, %v2228_v45, %v2215_v38  ;;  %v2224_v0 = vrot.slane %v2204_v58, 1  ;;  %v2392_v51 = vld [vmem:[%s2391_s23] sm:$0x1]  ;;  %s3043_s23 = sld [smem:[#allocation3 + $0x37]] }
 0x684   :  { %4683 = vmatpush3.bf16.msra.mxu0 %v5263_v28  ;;  %4653 = vmatprep.subr.bf16.mxu1 %v5319_v27  ;;  %v2230_v62 = vsel %vm1257_vm5, %v2229_v57, %v2218_v54 }
 0x685   :  { %4685 = vmatprep.subr.bf16.mxu0 %v5270_v32  ;;  %v2231_v2 = vsel %vm1259_vm6, %v2230_v62, %v2221_v61  ;;  %v5830_v61 = vld [vmem:[%s6004_s8] ss:$0 sm:$0xff]  ;;  %s3038_s8 = sld [smem:[#allocation3 + $0xf]] }
 0x687   :  { %4655 = vmatpush3.bf16.msra.mxu1 %v5323_v34 }
 0x688   :  { %4687 = vmatpush3.bf16.msra.mxu0 %v5272_v36  ;;  %4657 = vmatprep.subr.bf16.mxu1 %v5326_v40 }
 0x689   :  { %4689 = vmatprep.subr.bf16.mxu0 %v5276_v42  ;;  %s2588_s3 = scalar_lea.vmem %s6002_s6, %s3043_s23 }
 0x68b   :  { %4659 = vmatpush3.bf16.msra.mxu1 %v5330_v44  ;;  %s2573_s5 = scalar_lea.vmem %s6002_s6, %s3038_s8 }
 0x68c   :  { %4691 = vmatpush3.bf16.msra.mxu0 %v5278_v46  ;;  %4661 = vmatprep.subr.bf16.mxu1 %v5333_v52 }
 0x68d   :  { %4693 = vmatprep.subr.bf16.mxu0 %v5284_v50 }
 0x68f   :  { %4663 = vmatpush3.bf16.msra.mxu1 %v5336_v55 }
 0x690   :  { %4695 = vmatpush3.bf16.msra.mxu0 %v5286_v53  ;;  %4665 = vmatprep.subr.bf16.mxu1 %v5363_v60 }
 0x691   :  { %4697 = vmatprep.subr.bf16.mxu0 %v5290_v56 }
 0x693   :  { %4667 = vmatpush3.bf16.msra.mxu1 %v5365_v63 }
 0x694   :  { %4699 = vmatpush3.bf16.msra.mxu0 %v5292_v59  ;;  %4669 = vmatprep.subr.bf16.mxu1 %v5369_v3 }
 0x695   :  { %4701 = vmatprep.subr.bf16.mxu0 %v5296_v1 }
 0x697   :  { %4671 = vmatpush3.bf16.msra.mxu1 %v5371_v8 }
 0x698   :  { %4703 = vmatpush3.bf16.msra.mxu0 %v5298_v4  ;;  %4673 = vmatprep.subr.bf16.mxu1 %v5375_v14 }
 0x699   :  { %4705 = vmatprep.subr.bf16.mxu0 %v5302_v7 }
 0x69b   :  { %4675 = vmatpush3.bf16.msra.mxu1 %v5377_v20 }
 0x69c   :  { %4707 = vmatpush3.bf16.msra.mxu0 %v5304_v10  ;;  %4677 = vmatprep.subr.bf16.mxu1 %v5379_v22 }
 0x69d   :  { %4709 = vmatprep.subr.bf16.mxu0 %v5308_v13 }
 0x69f   :  { %4679 = vmatpush3.bf16.msra.mxu1 %v5383_v29 }
 0x6a0   :  { %4711 = vmatpush3.bf16.msra.mxu0 %v5310_v16  ;;  %4713 = vmatprep.subr.bf16.mxu1 %v5315_v21 }
 0x6a1   :  { %4745 = vmatprep.subr.bf16.mxu0 %v5261_v25 }
 0x755   :  { %v3673_v11 = vpop.f32.mrb[18].mxu1 }
 0x756   :  { %v3674_v17 = vpop.f32.mrb[19].mxu1  ;;  %v3708_v23 = vpop.f32.mrb[16].mxu0 }
 0x757   :  { %v3675_v30 = vadd.f32 %v3674_v17, %v3673_v11  ;;  %v3709_v33 = vpop.f32.mrb[17].mxu0  ;;  %v2400_v11 = vrot.slane %v2380_v9, 7 }
 0x758   :  { %v3710_v35 = vadd.f32 %v3709_v33, %v3708_v23  ;;  %v2406_v33 = vrot.slane %v2386_v15, 5 }
 0x759   :  { %v1983_v43 = vadd.f32 %v3675_v30, %v5479_v41  ;;  %v2420_v23 = vsel %vm1249_vm1, %v2377_v12, %v2400_v11  ;;  %v2389_v30 = vld [vmem:[%s2388_s21] sm:$0x1]  ;;  %s3042_s21 = sld [smem:[#allocation3 + $0x2f]] }
 0x75a   :  { %v2106_v48 = vadd.f32 %v3710_v35, %v5411_v49  ;;  %v2232_v49 = vsel %vm1261_vm7, %v2231_v2, %v2224_v0  ;;  %v2409_v54 = vrot.slane %v2389_v30, 4  ;;  %v2395_v0 = vld [vmem:[%s2394_s30] sm:$0x1]  ;;  %v2412_v2 = vrot.slane %v2392_v51, 3  ;;  %s2582_s30 = scalar_lea.vmem %s6002_s6, %s3041_s7 }
 0x75b   :  { %4926 = vtanh.f32 %v1983_v43 }
 0x75c   :  { %4928 = vtanh.f32 %v2106_v48 }
 0x75f   :  { %s2585_s1 = scalar_lea.vmem %s6002_s6, %s3042_s21 }
 0x765   :  { %v5766_v5 = vpop.eup %4926 }
 0x766   :  { %v4929_v6 = vpop.eup %4928  ;;  %2174 = vmatprep.mubr.f32.mxu1 %v5766_v5 }
 0x767   :  { %2175 = vmatmul.mubr.f32.vlgmr.msra.gmra.mrb[20].mxu1 %v4929_v6  ;;  %2297 = vmatprep.mubr.f32.mxu0 %v4929_v6  ;;  %v2415_v6 = vrot.slane %v2395_v0, 2  ;;  %v2763_v0 = vld [vmem:[#allocation9] sm:$0xff] }
 0x768   :  { %2298 = vmatmul.mubr.f32.vlgmr.msra.gmra.mrb[18].mxu0 %v2232_v49  ;;  %4715 = vmatpush3.bf16.msra.mxu1 %v5317_v26 }
 0x769   :  { %4747 = vmatpush3.bf16.msra.mxu0 %v5263_v28  ;;  %4717 = vmatprep.subr.bf16.mxu1 %v5319_v27 }
 0x76a   :  { %4749 = vmatprep.subr.bf16.mxu0 %v5270_v32 }
 0x76c   :  { %4719 = vmatpush3.bf16.msra.mxu1 %v5323_v34 }
 0x76d   :  { %4751 = vmatpush3.bf16.msra.mxu0 %v5272_v36  ;;  %4721 = vmatprep.subr.bf16.mxu1 %v5326_v40 }
 0x76e   :  { %4753 = vmatprep.subr.bf16.mxu0 %v5276_v42 }
 0x770   :  { %4723 = vmatpush3.bf16.msra.mxu1 %v5330_v44 }
 0x771   :  { %4755 = vmatpush3.bf16.msra.mxu0 %v5278_v46  ;;  %4725 = vmatprep.subr.bf16.mxu1 %v5333_v52 }
 0x772   :  { %4757 = vmatprep.subr.bf16.mxu0 %v5284_v50 }
 0x774   :  { %4727 = vmatpush3.bf16.msra.mxu1 %v5336_v55 }
 0x775   :  { %4759 = vmatpush3.bf16.msra.mxu0 %v5286_v53  ;;  %4729 = vmatprep.subr.bf16.mxu1 %v5363_v60 }
 0x776   :  { %4761 = vmatprep.subr.bf16.mxu0 %v5290_v56 }
 0x778   :  { %4731 = vmatpush3.bf16.msra.mxu1 %v5365_v63 }
 0x779   :  { %4763 = vmatpush3.bf16.msra.mxu0 %v5292_v59  ;;  %4733 = vmatprep.subr.bf16.mxu1 %v5369_v3 }
 0x77a   :  { %4765 = vmatprep.subr.bf16.mxu0 %v5296_v1 }
 0x77c   :  { %4735 = vmatpush3.bf16.msra.mxu1 %v5371_v8 }
 0x77d   :  { %4767 = vmatpush3.bf16.msra.mxu0 %v5298_v4  ;;  %4737 = vmatprep.subr.bf16.mxu1 %v5375_v14 }
 0x77e   :  { %4769 = vmatprep.subr.bf16.mxu0 %v5302_v7 }
 0x780   :  { %4739 = vmatpush3.bf16.msra.mxu1 %v5377_v20 }
 0x781   :  { %4771 = vmatpush3.bf16.msra.mxu0 %v5304_v10  ;;  %4741 = vmatprep.subr.bf16.mxu1 %v5379_v22 }
 0x782   :  { %4773 = vmatprep.subr.bf16.mxu0 %v5308_v13 }
 0x784   :  { %4743 = vmatpush3.bf16.msra.mxu1 %v5383_v29 }
 0x785   :  { %4775 = vmatpush3.bf16.msra.mxu0 %v5310_v16  ;;  %4777 = vmatprep.subr.bf16.mxu1 %v5315_v21 }
 0x786   :  { %4809 = vmatprep.subr.bf16.mxu0 %v5261_v25  ;;  %v2383_v25 = vld [vmem:[%s2382_s18] sm:$0x1]  ;;  %s3040_s18 = sld [smem:[#allocation3 + $0x1f]] }
 0x787   :  { %v2403_v17 = vrot.slane %v2383_v25, 6 }
 0x789   :  { %v2421_v38 = vsel %vm1251_vm2, %v2420_v23, %v2403_v17 }
 0x78a   :  { %v2422_v58 = vsel %vm1253_vm3, %v2421_v38, %v2406_v33  ;;  %v5901_v33 = vld [vmem:[%s6006_s10] ss:$0 sm:$0xff] }
 0x78b   :  { %v2423_v49 = vsel %vm1255_vm4, %v2422_v58, %v2409_v54 }
 0x78c   :  { %v2424_v9 = vsel %vm1257_vm5, %v2423_v49, %v2412_v2  ;;  %s2579_s25 = scalar_lea.vmem %s6002_s6, %s3040_s18  ;;  %v2764_v2 = vld [vmem:[#allocation9 + $0x8] sm:$0xff] }
 0x78d   :  { %v2425_v11 = vsel %vm1259_vm6, %v2424_v9, %v2415_v6  ;;  %v4873_v6 = vpack.c.bf16 %v2764_v2, %v2763_v0 }
 0x83a   :  { %v3743_v24 = vpop.f32.mrb[20].mxu1 }
 0x83b   :  { %v3744_v35 = vpop.f32.mrb[21].mxu1  ;;  %v3778_v37 = vpop.f32.mrb[18].mxu0 }
 0x83c   :  { %v3745_v43 = vadd.f32 %v3744_v35, %v3743_v24  ;;  %v3779_v45 = vpop.f32.mrb[19].mxu0  ;;  %v2586_v24 = vld [vmem:[%s2585_s1] sm:$0x1] }
 0x83d   :  { %v3780_v48 = vadd.f32 %v3779_v45, %v3778_v37  ;;  %v2606_v45 = vrot.slane %v2586_v24, 3 }
 0x83e   :  { %v2177_v57 = vadd.f32 %v3745_v43, %v5479_v41  ;;  %v2398_v41 = vld [vmem:[%s2397_s0] sm:$0x1] }
 0x83f   :  { %v2300_v62 = vadd.f32 %v5830_v61, %v3780_v48  ;;  %v2418_v25 = vrot.slane %v2398_v41, 1  ;;  %v2589_v43 = vld [vmem:[%s2588_s3] sm:$0x1] }
 0x840   :  { %4930 = vtanh.f32 %v2177_v57  ;;  %v2609_v54 = vrot.slane %v2589_v43, 2 }
 0x841   :  { %4932 = vtanh.f32 %v2300_v62  ;;  %v2426_v15 = vsel %vm1261_vm7, %v2425_v11, %v2418_v25  ;;  %v2765_v25 = vld [vmem:[#allocation9 + $0x10] sm:$0xff]  ;;  %v2766_v11 = vld [vmem:[#allocation9 + $0x18] sm:$0xff] }
 0x84a   :  { %v5839_v12 = vpop.eup %4930 }
 0x84b   :  { %v4933_v17 = vpop.eup %4932  ;;  %2368 = vmatprep.mubr.f32.mxu1 %v5839_v12 }
 0x84c   :  { %2369 = vmatmul.mubr.f32.vlgmr.msra.gmra.mrb[22].mxu1 %v4933_v17  ;;  %2491 = vmatprep.mubr.f32.mxu0 %v4933_v17  ;;  %v2767_v17 = vld [vmem:[#allocation9 + $0x20] sm:$0xff] }
 0x84d   :  { %2492 = vmatmul.mubr.f32.vlgmr.msra.gmra.mrb[20].mxu0 %v2426_v15  ;;  %4779 = vmatpush3.bf16.msra.mxu1 %v5317_v26  ;;  %v4876_v15 = vpack.c.bf16 %v2766_v11, %v2765_v25 }
 0x84e   :  { %4811 = vmatpush3.bf16.msra.mxu0 %v5263_v28  ;;  %4781 = vmatprep.subr.bf16.mxu1 %v5319_v27  ;;  %v5062_v28 = vmov 0.0|0.0  }
 0x84f   :  { %4813 = vmatprep.subr.bf16.mxu0 %v5270_v32  ;;  %v2574_v32 = vld [vmem:[%s2573_s5] sm:$0x1]  ;;  %s2591_s5 = scalar_lea.vmem %s6002_s6, %s3044_s15 }
 0x850   :  { %v2592_v51 = vld [vmem:[%s2591_s5] sm:$0x1] }
 0x851   :  { %4783 = vmatpush3.bf16.msra.mxu1 %v5323_v34  ;;  %v2612_v58 = vrot.slane %v2592_v51, 1 }
 0x852   :  { %4815 = vmatpush3.bf16.msra.mxu0 %v5272_v36  ;;  %4785 = vmatprep.subr.bf16.mxu1 %v5326_v40  ;;  %v2577_v36 = vld [vmem:[%s2576_s22] sm:$0x1] }
 0x853   :  { %4817 = vmatprep.subr.bf16.mxu0 %v5276_v42  ;;  %v2594_v42 = vrot.slane %v2574_v32, 7  ;;  %v2768_v32 = vld [vmem:[#allocation9 + $0x28] sm:$0xff] }
 0x855   :  { %4787 = vmatpush3.bf16.msra.mxu1 %v5330_v44 }
 0x856   :  { %4819 = vmatpush3.bf16.msra.mxu0 %v5278_v46  ;;  %4789 = vmatprep.subr.bf16.mxu1 %v5333_v52  ;;  %v2571_v46 = vld [vmem:[%s2570_s9] sm:$0x1] }
 0x857   :  { %4821 = vmatprep.subr.bf16.mxu0 %v5284_v50  ;;  %v2580_v50 = vld [vmem:[%s2579_s25] sm:$0x1] }
 0x859   :  { %4791 = vmatpush3.bf16.msra.mxu1 %v5336_v55 }
 0x85a   :  { %4823 = vmatpush3.bf16.msra.mxu0 %v5286_v53  ;;  %4793 = vmatprep.subr.bf16.mxu1 %v5363_v60  ;;  %v2597_v53 = vrot.slane %v2577_v36, 6  ;;  %v4879_v36 = vpack.c.bf16 %v2768_v32, %v2767_v17 }
 0x85b   :  { %4825 = vmatprep.subr.bf16.mxu0 %v5290_v56  ;;  %v2614_v56 = vsel %vm1249_vm1, %v2571_v46, %v2594_v42  ;;  %v2770_v42 = vld [vmem:[#allocation9 + $0x38] sm:$0xff] }
 0x85d   :  { %4795 = vmatpush3.bf16.msra.mxu1 %v5365_v63 }
 0x85e   :  { %4827 = vmatpush3.bf16.msra.mxu0 %v5292_v59  ;;  %4797 = vmatprep.subr.bf16.mxu1 %v5369_v3 }
 0x85f   :  { %4829 = vmatprep.subr.bf16.mxu0 %v5296_v1  ;;  %v2583_v1 = vld [vmem:[%s2582_s30] sm:$0x1] }
 0x860   :  { %v2603_v30 = vrot.slane %v2583_v1, 4 }
 0x861   :  { %4799 = vmatpush3.bf16.msra.mxu1 %v5371_v8 }
 0x862   :  { %4831 = vmatpush3.bf16.msra.mxu0 %v5298_v4  ;;  %4801 = vmatprep.subr.bf16.mxu1 %v5375_v14  ;;  %v2600_v4 = vrot.slane %v2580_v50, 5  ;;  %v2771_v50 = vld [vmem:[#allocation9 + $0x40] sm:$0xff] }
 0x863   :  { %4833 = vmatprep.subr.bf16.mxu0 %v5302_v7 }
 0x865   :  { %4803 = vmatpush3.bf16.msra.mxu1 %v5377_v20 }
 0x866   :  { %4835 = vmatpush3.bf16.msra.mxu0 %v5304_v10  ;;  %4805 = vmatprep.subr.bf16.mxu1 %v5379_v22 }
 0x867   :  { %4837 = vmatprep.subr.bf16.mxu0 %v5308_v13  ;;  %v2615_v13 = vsel %vm1251_vm2, %v2614_v56, %v2597_v53  ;;  %v2774_v53 = vld [vmem:[#allocation9 + $0x58] sm:$0xff]  ;;  %v2776_v56 = vld [vmem:[#allocation9 + $0x68] sm:$0xff] }
 0x868   :  { %v2616_v37 = vsel %vm1253_vm3, %v2615_v13, %v2600_v4 }
 0x869   :  { %4807 = vmatpush3.bf16.msra.mxu1 %v5383_v29  ;;  %v2617_v48 = vsel %vm1255_vm4, %v2616_v37, %v2603_v30 }
 0x86a   :  { %4839 = vmatpush3.bf16.msra.mxu0 %v5310_v16  ;;  %4841 = vmatprep.subr.bf16.mxu1 %v5315_v21  ;;  %v2618_v57 = vsel %vm1257_vm5, %v2617_v48, %v2606_v45 }
 0x86b   :  { %4872 = vmatprep.subr.bf16.mxu0 %v5062_v28  ;;  %v2619_v62 = vsel %vm1259_vm6, %v2618_v57, %v2609_v54 }
 0x86c   :  { %v2620_v41 = vsel %vm1261_vm7, %v2619_v62, %v2612_v58 }
 0x91f   :  { %v3813_v59 = vpop.f32.mrb[22].mxu1 }
 0x920   :  { %v3814_v7 = vpop.f32.mrb[23].mxu1  ;;  %v3848_v10 = vpop.f32.mrb[20].mxu0 }
 0x921   :  { %v3815_v16 = vadd.f32 %v3814_v7, %v3813_v59  ;;  %v3849_v21 = vpop.f32.mrb[21].mxu0  ;;  %v2778_v59 = vld [vmem:[#allocation9 + $0x78] sm:$0xff] }
 0x922   :  { %v3850_v23 = vadd.f32 %v3849_v21, %v3848_v10 }
 0x923   :  { %v2371_v35 = vadd.f32 %v5901_v33, %v3815_v16 }
 0x924   :  { %v2494_v38 = vadd.f32 %v5830_v61, %v3850_v23 }
 0x925   :  { %4934 = vtanh.f32 %v2371_v35 }
 0x926   :  { %4936 = vtanh.f32 %v2494_v38 }
 0x92f   :  { %v5912_v49 = vpop.eup %4934 }
 0x930   :  { %v4937_v9 = vpop.eup %4936  ;;  %2562 = vmatprep.mubr.f32.mxu1 %v5912_v49 }
 0x931   :  { %2563 = vmatmul.mubr.f32.vlgmr.msra.gmra.mrb[24].mxu1 %v4937_v9  ;;  %2685 = vmatprep.mubr.f32.mxu0 %v4937_v9 }
 0x932   :  { %2686 = vmatmul.mubr.f32.vlgmr.msra.gmra.mrb[22].mxu0 %v2620_v41  ;;  %4843 = vmatpush3.bf16.msra.mxu1 %v5317_v26  ;;  %v2769_v26 = vld [vmem:[#allocation9 + $0x30] sm:$0xff] }
 0x933   :  { %4874 = vmatpush3.bf16.msra.mxu0 %v4873_v6  ;;  %4013 = vmatprep.mubr.msk.f32.mxu0 %vm5063_vm8, %v5061_v19  ;;  %v4882_v46 = vpack.c.bf16 %v2770_v42, %v2769_v26 }
 0x934   :  { %4875 = vmatprep.subr.bf16.mxu0 %v5062_v28  ;;  %4845 = vmatprep.subr.bf16.mxu1 %v5319_v27  ;;  %v2772_v27 = vld [vmem:[#allocation9 + $0x48] sm:$0xff] }
 0x936   :  { %4847 = vmatpush3.bf16.msra.mxu1 %v5323_v34  ;;  %v4885_v34 = vpack.c.bf16 %v2772_v27, %v2771_v50 }
 0x937   :  { %4877 = vmatpush3.bf16.msra.mxu0 %v4876_v15  ;;  %4849 = vmatprep.subr.bf16.mxu1 %v5326_v40  ;;  %v2773_v40 = vld [vmem:[#allocation9 + $0x50] sm:$0xff] }
 0x938   :  { %4878 = vmatprep.subr.bf16.mxu0 %v5062_v28 }
 0x93a   :  { %4851 = vmatpush3.bf16.msra.mxu1 %v5330_v44  ;;  %v4888_v44 = vpack.c.bf16 %v2774_v53, %v2773_v40 }
 0x93b   :  { %4880 = vmatpush3.bf16.msra.mxu0 %v4879_v36  ;;  %4853 = vmatprep.subr.bf16.mxu1 %v5333_v52  ;;  %v2775_v52 = vld [vmem:[#allocation9 + $0x60] sm:$0xff] }
 0x93c   :  { %4881 = vmatprep.subr.bf16.mxu0 %v5062_v28 }
 0x93e   :  { %4855 = vmatpush3.bf16.msra.mxu1 %v5336_v55  ;;  %v4891_v55 = vpack.c.bf16 %v2776_v56, %v2775_v52 }
 0x93f   :  { %4883 = vmatpush3.bf16.msra.mxu0 %v4882_v46  ;;  %4857 = vmatprep.subr.bf16.mxu1 %v5363_v60  ;;  %v2777_v60 = vld [vmem:[#allocation9 + $0x70] sm:$0xff] }
 0x940   :  { %4884 = vmatprep.subr.bf16.mxu0 %v5062_v28 }
 0x942   :  { %4859 = vmatpush3.bf16.msra.mxu1 %v5365_v63  ;;  %v4894_v63 = vpack.c.bf16 %v2778_v59, %v2777_v60 }
 0x943   :  { %4886 = vmatpush3.bf16.msra.mxu0 %v4885_v34  ;;  %4861 = vmatprep.subr.bf16.mxu1 %v5369_v3 }
 0x944   :  { %4887 = vmatprep.subr.bf16.mxu0 %v5062_v28 }
 0x946   :  { %4863 = vmatpush3.bf16.msra.mxu1 %v5371_v8 }
 0x947   :  { %4889 = vmatpush3.bf16.msra.mxu0 %v4888_v44  ;;  %4865 = vmatprep.subr.bf16.mxu1 %v5375_v14 }
 0x948   :  { %4890 = vmatprep.subr.bf16.mxu0 %v5062_v28 }
 0x94a   :  { %4867 = vmatpush3.bf16.msra.mxu1 %v5377_v20 }
 0x94b   :  { %4892 = vmatpush3.bf16.msra.mxu0 %v4891_v55  ;;  %4869 = vmatprep.subr.bf16.mxu1 %v5379_v22 }
 0x94c   :  { %4893 = vmatprep.subr.bf16.mxu0 %v5062_v28 }
 0x94e   :  { %4871 = vmatpush3.bf16.msra.mxu1 %v5383_v29 }
 0x94f   :  { %4895 = vmatpush3.bf16.msra.mxu0 %v4894_v63 }
 0x952   :  { %4014 = vmatmul.mubr.f32.vlgmr.msra.gmra.mrb[24].mxu0 %v5494_v18 }
 0x953   :  { %4016 = vmatprep.mubr.msk.f32.mxu0 %vm5063_vm8, %v5061_v19 }
 0x956   :  { %4017 = vmatmul.mubr.f32.gmra.mrb[26].mxu0 %v5562_v31 }
 0x957   :  { %4019 = vmatprep.mubr.msk.f32.mxu0 %vm5063_vm8, %v5061_v19 }
 0x95a   :  { %4020 = vmatmul.mubr.f32.gmra.mrb[28].mxu0 %v5630_v39 }
 0x95b   :  { %4022 = vmatprep.mubr.msk.f32.mxu0 %vm5063_vm8, %v5061_v19 }
 0x95e   :  { %4023 = vmatmul.mubr.f32.gmra.mrb[30].mxu0 %v5698_v47 }
 0x95f   :  { %4025 = vmatprep.mubr.msk.f32.mxu0 %vm5063_vm8, %v5061_v19 }
 0x962   :  { %4026 = vmatmul.mubr.f32.gmra.mrb[32].mxu0 %v5766_v5  ;;  %v3045_v5 = vld [vmem:[%s6008_s12] ss:$0 sm:$0xff] }
 0x963   :  { %4028 = vmatprep.mubr.msk.f32.mxu0 %vm5063_vm8, %v5061_v19 }
 0x966   :  { %4029 = vmatmul.mubr.f32.gmra.mrb[34].mxu0 %v5839_v12 }
 0x967   :  { %4031 = vmatprep.mubr.msk.f32.mxu0 %vm5063_vm8, %v5061_v19 }
 0x96a   :  { %4032 = vmatmul.mubr.f32.gmra.mrb[36].mxu0 %v5912_v49 }
 0x96b   :  { %4034 = vmatprep.mubr.msk.f32.mxu0 %vm5063_vm8, %v5061_v19 }
 0xa04   :  { %v3883_v3 = vpop.f32.mrb[24].mxu1 }
 0xa05   :  { %v3884_v8 = vpop.f32.mrb[25].mxu1  ;;  %v3918_v14 = vpop.f32.mrb[22].mxu0 }
 0xa06   :  { %v3885_v20 = vadd.f32 %v3884_v8, %v3883_v3  ;;  %v3919_v22 = vpop.f32.mrb[23].mxu0 }
 0xa07   :  { %v3920_v29 = vadd.f32 %v3919_v22, %v3918_v14 }
 0xa08   :  { %v2565_v18 = vadd.f32 %v5901_v33, %v3885_v20 }
 0xa09   :  { %v2688_v31 = vadd.f32 %v5830_v61, %v3920_v29 }
 0xa0a   :  { %4938 = vtanh.f32 %v2565_v18 }
 0xa0b   :  { %4940 = vtanh.f32 %v2688_v31 }
 0xa14   :  { %v4939_v39 = vpop.eup %4938 }
 0xa15   :  { %v4941_v47 = vpop.eup %4940  ;;  %2756 = vmatprep.mubr.f32.mxu1 %v4939_v39  ;;  %4035 = vmatmul.mubr.f32.gmra.mrb[38].mxu0 %v4939_v39 }
 0xa16   :  { %2757 = vmatmul.mubr.f32.vlgmr.msra.gmra.mrb[26].mxu1 %v4941_v47  ;;  %4037 = vmatprep.mubr.msk.f32.mxu0 %vm5063_vm8, %v5061_v19 }
 0xa25   :  { %v2852_v12 = vpop.f32.mrb[24].mxu0 }
 0xa26   :  { %v2853_v28 = vadd.f32 %v3045_v5, %v2852_v12  ;;  %v4015_v1 = vpop.f32.mrb[25].mxu0 }
 0xa28   :  { %2896 = vst [vmem:[%s6009_s13] sm:$0xff] %v2853_v28 }
 0xa29   :  { %v2857_v61 = vpop.f32.mrb[26].mxu0 }
 0xa2a   :  { %v2858_v4 = vadd.f32 %v3045_v5, %v2857_v61  ;;  %v4018_v7 = vpop.f32.mrb[27].mxu0 }
 0xa2c   :  { %2897 = vst [vmem:[%s6009_s13 + $0x8] sm:$0xff] %v2858_v4 }
 0xa2d   :  { %v2862_v10 = vpop.f32.mrb[28].mxu0 }
 0xa2e   :  { %v2863_v19 = vadd.f32 %v3045_v5, %v2862_v10  ;;  %v4021_v13 = vpop.f32.mrb[29].mxu0 }
 0xa30   :  { %2898 = vst [vmem:[%s6009_s13 + $0x10] sm:$0xff] %v2863_v19 }
 0xa31   :  { %v2867_v16 = vpop.f32.mrb[30].mxu0 }
 0xa32   :  { %v2868_v21 = vadd.f32 %v3045_v5, %v2867_v16  ;;  %v4024_v23 = vpop.f32.mrb[31].mxu0 }
 0xa34   :  { %2899 = vst [vmem:[%s6009_s13 + $0x18] sm:$0xff] %v2868_v21 }
 0xa35   :  { %v2872_v24 = vpop.f32.mrb[32].mxu0 }
 0xa36   :  { %v2873_v30 = vadd.f32 %v3045_v5, %v2872_v24  ;;  %v4027_v35 = vpop.f32.mrb[33].mxu0 }
 0xa38   :  { %2900 = vst [vmem:[%s6009_s13 + $0x20] sm:$0xff] %v2873_v30 }
 0xa39   :  { %v2877_v37 = vpop.f32.mrb[34].mxu0 }
 0xa3a   :  { %v2878_v38 = vadd.f32 %v3045_v5, %v2877_v37  ;;  %v4030_v43 = vpop.f32.mrb[35].mxu0 }
 0xa3c   :  { %2901 = vst [vmem:[%s6009_s13 + $0x28] sm:$0xff] %v2878_v38 }
 0xa3d   :  { %v2882_v45 = vpop.f32.mrb[36].mxu0 }
 0xa3e   :  { %v2883_v48 = vadd.f32 %v3045_v5, %v2882_v45  ;;  %v4033_v51 = vpop.f32.mrb[37].mxu0 }
 0xa40   :  { %2902 = vst [vmem:[%s6009_s13 + $0x30] sm:$0xff] %v2883_v48 }
 0xae8   :  { %v2887_v54 = vpop.f32.mrb[38].mxu0 }
 0xae9   :  { %v2888_v57 = vadd.f32 %v3045_v5, %v2887_v54  ;;  %v3953_v58 = vpop.f32.mrb[26].mxu1  ;;  %v4036_v62 = vpop.f32.mrb[39].mxu0 }
 0xaea   :  { %v3954_v0 = vpop.f32.mrb[27].mxu1 }
 0xaeb   :  { %2903 = vst [vmem:[%s6009_s13 + $0x38] sm:$0xff] %v2888_v57  ;;  %v3955_v2 = vadd.f32 %v3954_v0, %v3953_v58 }
 0xaed   :  { %v2759_v49 = vadd.f32 %v5901_v33, %v3955_v2 }
 0xaef   :  { %4942 = vtanh.f32 %v2759_v49 }
 0xaf9   :  { %v4943_v41 = vpop.eup %4942 }
 0xafa   :  { %4038 = vmatmul.mubr.f32.gmra.mrb[40].mxu0 %v4943_v41 }
 0xbcd   :  { %v2892_v6 = vpop.f32.mrb[40].mxu0 }
 0xbce   :  { %v2893_v9 = vadd.f32 %v3045_v5, %v2892_v6  ;;  %v4039_v25 = vpop.f32.mrb[41].mxu0 }
 0xbd0   :  { %2904 = vst [vmem:[%s6009_s13 + $0x40] sm:$0xff] %v2893_v9 }
 0xbd1   :  { %2909 = vsyncpa [#allocation5], 1 }
 0xbd2   :  { %2910 = vsyncpa [#allocation7], 1 }
 0xbd3   :  { %2911 = vsyncpa [#allocation10], 1 }

</bundles_post_ra>
